<compile_context>
chip_gen: v7x
topology: tpu7x:2x2x1
jax: 0.10.0
libtpu: 0.0.40
codegen_flags: <defaults>
</compile_context>

<pallas_src>
import math
from functools import partial

import numpy as np
import jax
import jax.numpy as jnp
from jax.experimental import pallas as pl
from jax.experimental.pallas import tpu as pltpu

_EPS = 1e-5  # PyTorch layer_norm_eps default


# ---------------------------------------------------------------------------
# Positional encoding table (built once, plain numpy/JAX)
# ---------------------------------------------------------------------------
def positional_encoding_table(max_len, d_model):
    pos = np.arange(max_len, dtype=np.float32)[:, None]                       # (L, 1)
    div = np.exp(np.arange(0, d_model, 2, dtype=np.float32)
                 * -(np.log(10000.0) / d_model))                              # (D/2,)
    enc = np.zeros((max_len, d_model), dtype=np.float32)
    enc[:, 0::2] = np.sin(pos * div)
    enc[:, 1::2] = np.cos(pos * div)
    return jnp.asarray(enc)                                                   # (L, D)


# ---------------------------------------------------------------------------
# Pallas kernels
# ---------------------------------------------------------------------------
def _layer_norm(y, g, beta):
    mu = jnp.mean(y, axis=-1, keepdims=True)
    var = jnp.mean((y - mu) * (y - mu), axis=-1, keepdims=True)
    return (y - mu) * jax.lax.rsqrt(var + _EPS) * g + beta


def _attn_block_kernel(xq_ref, xkv_ref, wq_ref, bq_ref, wk_ref, bk_ref,
                       wv_ref, bv_ref, wo_ref, bo_ref, g_ref, beta_ref,
                       o_ref, *, B, Tq, Tk, H, Dh, scale):
    """Fused MHA block: out = LN(xq + OutProj(MHA(Q(xq), K(xkv), V(xkv))))."""
    f32 = jnp.float32
    xq = xq_ref[...]                                        # (B*Tq, D) batch-major
    xkv = xkv_ref[...]                                      # (B*Tk, D) batch-major

    # Single batched projections on the MXU, bias folded next to the matmul.
    q = jnp.dot(xq, wq_ref[...], preferred_element_type=f32) + bq_ref[...]
    k = jnp.dot(xkv, wk_ref[...], preferred_element_type=f32) + bk_ref[...]
    v = jnp.dot(xkv, wv_ref[...], preferred_element_type=f32) + bv_ref[...]

    # Per-(batch, head) attention; B*H is tiny here so the loop is statically
    # unrolled (would become a grid axis at production sizes).
    batch_blocks = []
    for b in range(B):
        qb = q[b * Tq:(b + 1) * Tq, :]                      # (Tq, D)
        kb = k[b * Tk:(b + 1) * Tk, :]                      # (Tk, D)
        vb = v[b * Tk:(b + 1) * Tk, :]
        head_blocks = []
        for h in range(H):
            qh = qb[:, h * Dh:(h + 1) * Dh]                 # (Tq, Dh)
            kh = kb[:, h * Dh:(h + 1) * Dh]                 # (Tk, Dh)
            vh = vb[:, h * Dh:(h + 1) * Dh]                 # (Tk, Dh)
            s = jnp.einsum('qd,kd->qk', qh, kh,
                           preferred_element_type=f32) * scale      # (Tq, Tk)
            s = s - jnp.max(s, axis=-1, keepdims=True)
            p = jnp.exp(s)
            p = p / jnp.sum(p, axis=-1, keepdims=True)
            head_blocks.append(
                jnp.dot(p, vh, preferred_element_type=f32))          # (Tq, Dh)
        batch_blocks.append(jnp.concatenate(head_blocks, axis=1))    # (Tq, D)
    ctx = jnp.concatenate(batch_blocks, axis=0)                      # (B*Tq, D)

    attn = jnp.dot(ctx, wo_ref[...], preferred_element_type=f32) + bo_ref[...]
    o_ref[...] = _layer_norm(xq + attn, g_ref[...], beta_ref[...])


def _ffn_block_kernel(x_ref, w1_ref, b1_ref, w2_ref, b2_ref, g_ref, beta_ref,
                      o_ref):
    """Fused FFN block: out = LN(x + W2 @ relu(W1 @ x + b1) + b2)."""
    f32 = jnp.float32
    x = x_ref[...]                                                   # (B*T, D)
    h = jnp.dot(x, w1_ref[...], preferred_element_type=f32) + b1_ref[...]
    h = jnp.maximum(h, 0.0)                                          # ReLU
    f = jnp.dot(h, w2_ref[...], preferred_element_type=f32) + b2_ref[...]
    o_ref[...] = _layer_norm(x + f, g_ref[...], beta_ref[...])


# ---------------------------------------------------------------------------
# pallas_call wrappers
# ---------------------------------------------------------------------------
_VMEM = pl.BlockSpec(memory_space=pltpu.MemorySpace.VMEM)


def attn_block(xq, xkv, weights, ln_params, *, B, Tq, Tk, H):
    wq, bq, wk, bk, wv, bv, wo, bo = weights
    g, beta = ln_params
    D = xq.shape[-1]
    Dh = D // H
    kernel = partial(_attn_block_kernel, B=B, Tq=Tq, Tk=Tk, H=H, Dh=Dh,
                     scale=1.0 / math.sqrt(Dh))
    return pl.pallas_call(
        kernel,
        out_shape=jax.ShapeDtypeStruct((B * Tq, D), jnp.float32),
        in_specs=[_VMEM] * 12,
        out_specs=_VMEM,
    )(xq, xkv, wq, bq, wk, bk, wv, bv, wo, bo, g, beta)


def ffn_block(x, ffn_weights, ln_params):
    w1, b1, w2, b2 = ffn_weights
    g, beta = ln_params
    M, D = x.shape
    return pl.pallas_call(
        _ffn_block_kernel,
        out_shape=jax.ShapeDtypeStruct((M, D), jnp.float32),
        in_specs=[_VMEM] * 7,
        out_specs=_VMEM,
    )(x, w1, b1, w2, b2, g, beta)


# ---------------------------------------------------------------------------
# Full TransformerDecoder forward (PE add + layout glue in JAX, compute in Pallas)
# ---------------------------------------------------------------------------
def transformer_decoder_forward(tgt, memory, params, *, nhead):
    T, B, D = tgt.shape
    S = memory.shape[0]

    # PositionalEncoding.forward: x + encoding[:T]  (cheap elementwise glue)
    x = tgt + params['pe'][:T][:, None, :]

    # batch-major 2-D slabs for the kernels: row index = b*T + t
    xb = jnp.transpose(x, (1, 0, 2)).reshape(B * T, D)
    mb = jnp.transpose(memory, (1, 0, 2)).reshape(B * S, D)

    for lp in params['layers']:
        xb = attn_block(xb, xb, lp['self'], lp['ln1'], B=B, Tq=T, Tk=T, H=nhead)
        xb = attn_block(xb, mb, lp['cross'], lp['ln2'], B=B, Tq=T, Tk=S, H=nhead)
        xb = ffn_block(xb, lp['ffn'], lp['ln3'])

    return xb.reshape(B, T, D).transpose(1, 0, 2)                    # (T, B, D)


# ---------------------------------------------------------------------------
# Parameter init (deterministic; weights stored as (in, out): y = x @ W + b)
# ---------------------------------------------------------------------------
def init_transformer_params(key, d_model, nhead, num_layers,
                            dim_feedforward=2048, max_len=5000):
    D, F = d_model, dim_feedforward

    def dense(k, din, dout):
        kw, kb = jax.random.split(k)
        w = jax.random.normal(kw, (din, dout), jnp.float32) / np.sqrt(din)
        b = 0.02 * jax.random.normal(kb, (1, dout), jnp.float32)
        return w.astype(jnp.float32), b.astype(jnp.float32)

    def ln(k):
        kg, kb = jax.random.split(k)
        g = 1.0 + 0.1 * jax.random.normal(kg, (1, D), jnp.float32)
        b = 0.1 * jax.random.normal(kb, (1, D), jnp.float32)
        return g.astype(jnp.float32), b.astype(jnp.float32)

    layers = []
    for _ in range(num_layers):
        key, *ks = jax.random.split(key, 14)
        wq_s, bq_s = dense(ks[0], D, D); wk_s, bk_s = dense(ks[1], D, D)
        wv_s, bv_s = dense(ks[2], D, D); wo_s, bo_s = dense(ks[3], D, D)
        wq_c, bq_c = dense(ks[4], D, D); wk_c, bk_c = dense(ks[5], D, D)
        wv_c, bv_c = dense(ks[6], D, D); wo_c, bo_c = dense(ks[7], D, D)
        w1, b1 = dense(ks[8], D, F); w2, b2 = dense(ks[9], F, D)
        layers.append(dict(
            self=(wq_s, bq_s, wk_s, bk_s, wv_s, bv_s, wo_s, bo_s),
            cross=(wq_c, bq_c, wk_c, bk_c, wv_c, bv_c, wo_c, bo_c),
            ffn=(w1, b1, w2, b2),
            ln1=ln(ks[10]), ln2=ln(ks[11]), ln3=ln(ks[12]),
        ))
    return dict(layers=layers, pe=positional_encoding_table(max_len, D))


# ---------------------------------------------------------------------------
# Pure-JAX reference (same math, standard XLA ops) for the self-check
# ---------------------------------------------------------------------------
def reference_forward(tgt, memory, params, *, nhead):
    T, B, D = tgt.shape
    H = nhead
    Dh = D // H
    x = tgt + params['pe'][:T][:, None, :]

    def mha(xq, xkv, w):
        wq, bq, wk, bk, wv, bv, wo, bo = w
        Tq = xq.shape[0]
        q = xq @ wq + bq[0]
        k = xkv @ wk + bk[0]
        v = xkv @ wv + bv[0]
        split = lambda a: a.reshape(a.shape[0], B, H, Dh).transpose(1, 2, 0, 3)
        qh, kh, vh = split(q), split(k), split(v)                   # (B,H,T,Dh)
        s = jnp.einsum('bhqd,bhkd->bhqk', qh, kh) / np.sqrt(Dh)
        p = jax.nn.softmax(s, axis=-1)
        o = jnp.einsum('bhqk,bhkd->bhqd', p, vh)
        o = o.transpose(2, 0, 1, 3).reshape(Tq, B, D)
        return o @ wo + bo[0]

    def layer_norm(y, g, b):
        mu = y.mean(-1, keepdims=True)
        var = ((y - mu) ** 2).mean(-1, keepdims=True)
        return (y - mu) / jnp.sqrt(var + _EPS) * g[0] + b[0]

    for lp in params['layers']:
        x = layer_norm(x + mha(x, x, lp['self']), *lp['ln1'])
        x = layer_norm(x + mha(x, memory, lp['cross']), *lp['ln2'])
        w1, b1, w2, b2 = lp['ffn']
        ff = jnp.maximum(x @ w1 + b1[0], 0.0) @ w2 + b2[0]
        x = layer_norm(x + ff, *lp['ln3'])
    return x


# ---------------------------------------------------------------------------
# Demo / self-check
# ---------------------------------------------------------------------------
if __name__ == "__main__":
    key = jax.random.PRNGKey(0)
    k_par, k_tgt, k_mem = jax.random.split(key, 3)

    feature_size, nhead, num_layers = 32, 4, 2
    dim_feedforward = 2048          # PyTorch nn.TransformerDecoderLayer default
    T, S, B = 8, 16, 2              # tgt seq, memory seq, batch

    params = init_transformer_params(k_par, feature_size, nhead, num_layers,
                                     dim_feedforward)
    tgt = jax.random.normal(k_tgt, (T, B, feature_size), jnp.float32)
    memory = jax.random.normal(k_mem, (S, B, feature_size), jnp.float32)

    fwd = jax.jit(transformer_decoder_forward, static_argnames=("nhead",))
    out = jax.block_until_ready(fwd(tgt, memory, params, nhead=nhead))
    assert out.shape == (T, B, feature_size)

    ref = jax.block_until_ready(reference_forward(tgt, memory, params, nhead=nhead))
    np.testing.assert_allclose(np.asarray(out), np.asarray(ref),
                               rtol=1e-2, atol=1e-2)   # slack for MXU precision

    print("KERNEL_OK")
</pallas_src>

<mosaic_0001>
module attributes {stable_mosaic.version = 11 : i64} {
  func.func @_ffn_block_kernel(%arg0: memref<16x32xf32, #tpu.memory_space<vmem>>, %arg1: memref<32x2048xf32, #tpu.memory_space<vmem>>, %arg2: memref<1x2048xf32, #tpu.memory_space<vmem>>, %arg3: memref<2048x32xf32, #tpu.memory_space<vmem>>, %arg4: memref<1x32xf32, #tpu.memory_space<vmem>>, %arg5: memref<1x32xf32, #tpu.memory_space<vmem>>, %arg6: memref<1x32xf32, #tpu.memory_space<vmem>>, %arg7: memref<16x32xf32, #tpu.memory_space<vmem>>) attributes {dimension_semantics = [], scalar_prefetch = 0 : i64, scratch_operands = 0 : i64, tpu.core_type = #tpu.core_type<tc>} {
    %c0 = arith.constant 0 : index
    %c0_0 = arith.constant 0 : index
    %0 = vector.load %arg0[%c0, %c0_0] : memref<16x32xf32, #tpu.memory_space<vmem>>, vector<16x32xf32>
    %c0_1 = arith.constant 0 : index
    %c0_2 = arith.constant 0 : index
    %1 = vector.load %arg1[%c0_1, %c0_2] : memref<32x2048xf32, #tpu.memory_space<vmem>>, vector<32x2048xf32>
    %cst = arith.constant dense<0.000000e+00> : vector<16x2048xf32>
    %2 = tpu.matmul %0, %1, %cst {dimension_numbers = #tpu.dot_dimension_numbers<[1], [0], [0], [1], [0, 0, 1, 1], [], []>} : vector<16x32xf32>, vector<32x2048xf32>, vector<16x2048xf32> -> vector<16x2048xf32>
    %c0_3 = arith.constant 0 : index
    %c0_4 = arith.constant 0 : index
    %3 = vector.load %arg2[%c0_3, %c0_4] : memref<1x2048xf32, #tpu.memory_space<vmem>>, vector<1x2048xf32>
    %4 = vector.broadcast %3 : vector<1x2048xf32> to vector<16x2048xf32>
    %5 = arith.addf %2, %4 : vector<16x2048xf32>
    %cst_5 = arith.constant 0.000000e+00 : f32
    %6 = vector.broadcast %cst_5 : f32 to vector<16x2048xf32>
    %7 = arith.maximumf %5, %6 : vector<16x2048xf32>
    %c0_6 = arith.constant 0 : index
    %c0_7 = arith.constant 0 : index
    %8 = vector.load %arg3[%c0_6, %c0_7] : memref<2048x32xf32, #tpu.memory_space<vmem>>, vector<2048x32xf32>
    %cst_8 = arith.constant dense<0.000000e+00> : vector<16x32xf32>
    %9 = tpu.matmul %7, %8, %cst_8 {dimension_numbers = #tpu.dot_dimension_numbers<[1], [0], [0], [1], [0, 0, 1, 1], [], []>} : vector<16x2048xf32>, vector<2048x32xf32>, vector<16x32xf32> -> vector<16x32xf32>
    %c0_9 = arith.constant 0 : index
    %c0_10 = arith.constant 0 : index
    %10 = vector.load %arg4[%c0_9, %c0_10] : memref<1x32xf32, #tpu.memory_space<vmem>>, vector<1x32xf32>
    %11 = vector.broadcast %10 : vector<1x32xf32> to vector<16x32xf32>
    %12 = arith.addf %9, %11 : vector<16x32xf32>
    %13 = arith.addf %0, %12 : vector<16x32xf32>
    %c0_11 = arith.constant 0 : index
    %c0_12 = arith.constant 0 : index
    %14 = vector.load %arg5[%c0_11, %c0_12] : memref<1x32xf32, #tpu.memory_space<vmem>>, vector<1x32xf32>
    %c0_13 = arith.constant 0 : index
    %c0_14 = arith.constant 0 : index
    %15 = vector.load %arg6[%c0_13, %c0_14] : memref<1x32xf32, #tpu.memory_space<vmem>>, vector<1x32xf32>
    %cst_15 = arith.constant dense<0.000000e+00> : vector<16xf32>
    %16 = vector.multi_reduction <add>, %13, %cst_15 [1] : vector<16x32xf32> to vector<16xf32>
    %17 = vector.shape_cast %16 : vector<16xf32> to vector<16x1xf32>
    %cst_16 = arith.constant 3.200000e+01 : f32
    %18 = vector.broadcast %cst_16 : f32 to vector<16x1xf32>
    %19 = arith.divf %17, %18 : vector<16x1xf32>
    %20 = vector.broadcast %19 : vector<16x1xf32> to vector<16x32xf32>
    %21 = arith.subf %13, %20 : vector<16x32xf32>
    %22 = vector.broadcast %19 : vector<16x1xf32> to vector<16x32xf32>
    %23 = arith.subf %13, %22 : vector<16x32xf32>
    %24 = arith.mulf %21, %23 : vector<16x32xf32>
    %cst_17 = arith.constant dense<0.000000e+00> : vector<16xf32>
    %25 = vector.multi_reduction <add>, %24, %cst_17 [1] : vector<16x32xf32> to vector<16xf32>
    %26 = vector.shape_cast %25 : vector<16xf32> to vector<16x1xf32>
    %cst_18 = arith.constant 3.200000e+01 : f32
    %27 = vector.broadcast %cst_18 : f32 to vector<16x1xf32>
    %28 = arith.divf %26, %27 : vector<16x1xf32>
    %29 = vector.broadcast %19 : vector<16x1xf32> to vector<16x32xf32>
    %30 = arith.subf %13, %29 : vector<16x32xf32>
    %cst_19 = arith.constant 9.99999974E-6 : f32
    %31 = vector.broadcast %cst_19 : f32 to vector<16x1xf32>
    %32 = arith.addf %28, %31 : vector<16x1xf32>
    %33 = math.rsqrt %32 : vector<16x1xf32>
    %34 = vector.broadcast %33 : vector<16x1xf32> to vector<16x32xf32>
    %35 = arith.mulf %30, %34 : vector<16x32xf32>
    %36 = vector.broadcast %14 : vector<1x32xf32> to vector<16x32xf32>
    %37 = arith.mulf %35, %36 : vector<16x32xf32>
    %38 = vector.broadcast %15 : vector<1x32xf32> to vector<16x32xf32>
    %39 = arith.addf %37, %38 : vector<16x32xf32>
    %c0_20 = arith.constant 0 : index
    %c0_21 = arith.constant 0 : index
    %40 = vector.load %arg7[%c0_20, %c0_21] : memref<16x32xf32, #tpu.memory_space<vmem>>, vector<16x32xf32>
    tpu.vector_store %arg7[%c0_20, %c0_21], %39 {strides = array<i32>} : memref<16x32xf32, #tpu.memory_space<vmem>>, vector<16x32xf32>,
    return
  }
}

module attributes {stable_mosaic.version = 11 : i64} {
  func.func @_attn_block_kernel(%arg0: memref<16x32xf32, #tpu.memory_space<vmem>>, %arg1: memref<16x32xf32, #tpu.memory_space<vmem>>, %arg2: memref<32x32xf32, #tpu.memory_space<vmem>>, %arg3: memref<1x32xf32, #tpu.memory_space<vmem>>, %arg4: memref<32x32xf32, #tpu.memory_space<vmem>>, %arg5: memref<1x32xf32, #tpu.memory_space<vmem>>, %arg6: memref<32x32xf32, #tpu.memory_space<vmem>>, %arg7: memref<1x32xf32, #tpu.memory_space<vmem>>, %arg8: memref<32x32xf32, #tpu.memory_space<vmem>>, %arg9: memref<1x32xf32, #tpu.memory_space<vmem>>, %arg10: memref<1x32xf32, #tpu.memory_space<vmem>>, %arg11: memref<1x32xf32, #tpu.memory_space<vmem>>, %arg12: memref<16x32xf32, #tpu.memory_space<vmem>>) attributes {dimension_semantics = [], scalar_prefetch = 0 : i64, scratch_operands = 0 : i64, tpu.core_type = #tpu.core_type<tc>} {
    %c0 = arith.constant 0 : index
    %c0_0 = arith.constant 0 : index
    %0 = vector.load %arg0[%c0, %c0_0] : memref<16x32xf32, #tpu.memory_space<vmem>>, vector<16x32xf32>
    %c0_1 = arith.constant 0 : index
    %c0_2 = arith.constant 0 : index
    %1 = vector.load %arg1[%c0_1, %c0_2] : memref<16x32xf32, #tpu.memory_space<vmem>>, vector<16x32xf32>
    %c0_3 = arith.constant 0 : index
    %c0_4 = arith.constant 0 : index
    %2 = vector.load %arg2[%c0_3, %c0_4] : memref<32x32xf32, #tpu.memory_space<vmem>>, vector<32x32xf32>
    %cst = arith.constant dense<0.000000e+00> : vector<16x32xf32>
    %3 = tpu.matmul %0, %2, %cst {dimension_numbers = #tpu.dot_dimension_numbers<[1], [0], [0], [1], [0, 0, 1, 1], [], []>} : vector<16x32xf32>, vector<32x32xf32>, vector<16x32xf32> -> vector<16x32xf32>
    %c0_5 = arith.constant 0 : index
    %c0_6 = arith.constant 0 : index
    %4 = vector.load %arg3[%c0_5, %c0_6] : memref<1x32xf32, #tpu.memory_space<vmem>>, vector<1x32xf32>
    %5 = vector.broadcast %4 : vector<1x32xf32> to vector<16x32xf32>
    %6 = arith.addf %3, %5 : vector<16x32xf32>
    %c0_7 = arith.constant 0 : index
    %c0_8 = arith.constant 0 : index
    %7 = vector.load %arg4[%c0_7, %c0_8] : memref<32x32xf32, #tpu.memory_space<vmem>>, vector<32x32xf32>
    %cst_9 = arith.constant dense<0.000000e+00> : vector<16x32xf32>
    %8 = tpu.matmul %1, %7, %cst_9 {dimension_numbers = #tpu.dot_dimension_numbers<[1], [0], [0], [1], [0, 0, 1, 1], [], []>} : vector<16x32xf32>, vector<32x32xf32>, vector<16x32xf32> -> vector<16x32xf32>
    %c0_10 = arith.constant 0 : index
    %c0_11 = arith.constant 0 : index
    %9 = vector.load %arg5[%c0_10, %c0_11] : memref<1x32xf32, #tpu.memory_space<vmem>>, vector<1x32xf32>
    %10 = vector.broadcast %9 : vector<1x32xf32> to vector<16x32xf32>
    %11 = arith.addf %8, %10 : vector<16x32xf32>
    %c0_12 = arith.constant 0 : index
    %c0_13 = arith.constant 0 : index
    %12 = vector.load %arg6[%c0_12, %c0_13] : memref<32x32xf32, #tpu.memory_space<vmem>>, vector<32x32xf32>
    %cst_14 = arith.constant dense<0.000000e+00> : vector<16x32xf32>
    %13 = tpu.matmul %1, %12, %cst_14 {dimension_numbers = #tpu.dot_dimension_numbers<[1], [0], [0], [1], [0, 0, 1, 1], [], []>} : vector<16x32xf32>, vector<32x32xf32>, vector<16x32xf32> -> vector<16x32xf32>
    %c0_15 = arith.constant 0 : index
    %c0_16 = arith.constant 0 : index
    %14 = vector.load %arg7[%c0_15, %c0_16] : memref<1x32xf32, #tpu.memory_space<vmem>>, vector<1x32xf32>
    %15 = vector.broadcast %14 : vector<1x32xf32> to vector<16x32xf32>
    %16 = arith.addf %13, %15 : vector<16x32xf32>
    %17 = vector.extract_strided_slice %6 {offsets = [0, 0], sizes = [8, 32], strides = [1, 1]} : vector<16x32xf32> to vector<8x32xf32>
    %18 = vector.extract_strided_slice %11 {offsets = [0, 0], sizes = [8, 32], strides = [1, 1]} : vector<16x32xf32> to vector<8x32xf32>
    %19 = vector.extract_strided_slice %16 {offsets = [0, 0], sizes = [8, 32], strides = [1, 1]} : vector<16x32xf32> to vector<8x32xf32>
    %20 = vector.extract_strided_slice %17 {offsets = [0, 0], sizes = [8, 8], strides = [1, 1]} : vector<8x32xf32> to vector<8x8xf32>
    %21 = vector.extract_strided_slice %18 {offsets = [0, 0], sizes = [8, 8], strides = [1, 1]} : vector<8x32xf32> to vector<8x8xf32>
    %22 = vector.extract_strided_slice %19 {offsets = [0, 0], sizes = [8, 8], strides = [1, 1]} : vector<8x32xf32> to vector<8x8xf32>
    "tpu.trace_start"() <{level = 10 : i32, message = "qd,kd->qk"}> : () -> ()
    %cst_17 = arith.constant dense<0.000000e+00> : vector<8x8xf32>
    %23 = tpu.matmul %20, %21, %cst_17 {dimension_numbers = #tpu.dot_dimension_numbers<[1], [1], [0], [0], [0, 0, 1, 0], [], []>} : vector<8x8xf32>, vector<8x8xf32>, vector<8x8xf32> -> vector<8x8xf32>
    "tpu.trace_stop"() : () -> ()
    %cst_18 = arith.constant 0.353553385 : f32
    %24 = vector.broadcast %cst_18 : f32 to vector<8x8xf32>
    %25 = arith.mulf %23, %24 : vector<8x8xf32>
    %cst_19 = arith.constant dense<0xFF800000> : vector<8xf32>
    %26 = vector.multi_reduction <maximumf>, %25, %cst_19 [1] : vector<8x8xf32> to vector<8xf32>
    %27 = vector.shape_cast %26 : vector<8xf32> to vector<8x1xf32>
    %28 = vector.broadcast %27 : vector<8x1xf32> to vector<8x8xf32>
    %29 = arith.subf %25, %28 : vector<8x8xf32>
    %30 = math.exp %29 : vector<8x8xf32>
    %cst_20 = arith.constant dense<0.000000e+00> : vector<8xf32>
    %31 = vector.multi_reduction <add>, %30, %cst_20 [1] : vector<8x8xf32> to vector<8xf32>
    %32 = vector.shape_cast %31 : vector<8xf32> to vector<8x1xf32>
    %33 = vector.broadcast %32 : vector<8x1xf32> to vector<8x8xf32>
    %34 = arith.divf %30, %33 : vector<8x8xf32>
    %cst_21 = arith.constant dense<0.000000e+00> : vector<8x8xf32>
    %35 = tpu.matmul %34, %22, %cst_21 {dimension_numbers = #tpu.dot_dimension_numbers<[1], [0], [0], [1], [0, 0, 1, 1], [], []>} : vector<8x8xf32>, vector<8x8xf32>, vector<8x8xf32> -> vector<8x8xf32>
    %36 = vector.extract_strided_slice %17 {offsets = [0, 8], sizes = [8, 8], strides = [1, 1]} : vector<8x32xf32> to vector<8x8xf32>
    %37 = vector.extract_strided_slice %18 {offsets = [0, 8], sizes = [8, 8], strides = [1, 1]} : vector<8x32xf32> to vector<8x8xf32>
    %38 = vector.extract_strided_slice %19 {offsets = [0, 8], sizes = [8, 8], strides = [1, 1]} : vector<8x32xf32> to vector<8x8xf32>
    "tpu.trace_start"() <{level = 10 : i32, message = "qd,kd->qk"}> : () -> ()
    %cst_22 = arith.constant dense<0.000000e+00> : vector<8x8xf32>
    %39 = tpu.matmul %36, %37, %cst_22 {dimension_numbers = #tpu.dot_dimension_numbers<[1], [1], [0], [0], [0, 0, 1, 0], [], []>} : vector<8x8xf32>, vector<8x8xf32>, vector<8x8xf32> -> vector<8x8xf32>
    "tpu.trace_stop"() : () -> ()
    %cst_23 = arith.constant 0.353553385 : f32
    %40 = vector.broadcast %cst_23 : f32 to vector<8x8xf32>
    %41 = arith.mulf %39, %40 : vector<8x8xf32>
    %cst_24 = arith.constant dense<0xFF800000> : vector<8xf32>
    %42 = vector.multi_reduction <maximumf>, %41, %cst_24 [1] : vector<8x8xf32> to vector<8xf32>
    %43 = vector.shape_cast %42 : vector<8xf32> to vector<8x1xf32>
    %44 = vector.broadcast %43 : vector<8x1xf32> to vector<8x8xf32>
    %45 = arith.subf %41, %44 : vector<8x8xf32>
    %46 = math.exp %45 : vector<8x8xf32>
    %cst_25 = arith.constant dense<0.000000e+00> : vector<8xf32>
    %47 = vector.multi_reduction <add>, %46, %cst_25 [1] : vector<8x8xf32> to vector<8xf32>
    %48 = vector.shape_cast %47 : vector<8xf32> to vector<8x1xf32>
    %49 = vector.broadcast %48 : vector<8x1xf32> to vector<8x8xf32>
    %50 = arith.divf %46, %49 : vector<8x8xf32>
    %cst_26 = arith.constant dense<0.000000e+00> : vector<8x8xf32>
    %51 = tpu.matmul %50, %38, %cst_26 {dimension_numbers = #tpu.dot_dimension_numbers<[1], [0], [0], [1], [0, 0, 1, 1], [], []>} : vector<8x8xf32>, vector<8x8xf32>, vector<8x8xf32> -> vector<8x8xf32>
    %52 = vector.extract_strided_slice %17 {offsets = [0, 16], sizes = [8, 8], strides = [1, 1]} : vector<8x32xf32> to vector<8x8xf32>
    %53 = vector.extract_strided_slice %18 {offsets = [0, 16], sizes = [8, 8], strides = [1, 1]} : vector<8x32xf32> to vector<8x8xf32>
    %54 = vector.extract_strided_slice %19 {offsets = [0, 16], sizes = [8, 8], strides = [1, 1]} : vector<8x32xf32> to vector<8x8xf32>
    "tpu.trace_start"() <{level = 10 : i32, message = "qd,kd->qk"}> : () -> ()
    %cst_27 = arith.constant dense<0.000000e+00> : vector<8x8xf32>
    %55 = tpu.matmul %52, %53, %cst_27 {dimension_numbers = #tpu.dot_dimension_numbers<[1], [1], [0], [0], [0, 0, 1, 0], [], []>} : vector<8x8xf32>, vector<8x8xf32>, vector<8x8xf32> -> vector<8x8xf32>
    "tpu.trace_stop"() : () -> ()
    %cst_28 = arith.constant 0.353553385 : f32
    %56 = vector.broadcast %cst_28 : f32 to vector<8x8xf32>
    %57 = arith.mulf %55, %56 : vector<8x8xf32>
    %cst_29 = arith.constant dense<0xFF800000> : vector<8xf32>
    %58 = vector.multi_reduction <maximumf>, %57, %cst_29 [1] : vector<8x8xf32> to vector<8xf32>
    %59 = vector.shape_cast %58 : vector<8xf32> to vector<8x1xf32>
    %60 = vector.broadcast %59 : vector<8x1xf32> to vector<8x8xf32>
    %61 = arith.subf %57, %60 : vector<8x8xf32>
    %62 = math.exp %61 : vector<8x8xf32>
    %cst_30 = arith.constant dense<0.000000e+00> : vector<8xf32>
    %63 = vector.multi_reduction <add>, %62, %cst_30 [1] : vector<8x8xf32> to vector<8xf32>
    %64 = vector.shape_cast %63 : vector<8xf32> to vector<8x1xf32>
    %65 = vector.broadcast %64 : vector<8x1xf32> to vector<8x8xf32>
    %66 = arith.divf %62, %65 : vector<8x8xf32>
    %cst_31 = arith.constant dense<0.000000e+00> : vector<8x8xf32>
    %67 = tpu.matmul %66, %54, %cst_31 {dimension_numbers = #tpu.dot_dimension_numbers<[1], [0], [0], [1], [0, 0, 1, 1], [], []>} : vector<8x8xf32>, vector<8x8xf32>, vector<8x8xf32> -> vector<8x8xf32>
    %68 = vector.extract_strided_slice %17 {offsets = [0, 24], sizes = [8, 8], strides = [1, 1]} : vector<8x32xf32> to vector<8x8xf32>
    %69 = vector.extract_strided_slice %18 {offsets = [0, 24], sizes = [8, 8], strides = [1, 1]} : vector<8x32xf32> to vector<8x8xf32>
    %70 = vector.extract_strided_slice %19 {offsets = [0, 24], sizes = [8, 8], strides = [1, 1]} : vector<8x32xf32> to vector<8x8xf32>
    "tpu.trace_start"() <{level = 10 : i32, message = "qd,kd->qk"}> : () -> ()
    %cst_32 = arith.constant dense<0.000000e+00> : vector<8x8xf32>
    %71 = tpu.matmul %68, %69, %cst_32 {dimension_numbers = #tpu.dot_dimension_numbers<[1], [1], [0], [0], [0, 0, 1, 0], [], []>} : vector<8x8xf32>, vector<8x8xf32>, vector<8x8xf32> -> vector<8x8xf32>
    "tpu.trace_stop"() : () -> ()
    %cst_33 = arith.constant 0.353553385 : f32
    %72 = vector.broadcast %cst_33 : f32 to vector<8x8xf32>
    %73 = arith.mulf %71, %72 : vector<8x8xf32>
    %cst_34 = arith.constant dense<0xFF800000> : vector<8xf32>
    %74 = vector.multi_reduction <maximumf>, %73, %cst_34 [1] : vector<8x8xf32> to vector<8xf32>
    %75 = vector.shape_cast %74 : vector<8xf32> to vector<8x1xf32>
    %76 = vector.broadcast %75 : vector<8x1xf32> to vector<8x8xf32>
    %77 = arith.subf %73, %76 : vector<8x8xf32>
    %78 = math.exp %77 : vector<8x8xf32>
    %cst_35 = arith.constant dense<0.000000e+00> : vector<8xf32>
    %79 = vector.multi_reduction <add>, %78, %cst_35 [1] : vector<8x8xf32> to vector<8xf32>
    %80 = vector.shape_cast %79 : vector<8xf32> to vector<8x1xf32>
    %81 = vector.broadcast %80 : vector<8x1xf32> to vector<8x8xf32>
    %82 = arith.divf %78, %81 : vector<8x8xf32>
    %cst_36 = arith.constant dense<0.000000e+00> : vector<8x8xf32>
    %83 = tpu.matmul %82, %70, %cst_36 {dimension_numbers = #tpu.dot_dimension_numbers<[1], [0], [0], [1], [0, 0, 1, 1], [], []>} : vector<8x8xf32>, vector<8x8xf32>, vector<8x8xf32> -> vector<8x8xf32>
    %84 = tpu.concatenate %35, %51, %67, %83 in 1 : vector<8x8xf32>, vector<8x8xf32>, vector<8x8xf32>, vector<8x8xf32> -> vector<8x32xf32>
    %85 = vector.extract_strided_slice %6 {offsets = [8, 0], sizes = [8, 32], strides = [1, 1]} : vector<16x32xf32> to vector<8x32xf32>
    %86 = vector.extract_strided_slice %11 {offsets = [8, 0], sizes = [8, 32], strides = [1, 1]} : vector<16x32xf32> to vector<8x32xf32>
    %87 = vector.extract_strided_slice %16 {offsets = [8, 0], sizes = [8, 32], strides = [1, 1]} : vector<16x32xf32> to vector<8x32xf32>
    %88 = vector.extract_strided_slice %85 {offsets = [0, 0], sizes = [8, 8], strides = [1, 1]} : vector<8x32xf32> to vector<8x8xf32>
    %89 = vector.extract_strided_slice %86 {offsets = [0, 0], sizes = [8, 8], strides = [1, 1]} : vector<8x32xf32> to vector<8x8xf32>
    %90 = vector.extract_strided_slice %87 {offsets = [0, 0], sizes = [8, 8], strides = [1, 1]} : vector<8x32xf32> to vector<8x8xf32>
    "tpu.trace_start"() <{level = 10 : i32, message = "qd,kd->qk"}> : () -> ()
    %cst_37 = arith.constant dense<0.000000e+00> : vector<8x8xf32>
    %91 = tpu.matmul %88, %89, %cst_37 {dimension_numbers = #tpu.dot_dimension_numbers<[1], [1], [0], [0], [0, 0, 1, 0], [], []>} : vector<8x8xf32>, vector<8x8xf32>, vector<8x8xf32> -> vector<8x8xf32>
    "tpu.trace_stop"() : () -> ()
    %cst_38 = arith.constant 0.353553385 : f32
    %92 = vector.broadcast %cst_38 : f32 to vector<8x8xf32>
    %93 = arith.mulf %91, %92 : vector<8x8xf32>
    %cst_39 = arith.constant dense<0xFF800000> : vector<8xf32>
    %94 = vector.multi_reduction <maximumf>, %93, %cst_39 [1] : vector<8x8xf32> to vector<8xf32>
    %95 = vector.shape_cast %94 : vector<8xf32> to vector<8x1xf32>
    %96 = vector.broadcast %95 : vector<8x1xf32> to vector<8x8xf32>
    %97 = arith.subf %93, %96 : vector<8x8xf32>
    %98 = math.exp %97 : vector<8x8xf32>
    %cst_40 = arith.constant dense<0.000000e+00> : vector<8xf32>
    %99 = vector.multi_reduction <add>, %98, %cst_40 [1] : vector<8x8xf32> to vector<8xf32>
    %100 = vector.shape_cast %99 : vector<8xf32> to vector<8x1xf32>
    %101 = vector.broadcast %100 : vector<8x1xf32> to vector<8x8xf32>
    %102 = arith.divf %98, %101 : vector<8x8xf32>
    %cst_41 = arith.constant dense<0.000000e+00> : vector<8x8xf32>
    %103 = tpu.matmul %102, %90, %cst_41 {dimension_numbers = #tpu.dot_dimension_numbers<[1], [0], [0], [1], [0, 0, 1, 1], [], []>} : vector<8x8xf32>, vector<8x8xf32>, vector<8x8xf32> -> vector<8x8xf32>
    %104 = vector.extract_strided_slice %85 {offsets = [0, 8], sizes = [8, 8], strides = [1, 1]} : vector<8x32xf32> to vector<8x8xf32>
    %105 = vector.extract_strided_slice %86 {offsets = [0, 8], sizes = [8, 8], strides = [1, 1]} : vector<8x32xf32> to vector<8x8xf32>
    %106 = vector.extract_strided_slice %87 {offsets = [0, 8], sizes = [8, 8], strides = [1, 1]} : vector<8x32xf32> to vector<8x8xf32>
    "tpu.trace_start"() <{level = 10 : i32, message = "qd,kd->qk"}> : () -> ()
    %cst_42 = arith.constant dense<0.000000e+00> : vector<8x8xf32>
    %107 = tpu.matmul %104, %105, %cst_42 {dimension_numbers = #tpu.dot_dimension_numbers<[1], [1], [0], [0], [0, 0, 1, 0], [], []>} : vector<8x8xf32>, vector<8x8xf32>, vector<8x8xf32> -> vector<8x8xf32>
    "tpu.trace_stop"() : () -> ()
    %cst_43 = arith.constant 0.353553385 : f32
    %108 = vector.broadcast %cst_43 : f32 to vector<8x8xf32>
    %109 = arith.mulf %107, %108 : vector<8x8xf32>
    %cst_44 = arith.constant dense<0xFF800000> : vector<8xf32>
    %110 = vector.multi_reduction <maximumf>, %109, %cst_44 [1] : vector<8x8xf32> to vector<8xf32>
    %111 = vector.shape_cast %110 : vector<8xf32> to vector<8x1xf32>
    %112 = vector.broadcast %111 : vector<8x1xf32> to vector<8x8xf32>
    %113 = arith.subf %109, %112 : vector<8x8xf32>
    %114 = math.exp %113 : vector<8x8xf32>
    %cst_45 = arith.constant dense<0.000000e+00> : vector<8xf32>
    %115 = vector.multi_reduction <add>, %114, %cst_45 [1] : vector<8x8xf32> to vector<8xf32>
    %116 = vector.shape_cast %115 : vector<8xf32> to vector<8x1xf32>
    %117 = vector.broadcast %116 : vector<8x1xf32> to vector<8x8xf32>
    %118 = arith.divf %114, %117 : vector<8x8xf32>
    %cst_46 = arith.constant dense<0.000000e+00> : vector<8x8xf32>
    %119 = tpu.matmul %118, %106, %cst_46 {dimension_numbers = #tpu.dot_dimension_numbers<[1], [0], [0], [1], [0, 0, 1, 1], [], []>} : vector<8x8xf32>, vector<8x8xf32>, vector<8x8xf32> -> vector<8x8xf32>
    %120 = vector.extract_strided_slice %85 {offsets = [0, 16], sizes = [8, 8], strides = [1, 1]} : vector<8x32xf32> to vector<8x8xf32>
    %121 = vector.extract_strided_slice %86 {offsets = [0, 16], sizes = [8, 8], strides = [1, 1]} : vector<8x32xf32> to vector<8x8xf32>
    %122 = vector.extract_strided_slice %87 {offsets = [0, 16], sizes = [8, 8], strides = [1, 1]} : vector<8x32xf32> to vector<8x8xf32>
    "tpu.trace_start"() <{level = 10 : i32, message = "qd,kd->qk"}> : () -> ()
    %cst_47 = arith.constant dense<0.000000e+00> : vector<8x8xf32>
    %123 = tpu.matmul %120, %121, %cst_47 {dimension_numbers = #tpu.dot_dimension_numbers<[1], [1], [0], [0], [0, 0, 1, 0], [], []>} : vector<8x8xf32>, vector<8x8xf32>, vector<8x8xf32> -> vector<8x8xf32>
    "tpu.trace_stop"() : () -> ()
    %cst_48 = arith.constant 0.353553385 : f32
    %124 = vector.broadcast %cst_48 : f32 to vector<8x8xf32>
    %125 = arith.mulf %123, %124 : vector<8x8xf32>
    %cst_49 = arith.constant dense<0xFF800000> : vector<8xf32>
    %126 = vector.multi_reduction <maximumf>, %125, %cst_49 [1] : vector<8x8xf32> to vector<8xf32>
    %127 = vector.shape_cast %126 : vector<8xf32> to vector<8x1xf32>
    %128 = vector.broadcast %127 : vector<8x1xf32> to vector<8x8xf32>
    %129 = arith.subf %125, %128 : vector<8x8xf32>
    %130 = math.exp %129 : vector<8x8xf32>
    %cst_50 = arith.constant dense<0.000000e+00> : vector<8xf32>
    %131 = vector.multi_reduction <add>, %130, %cst_50 [1] : vector<8x8xf32> to vector<8xf32>
    %132 = vector.shape_cast %131 : vector<8xf32> to vector<8x1xf32>
    %133 = vector.broadcast %132 : vector<8x1xf32> to vector<8x8xf32>
    %134 = arith.divf %130, %133 : vector<8x8xf32>
    %cst_51 = arith.constant dense<0.000000e+00> : vector<8x8xf32>
    %135 = tpu.matmul %134, %122, %cst_51 {dimension_numbers = #tpu.dot_dimension_numbers<[1], [0], [0], [1], [0, 0, 1, 1], [], []>} : vector<8x8xf32>, vector<8x8xf32>, vector<8x8xf32> -> vector<8x8xf32>
    %136 = vector.extract_strided_slice %85 {offsets = [0, 24], sizes = [8, 8], strides = [1, 1]} : vector<8x32xf32> to vector<8x8xf32>
    %137 = vector.extract_strided_slice %86 {offsets = [0, 24], sizes = [8, 8], strides = [1, 1]} : vector<8x32xf32> to vector<8x8xf32>
    %138 = vector.extract_strided_slice %87 {offsets = [0, 24], sizes = [8, 8], strides = [1, 1]} : vector<8x32xf32> to vector<8x8xf32>
    "tpu.trace_start"() <{level = 10 : i32, message = "qd,kd->qk"}> : () -> ()
    %cst_52 = arith.constant dense<0.000000e+00> : vector<8x8xf32>
    %139 = tpu.matmul %136, %137, %cst_52 {dimension_numbers = #tpu.dot_dimension_numbers<[1], [1], [0], [0], [0, 0, 1, 0], [], []>} : vector<8x8xf32>, vector<8x8xf32>, vector<8x8xf32> -> vector<8x8xf32>
    "tpu.trace_stop"() : () -> ()
    %cst_53 = arith.constant 0.353553385 : f32
    %140 = vector.broadcast %cst_53 : f32 to vector<8x8xf32>
    %141 = arith.mulf %139, %140 : vector<8x8xf32>
    %cst_54 = arith.constant dense<0xFF800000> : vector<8xf32>
    %142 = vector.multi_reduction <maximumf>, %141, %cst_54 [1] : vector<8x8xf32> to vector<8xf32>
    %143 = vector.shape_cast %142 : vector<8xf32> to vector<8x1xf32>
    %144 = vector.broadcast %143 : vector<8x1xf32> to vector<8x8xf32>
    %145 = arith.subf %141, %144 : vector<8x8xf32>
    %146 = math.exp %145 : vector<8x8xf32>
    %cst_55 = arith.constant dense<0.000000e+00> : vector<8xf32>
    %147 = vector.multi_reduction <add>, %146, %cst_55 [1] : vector<8x8xf32> to vector<8xf32>
    %148 = vector.shape_cast %147 : vector<8xf32> to vector<8x1xf32>
    %149 = vector.broadcast %148 : vector<8x1xf32> to vector<8x8xf32>
    %150 = arith.divf %146, %149 : vector<8x8xf32>
    %cst_56 = arith.constant dense<0.000000e+00> : vector<8x8xf32>
    %151 = tpu.matmul %150, %138, %cst_56 {dimension_numbers = #tpu.dot_dimension_numbers<[1], [0], [0], [1], [0, 0, 1, 1], [], []>} : vector<8x8xf32>, vector<8x8xf32>, vector<8x8xf32> -> vector<8x8xf32>
    %152 = tpu.concatenate %103, %119, %135, %151 in 1 : vector<8x8xf32>, vector<8x8xf32>, vector<8x8xf32>, vector<8x8xf32> -> vector<8x32xf32>
    %153 = tpu.concatenate %84, %152 in 0 : vector<8x32xf32>, vector<8x32xf32> -> vector<16x32xf32>
    %c0_57 = arith.constant 0 : index
    %c0_58 = arith.constant 0 : index
    %154 = vector.load %arg8[%c0_57, %c0_58] : memref<32x32xf32, #tpu.memory_space<vmem>>, vector<32x32xf32>
    %cst_59 = arith.constant dense<0.000000e+00> : vector<16x32xf32>
    %155 = tpu.matmul %153, %154, %cst_59 {dimension_numbers = #tpu.dot_dimension_numbers<[1], [0], [0], [1], [0, 0, 1, 1], [], []>} : vector<16x32xf32>, vector<32x32xf32>, vector<16x32xf32> -> vector<16x32xf32>
    %c0_60 = arith.constant 0 : index
    %c0_61 = arith.constant 0 : index
    %156 = vector.load %arg9[%c0_60, %c0_61] : memref<1x32xf32, #tpu.memory_space<vmem>>, vector<1x32xf32>
    %157 = vector.broadcast %156 : vector<1x32xf32> to vector<16x32xf32>
    %158 = arith.addf %155, %157 : vector<16x32xf32>
    %159 = arith.addf %0, %158 : vector<16x32xf32>
    %c0_62 = arith.constant 0 : index
    %c0_63 = arith.constant 0 : index
    %160 = vector.load %arg10[%c0_62, %c0_63] : memref<1x32xf32, #tpu.memory_space<vmem>>, vector<1x32xf32>
    %c0_64 = arith.constant 0 : index
    %c0_65 = arith.constant 0 : index
    %161 = vector.load %arg11[%c0_64, %c0_65] : memref<1x32xf32, #tpu.memory_space<vmem>>, vector<1x32xf32>
    %cst_66 = arith.constant dense<0.000000e+00> : vector<16xf32>
    %162 = vector.multi_reduction <add>, %159, %cst_66 [1] : vector<16x32xf32> to vector<16xf32>
    %163 = vector.shape_cast %162 : vector<16xf32> to vector<16x1xf32>
    %cst_67 = arith.constant 3.200000e+01 : f32
    %164 = vector.broadcast %cst_67 : f32 to vector<16x1xf32>
    %165 = arith.divf %163, %164 : vector<16x1xf32>
    %166 = vector.broadcast %165 : vector<16x1xf32> to vector<16x32xf32>
    %167 = arith.subf %159, %166 : vector<16x32xf32>
    %168 = vector.broadcast %165 : vector<16x1xf32> to vector<16x32xf32>
    %169 = arith.subf %159, %168 : vector<16x32xf32>
    %170 = arith.mulf %167, %169 : vector<16x32xf32>
    %cst_68 = arith.constant dense<0.000000e+00> : vector<16xf32>
    %171 = vector.multi_reduction <add>, %170, %cst_68 [1] : vector<16x32xf32> to vector<16xf32>
    %172 = vector.shape_cast %171 : vector<16xf32> to vector<16x1xf32>
    %cst_69 = arith.constant 3.200000e+01 : f32
    %173 = vector.broadcast %cst_69 : f32 to vector<16x1xf32>
    %174 = arith.divf %172, %173 : vector<16x1xf32>
    %175 = vector.broadcast %165 : vector<16x1xf32> to vector<16x32xf32>
    %176 = arith.subf %159, %175 : vector<16x32xf32>
    %cst_70 = arith.constant 9.99999974E-6 : f32
    %177 = vector.broadcast %cst_70 : f32 to vector<16x1xf32>
    %178 = arith.addf %174, %177 : vector<16x1xf32>
    %179 = math.rsqrt %178 : vector<16x1xf32>
    %180 = vector.broadcast %179 : vector<16x1xf32> to vector<16x32xf32>
    %181 = arith.mulf %176, %180 : vector<16x32xf32>
    %182 = vector.broadcast %160 : vector<1x32xf32> to vector<16x32xf32>
    %183 = arith.mulf %181, %182 : vector<16x32xf32>
    %184 = vector.broadcast %161 : vector<1x32xf32> to vector<16x32xf32>
    %185 = arith.addf %183, %184 : vector<16x32xf32>
    %c0_71 = arith.constant 0 : index
    %c0_72 = arith.constant 0 : index
    %186 = vector.load %arg12[%c0_71, %c0_72] : memref<16x32xf32, #tpu.memory_space<vmem>>, vector<16x32xf32>
    tpu.vector_store %arg12[%c0_71, %c0_72], %185 {strides = array<i32>} : memref<16x32xf32, #tpu.memory_space<vmem>>, vector<16x32xf32>,
    return
  }
}

module attributes {stable_mosaic.version = 11 : i64} {
  func.func @_attn_block_kernel(%arg0: memref<16x32xf32, #tpu.memory_space<vmem>>, %arg1: memref<32x32xf32, #tpu.memory_space<vmem>>, %arg2: memref<32x32xf32, #tpu.memory_space<vmem>>, %arg3: memref<1x32xf32, #tpu.memory_space<vmem>>, %arg4: memref<32x32xf32, #tpu.memory_space<vmem>>, %arg5: memref<1x32xf32, #tpu.memory_space<vmem>>, %arg6: memref<32x32xf32, #tpu.memory_space<vmem>>, %arg7: memref<1x32xf32, #tpu.memory_space<vmem>>, %arg8: memref<32x32xf32, #tpu.memory_space<vmem>>, %arg9: memref<1x32xf32, #tpu.memory_space<vmem>>, %arg10: memref<1x32xf32, #tpu.memory_space<vmem>>, %arg11: memref<1x32xf32, #tpu.memory_space<vmem>>, %arg12: memref<16x32xf32, #tpu.memory_space<vmem>>) attributes {dimension_semantics = [], scalar_prefetch = 0 : i64, scratch_operands = 0 : i64, tpu.core_type = #tpu.core_type<tc>} {
    %c0 = arith.constant 0 : index
    %c0_0 = arith.constant 0 : index
    %0 = vector.load %arg0[%c0, %c0_0] : memref<16x32xf32, #tpu.memory_space<vmem>>, vector<16x32xf32>
    %c0_1 = arith.constant 0 : index
    %c0_2 = arith.constant 0 : index
    %1 = vector.load %arg1[%c0_1, %c0_2] : memref<32x32xf32, #tpu.memory_space<vmem>>, vector<32x32xf32>
    %c0_3 = arith.constant 0 : index
    %c0_4 = arith.constant 0 : index
    %2 = vector.load %arg2[%c0_3, %c0_4] : memref<32x32xf32, #tpu.memory_space<vmem>>, vector<32x32xf32>
    %cst = arith.constant dense<0.000000e+00> : vector<16x32xf32>
    %3 = tpu.matmul %0, %2, %cst {dimension_numbers = #tpu.dot_dimension_numbers<[1], [0], [0], [1], [0, 0, 1, 1], [], []>} : vector<16x32xf32>, vector<32x32xf32>, vector<16x32xf32> -> vector<16x32xf32>
    %c0_5 = arith.constant 0 : index
    %c0_6 = arith.constant 0 : index
    %4 = vector.load %arg3[%c0_5, %c0_6] : memref<1x32xf32, #tpu.memory_space<vmem>>, vector<1x32xf32>
    %5 = vector.broadcast %4 : vector<1x32xf32> to vector<16x32xf32>
    %6 = arith.addf %3, %5 : vector<16x32xf32>
    %c0_7 = arith.constant 0 : index
    %c0_8 = arith.constant 0 : index
    %7 = vector.load %arg4[%c0_7, %c0_8] : memref<32x32xf32, #tpu.memory_space<vmem>>, vector<32x32xf32>
    %cst_9 = arith.constant dense<0.000000e+00> : vector<32x32xf32>
    %8 = tpu.matmul %1, %7, %cst_9 {dimension_numbers = #tpu.dot_dimension_numbers<[1], [0], [0], [1], [0, 0, 1, 1], [], []>} : vector<32x32xf32>, vector<32x32xf32>, vector<32x32xf32> -> vector<32x32xf32>
    %c0_10 = arith.constant 0 : index
    %c0_11 = arith.constant 0 : index
    %9 = vector.load %arg5[%c0_10, %c0_11] : memref<1x32xf32, #tpu.memory_space<vmem>>, vector<1x32xf32>
    %10 = vector.broadcast %9 : vector<1x32xf32> to vector<32x32xf32>
    %11 = arith.addf %8, %10 : vector<32x32xf32>
    %c0_12 = arith.constant 0 : index
    %c0_13 = arith.constant 0 : index
    %12 = vector.load %arg6[%c0_12, %c0_13] : memref<32x32xf32, #tpu.memory_space<vmem>>, vector<32x32xf32>
    %cst_14 = arith.constant dense<0.000000e+00> : vector<32x32xf32>
    %13 = tpu.matmul %1, %12, %cst_14 {dimension_numbers = #tpu.dot_dimension_numbers<[1], [0], [0], [1], [0, 0, 1, 1], [], []>} : vector<32x32xf32>, vector<32x32xf32>, vector<32x32xf32> -> vector<32x32xf32>
    %c0_15 = arith.constant 0 : index
    %c0_16 = arith.constant 0 : index
    %14 = vector.load %arg7[%c0_15, %c0_16] : memref<1x32xf32, #tpu.memory_space<vmem>>, vector<1x32xf32>
    %15 = vector.broadcast %14 : vector<1x32xf32> to vector<32x32xf32>
    %16 = arith.addf %13, %15 : vector<32x32xf32>
    %17 = vector.extract_strided_slice %6 {offsets = [0, 0], sizes = [8, 32], strides = [1, 1]} : vector<16x32xf32> to vector<8x32xf32>
    %18 = vector.extract_strided_slice %11 {offsets = [0, 0], sizes = [16, 32], strides = [1, 1]} : vector<32x32xf32> to vector<16x32xf32>
    %19 = vector.extract_strided_slice %16 {offsets = [0, 0], sizes = [16, 32], strides = [1, 1]} : vector<32x32xf32> to vector<16x32xf32>
    %20 = vector.extract_strided_slice %17 {offsets = [0, 0], sizes = [8, 8], strides = [1, 1]} : vector<8x32xf32> to vector<8x8xf32>
    %21 = vector.extract_strided_slice %18 {offsets = [0, 0], sizes = [16, 8], strides = [1, 1]} : vector<16x32xf32> to vector<16x8xf32>
    %22 = vector.extract_strided_slice %19 {offsets = [0, 0], sizes = [16, 8], strides = [1, 1]} : vector<16x32xf32> to vector<16x8xf32>
    "tpu.trace_start"() <{level = 10 : i32, message = "qd,kd->qk"}> : () -> ()
    %cst_17 = arith.constant dense<0.000000e+00> : vector<8x16xf32>
    %23 = tpu.matmul %20, %21, %cst_17 {dimension_numbers = #tpu.dot_dimension_numbers<[1], [1], [0], [0], [0, 0, 1, 0], [], []>} : vector<8x8xf32>, vector<16x8xf32>, vector<8x16xf32> -> vector<8x16xf32>
    "tpu.trace_stop"() : () -> ()
    %cst_18 = arith.constant 0.353553385 : f32
    %24 = vector.broadcast %cst_18 : f32 to vector<8x16xf32>
    %25 = arith.mulf %23, %24 : vector<8x16xf32>
    %cst_19 = arith.constant dense<0xFF800000> : vector<8xf32>
    %26 = vector.multi_reduction <maximumf>, %25, %cst_19 [1] : vector<8x16xf32> to vector<8xf32>
    %27 = vector.shape_cast %26 : vector<8xf32> to vector<8x1xf32>
    %28 = vector.broadcast %27 : vector<8x1xf32> to vector<8x16xf32>
    %29 = arith.subf %25, %28 : vector<8x16xf32>
    %30 = math.exp %29 : vector<8x16xf32>
    %cst_20 = arith.constant dense<0.000000e+00> : vector<8xf32>
    %31 = vector.multi_reduction <add>, %30, %cst_20 [1] : vector<8x16xf32> to vector<8xf32>
    %32 = vector.shape_cast %31 : vector<8xf32> to vector<8x1xf32>
    %33 = vector.broadcast %32 : vector<8x1xf32> to vector<8x16xf32>
    %34 = arith.divf %30, %33 : vector<8x16xf32>
    %cst_21 = arith.constant dense<0.000000e+00> : vector<8x8xf32>
    %35 = tpu.matmul %34, %22, %cst_21 {dimension_numbers = #tpu.dot_dimension_numbers<[1], [0], [0], [1], [0, 0, 1, 1], [], []>} : vector<8x16xf32>, vector<16x8xf32>, vector<8x8xf32> -> vector<8x8xf32>
    %36 = vector.extract_strided_slice %17 {offsets = [0, 8], sizes = [8, 8], strides = [1, 1]} : vector<8x32xf32> to vector<8x8xf32>
    %37 = vector.extract_strided_slice %18 {offsets = [0, 8], sizes = [16, 8], strides = [1, 1]} : vector<16x32xf32> to vector<16x8xf32>
    %38 = vector.extract_strided_slice %19 {offsets = [0, 8], sizes = [16, 8], strides = [1, 1]} : vector<16x32xf32> to vector<16x8xf32>
    "tpu.trace_start"() <{level = 10 : i32, message = "qd,kd->qk"}> : () -> ()
    %cst_22 = arith.constant dense<0.000000e+00> : vector<8x16xf32>
    %39 = tpu.matmul %36, %37, %cst_22 {dimension_numbers = #tpu.dot_dimension_numbers<[1], [1], [0], [0], [0, 0, 1, 0], [], []>} : vector<8x8xf32>, vector<16x8xf32>, vector<8x16xf32> -> vector<8x16xf32>
    "tpu.trace_stop"() : () -> ()
    %cst_23 = arith.constant 0.353553385 : f32
    %40 = vector.broadcast %cst_23 : f32 to vector<8x16xf32>
    %41 = arith.mulf %39, %40 : vector<8x16xf32>
    %cst_24 = arith.constant dense<0xFF800000> : vector<8xf32>
    %42 = vector.multi_reduction <maximumf>, %41, %cst_24 [1] : vector<8x16xf32> to vector<8xf32>
    %43 = vector.shape_cast %42 : vector<8xf32> to vector<8x1xf32>
    %44 = vector.broadcast %43 : vector<8x1xf32> to vector<8x16xf32>
    %45 = arith.subf %41, %44 : vector<8x16xf32>
    %46 = math.exp %45 : vector<8x16xf32>
    %cst_25 = arith.constant dense<0.000000e+00> : vector<8xf32>
    %47 = vector.multi_reduction <add>, %46, %cst_25 [1] : vector<8x16xf32> to vector<8xf32>
    %48 = vector.shape_cast %47 : vector<8xf32> to vector<8x1xf32>
    %49 = vector.broadcast %48 : vector<8x1xf32> to vector<8x16xf32>
    %50 = arith.divf %46, %49 : vector<8x16xf32>
    %cst_26 = arith.constant dense<0.000000e+00> : vector<8x8xf32>
    %51 = tpu.matmul %50, %38, %cst_26 {dimension_numbers = #tpu.dot_dimension_numbers<[1], [0], [0], [1], [0, 0, 1, 1], [], []>} : vector<8x16xf32>, vector<16x8xf32>, vector<8x8xf32> -> vector<8x8xf32>
    %52 = vector.extract_strided_slice %17 {offsets = [0, 16], sizes = [8, 8], strides = [1, 1]} : vector<8x32xf32> to vector<8x8xf32>
    %53 = vector.extract_strided_slice %18 {offsets = [0, 16], sizes = [16, 8], strides = [1, 1]} : vector<16x32xf32> to vector<16x8xf32>
    %54 = vector.extract_strided_slice %19 {offsets = [0, 16], sizes = [16, 8], strides = [1, 1]} : vector<16x32xf32> to vector<16x8xf32>
    "tpu.trace_start"() <{level = 10 : i32, message = "qd,kd->qk"}> : () -> ()
    %cst_27 = arith.constant dense<0.000000e+00> : vector<8x16xf32>
    %55 = tpu.matmul %52, %53, %cst_27 {dimension_numbers = #tpu.dot_dimension_numbers<[1], [1], [0], [0], [0, 0, 1, 0], [], []>} : vector<8x8xf32>, vector<16x8xf32>, vector<8x16xf32> -> vector<8x16xf32>
    "tpu.trace_stop"() : () -> ()
    %cst_28 = arith.constant 0.353553385 : f32
    %56 = vector.broadcast %cst_28 : f32 to vector<8x16xf32>
    %57 = arith.mulf %55, %56 : vector<8x16xf32>
    %cst_29 = arith.constant dense<0xFF800000> : vector<8xf32>
    %58 = vector.multi_reduction <maximumf>, %57, %cst_29 [1] : vector<8x16xf32> to vector<8xf32>
    %59 = vector.shape_cast %58 : vector<8xf32> to vector<8x1xf32>
    %60 = vector.broadcast %59 : vector<8x1xf32> to vector<8x16xf32>
    %61 = arith.subf %57, %60 : vector<8x16xf32>
    %62 = math.exp %61 : vector<8x16xf32>
    %cst_30 = arith.constant dense<0.000000e+00> : vector<8xf32>
    %63 = vector.multi_reduction <add>, %62, %cst_30 [1] : vector<8x16xf32> to vector<8xf32>
    %64 = vector.shape_cast %63 : vector<8xf32> to vector<8x1xf32>
    %65 = vector.broadcast %64 : vector<8x1xf32> to vector<8x16xf32>
    %66 = arith.divf %62, %65 : vector<8x16xf32>
    %cst_31 = arith.constant dense<0.000000e+00> : vector<8x8xf32>
    %67 = tpu.matmul %66, %54, %cst_31 {dimension_numbers = #tpu.dot_dimension_numbers<[1], [0], [0], [1], [0, 0, 1, 1], [], []>} : vector<8x16xf32>, vector<16x8xf32>, vector<8x8xf32> -> vector<8x8xf32>
    %68 = vector.extract_strided_slice %17 {offsets = [0, 24], sizes = [8, 8], strides = [1, 1]} : vector<8x32xf32> to vector<8x8xf32>
    %69 = vector.extract_strided_slice %18 {offsets = [0, 24], sizes = [16, 8], strides = [1, 1]} : vector<16x32xf32> to vector<16x8xf32>
    %70 = vector.extract_strided_slice %19 {offsets = [0, 24], sizes = [16, 8], strides = [1, 1]} : vector<16x32xf32> to vector<16x8xf32>
    "tpu.trace_start"() <{level = 10 : i32, message = "qd,kd->qk"}> : () -> ()
    %cst_32 = arith.constant dense<0.000000e+00> : vector<8x16xf32>
    %71 = tpu.matmul %68, %69, %cst_32 {dimension_numbers = #tpu.dot_dimension_numbers<[1], [1], [0], [0], [0, 0, 1, 0], [], []>} : vector<8x8xf32>, vector<16x8xf32>, vector<8x16xf32> -> vector<8x16xf32>
    "tpu.trace_stop"() : () -> ()
    %cst_33 = arith.constant 0.353553385 : f32
    %72 = vector.broadcast %cst_33 : f32 to vector<8x16xf32>
    %73 = arith.mulf %71, %72 : vector<8x16xf32>
    %cst_34 = arith.constant dense<0xFF800000> : vector<8xf32>
    %74 = vector.multi_reduction <maximumf>, %73, %cst_34 [1] : vector<8x16xf32> to vector<8xf32>
    %75 = vector.shape_cast %74 : vector<8xf32> to vector<8x1xf32>
    %76 = vector.broadcast %75 : vector<8x1xf32> to vector<8x16xf32>
    %77 = arith.subf %73, %76 : vector<8x16xf32>
    %78 = math.exp %77 : vector<8x16xf32>
    %cst_35 = arith.constant dense<0.000000e+00> : vector<8xf32>
    %79 = vector.multi_reduction <add>, %78, %cst_35 [1] : vector<8x16xf32> to vector<8xf32>
    %80 = vector.shape_cast %79 : vector<8xf32> to vector<8x1xf32>
    %81 = vector.broadcast %80 : vector<8x1xf32> to vector<8x16xf32>
    %82 = arith.divf %78, %81 : vector<8x16xf32>
    %cst_36 = arith.constant dense<0.000000e+00> : vector<8x8xf32>
    %83 = tpu.matmul %82, %70, %cst_36 {dimension_numbers = #tpu.dot_dimension_numbers<[1], [0], [0], [1], [0, 0, 1, 1], [], []>} : vector<8x16xf32>, vector<16x8xf32>, vector<8x8xf32> -> vector<8x8xf32>
    %84 = tpu.concatenate %35, %51, %67, %83 in 1 : vector<8x8xf32>, vector<8x8xf32>, vector<8x8xf32>, vector<8x8xf32> -> vector<8x32xf32>
    %85 = vector.extract_strided_slice %6 {offsets = [8, 0], sizes = [8, 32], strides = [1, 1]} : vector<16x32xf32> to vector<8x32xf32>
    %86 = vector.extract_strided_slice %11 {offsets = [16, 0], sizes = [16, 32], strides = [1, 1]} : vector<32x32xf32> to vector<16x32xf32>
    %87 = vector.extract_strided_slice %16 {offsets = [16, 0], sizes = [16, 32], strides = [1, 1]} : vector<32x32xf32> to vector<16x32xf32>
    %88 = vector.extract_strided_slice %85 {offsets = [0, 0], sizes = [8, 8], strides = [1, 1]} : vector<8x32xf32> to vector<8x8xf32>
    %89 = vector.extract_strided_slice %86 {offsets = [0, 0], sizes = [16, 8], strides = [1, 1]} : vector<16x32xf32> to vector<16x8xf32>
    %90 = vector.extract_strided_slice %87 {offsets = [0, 0], sizes = [16, 8], strides = [1, 1]} : vector<16x32xf32> to vector<16x8xf32>
    "tpu.trace_start"() <{level = 10 : i32, message = "qd,kd->qk"}> : () -> ()
    %cst_37 = arith.constant dense<0.000000e+00> : vector<8x16xf32>
    %91 = tpu.matmul %88, %89, %cst_37 {dimension_numbers = #tpu.dot_dimension_numbers<[1], [1], [0], [0], [0, 0, 1, 0], [], []>} : vector<8x8xf32>, vector<16x8xf32>, vector<8x16xf32> -> vector<8x16xf32>
    "tpu.trace_stop"() : () -> ()
    %cst_38 = arith.constant 0.353553385 : f32
    %92 = vector.broadcast %cst_38 : f32 to vector<8x16xf32>
    %93 = arith.mulf %91, %92 : vector<8x16xf32>
    %cst_39 = arith.constant dense<0xFF800000> : vector<8xf32>
    %94 = vector.multi_reduction <maximumf>, %93, %cst_39 [1] : vector<8x16xf32> to vector<8xf32>
    %95 = vector.shape_cast %94 : vector<8xf32> to vector<8x1xf32>
    %96 = vector.broadcast %95 : vector<8x1xf32> to vector<8x16xf32>
    %97 = arith.subf %93, %96 : vector<8x16xf32>
    %98 = math.exp %97 : vector<8x16xf32>
    %cst_40 = arith.constant dense<0.000000e+00> : vector<8xf32>
    %99 = vector.multi_reduction <add>, %98, %cst_40 [1] : vector<8x16xf32> to vector<8xf32>
    %100 = vector.shape_cast %99 : vector<8xf32> to vector<8x1xf32>
    %101 = vector.broadcast %100 : vector<8x1xf32> to vector<8x16xf32>
    %102 = arith.divf %98, %101 : vector<8x16xf32>
    %cst_41 = arith.constant dense<0.000000e+00> : vector<8x8xf32>
    %103 = tpu.matmul %102, %90, %cst_41 {dimension_numbers = #tpu.dot_dimension_numbers<[1], [0], [0], [1], [0, 0, 1, 1], [], []>} : vector<8x16xf32>, vector<16x8xf32>, vector<8x8xf32> -> vector<8x8xf32>
    %104 = vector.extract_strided_slice %85 {offsets = [0, 8], sizes = [8, 8], strides = [1, 1]} : vector<8x32xf32> to vector<8x8xf32>
    %105 = vector.extract_strided_slice %86 {offsets = [0, 8], sizes = [16, 8], strides = [1, 1]} : vector<16x32xf32> to vector<16x8xf32>
    %106 = vector.extract_strided_slice %87 {offsets = [0, 8], sizes = [16, 8], strides = [1, 1]} : vector<16x32xf32> to vector<16x8xf32>
    "tpu.trace_start"() <{level = 10 : i32, message = "qd,kd->qk"}> : () -> ()
    %cst_42 = arith.constant dense<0.000000e+00> : vector<8x16xf32>
    %107 = tpu.matmul %104, %105, %cst_42 {dimension_numbers = #tpu.dot_dimension_numbers<[1], [1], [0], [0], [0, 0, 1, 0], [], []>} : vector<8x8xf32>, vector<16x8xf32>, vector<8x16xf32> -> vector<8x16xf32>
    "tpu.trace_stop"() : () -> ()
    %cst_43 = arith.constant 0.353553385 : f32
    %108 = vector.broadcast %cst_43 : f32 to vector<8x16xf32>
    %109 = arith.mulf %107, %108 : vector<8x16xf32>
    %cst_44 = arith.constant dense<0xFF800000> : vector<8xf32>
    %110 = vector.multi_reduction <maximumf>, %109, %cst_44 [1] : vector<8x16xf32> to vector<8xf32>
    %111 = vector.shape_cast %110 : vector<8xf32> to vector<8x1xf32>
    %112 = vector.broadcast %111 : vector<8x1xf32> to vector<8x16xf32>
    %113 = arith.subf %109, %112 : vector<8x16xf32>
    %114 = math.exp %113 : vector<8x16xf32>
    %cst_45 = arith.constant dense<0.000000e+00> : vector<8xf32>
    %115 = vector.multi_reduction <add>, %114, %cst_45 [1] : vector<8x16xf32> to vector<8xf32>
    %116 = vector.shape_cast %115 : vector<8xf32> to vector<8x1xf32>
    %117 = vector.broadcast %116 : vector<8x1xf32> to vector<8x16xf32>
    %118 = arith.divf %114, %117 : vector<8x16xf32>
    %cst_46 = arith.constant dense<0.000000e+00> : vector<8x8xf32>
    %119 = tpu.matmul %118, %106, %cst_46 {dimension_numbers = #tpu.dot_dimension_numbers<[1], [0], [0], [1], [0, 0, 1, 1], [], []>} : vector<8x16xf32>, vector<16x8xf32>, vector<8x8xf32> -> vector<8x8xf32>
    %120 = vector.extract_strided_slice %85 {offsets = [0, 16], sizes = [8, 8], strides = [1, 1]} : vector<8x32xf32> to vector<8x8xf32>
    %121 = vector.extract_strided_slice %86 {offsets = [0, 16], sizes = [16, 8], strides = [1, 1]} : vector<16x32xf32> to vector<16x8xf32>
    %122 = vector.extract_strided_slice %87 {offsets = [0, 16], sizes = [16, 8], strides = [1, 1]} : vector<16x32xf32> to vector<16x8xf32>
    "tpu.trace_start"() <{level = 10 : i32, message = "qd,kd->qk"}> : () -> ()
    %cst_47 = arith.constant dense<0.000000e+00> : vector<8x16xf32>
    %123 = tpu.matmul %120, %121, %cst_47 {dimension_numbers = #tpu.dot_dimension_numbers<[1], [1], [0], [0], [0, 0, 1, 0], [], []>} : vector<8x8xf32>, vector<16x8xf32>, vector<8x16xf32> -> vector<8x16xf32>
    "tpu.trace_stop"() : () -> ()
    %cst_48 = arith.constant 0.353553385 : f32
    %124 = vector.broadcast %cst_48 : f32 to vector<8x16xf32>
    %125 = arith.mulf %123, %124 : vector<8x16xf32>
    %cst_49 = arith.constant dense<0xFF800000> : vector<8xf32>
    %126 = vector.multi_reduction <maximumf>, %125, %cst_49 [1] : vector<8x16xf32> to vector<8xf32>
    %127 = vector.shape_cast %126 : vector<8xf32> to vector<8x1xf32>
    %128 = vector.broadcast %127 : vector<8x1xf32> to vector<8x16xf32>
    %129 = arith.subf %125, %128 : vector<8x16xf32>
    %130 = math.exp %129 : vector<8x16xf32>
    %cst_50 = arith.constant dense<0.000000e+00> : vector<8xf32>
    %131 = vector.multi_reduction <add>, %130, %cst_50 [1] : vector<8x16xf32> to vector<8xf32>
    %132 = vector.shape_cast %131 : vector<8xf32> to vector<8x1xf32>
    %133 = vector.broadcast %132 : vector<8x1xf32> to vector<8x16xf32>
    %134 = arith.divf %130, %133 : vector<8x16xf32>
    %cst_51 = arith.constant dense<0.000000e+00> : vector<8x8xf32>
    %135 = tpu.matmul %134, %122, %cst_51 {dimension_numbers = #tpu.dot_dimension_numbers<[1], [0], [0], [1], [0, 0, 1, 1], [], []>} : vector<8x16xf32>, vector<16x8xf32>, vector<8x8xf32> -> vector<8x8xf32>
    %136 = vector.extract_strided_slice %85 {offsets = [0, 24], sizes = [8, 8], strides = [1, 1]} : vector<8x32xf32> to vector<8x8xf32>
    %137 = vector.extract_strided_slice %86 {offsets = [0, 24], sizes = [16, 8], strides = [1, 1]} : vector<16x32xf32> to vector<16x8xf32>
    %138 = vector.extract_strided_slice %87 {offsets = [0, 24], sizes = [16, 8], strides = [1, 1]} : vector<16x32xf32> to vector<16x8xf32>
    "tpu.trace_start"() <{level = 10 : i32, message = "qd,kd->qk"}> : () -> ()
    %cst_52 = arith.constant dense<0.000000e+00> : vector<8x16xf32>
    %139 = tpu.matmul %136, %137, %cst_52 {dimension_numbers = #tpu.dot_dimension_numbers<[1], [1], [0], [0], [0, 0, 1, 0], [], []>} : vector<8x8xf32>, vector<16x8xf32>, vector<8x16xf32> -> vector<8x16xf32>
    "tpu.trace_stop"() : () -> ()
    %cst_53 = arith.constant 0.353553385 : f32
    %140 = vector.broadcast %cst_53 : f32 to vector<8x16xf32>
    %141 = arith.mulf %139, %140 : vector<8x16xf32>
    %cst_54 = arith.constant dense<0xFF800000> : vector<8xf32>
    %142 = vector.multi_reduction <maximumf>, %141, %cst_54 [1] : vector<8x16xf32> to vector<8xf32>
    %143 = vector.shape_cast %142 : vector<8xf32> to vector<8x1xf32>
    %144 = vector.broadcast %143 : vector<8x1xf32> to vector<8x16xf32>
    %145 = arith.subf %141, %144 : vector<8x16xf32>
    %146 = math.exp %145 : vector<8x16xf32>
    %cst_55 = arith.constant dense<0.000000e+00> : vector<8xf32>
    %147 = vector.multi_reduction <add>, %146, %cst_55 [1] : vector<8x16xf32> to vector<8xf32>
    %148 = vector.shape_cast %147 : vector<8xf32> to vector<8x1xf32>
    %149 = vector.broadcast %148 : vector<8x1xf32> to vector<8x16xf32>
    %150 = arith.divf %146, %149 : vector<8x16xf32>
    %cst_56 = arith.constant dense<0.000000e+00> : vector<8x8xf32>
    %151 = tpu.matmul %150, %138, %cst_56 {dimension_numbers = #tpu.dot_dimension_numbers<[1], [0], [0], [1], [0, 0, 1, 1], [], []>} : vector<8x16xf32>, vector<16x8xf32>, vector<8x8xf32> -> vector<8x8xf32>
    %152 = tpu.concatenate %103, %119, %135, %151 in 1 : vector<8x8xf32>, vector<8x8xf32>, vector<8x8xf32>, vector<8x8xf32> -> vector<8x32xf32>
    %153 = tpu.concatenate %84, %152 in 0 : vector<8x32xf32>, vector<8x32xf32> -> vector<16x32xf32>
    %c0_57 = arith.constant 0 : index
    %c0_58 = arith.constant 0 : index
    %154 = vector.load %arg8[%c0_57, %c0_58] : memref<32x32xf32, #tpu.memory_space<vmem>>, vector<32x32xf32>
    %cst_59 = arith.constant dense<0.000000e+00> : vector<16x32xf32>
    %155 = tpu.matmul %153, %154, %cst_59 {dimension_numbers = #tpu.dot_dimension_numbers<[1], [0], [0], [1], [0, 0, 1, 1], [], []>} : vector<16x32xf32>, vector<32x32xf32>, vector<16x32xf32> -> vector<16x32xf32>
    %c0_60 = arith.constant 0 : index
    %c0_61 = arith.constant 0 : index
    %156 = vector.load %arg9[%c0_60, %c0_61] : memref<1x32xf32, #tpu.memory_space<vmem>>, vector<1x32xf32>
    %157 = vector.broadcast %156 : vector<1x32xf32> to vector<16x32xf32>
    %158 = arith.addf %155, %157 : vector<16x32xf32>
    %159 = arith.addf %0, %158 : vector<16x32xf32>
    %c0_62 = arith.constant 0 : index
    %c0_63 = arith.constant 0 : index
    %160 = vector.load %arg10[%c0_62, %c0_63] : memref<1x32xf32, #tpu.memory_space<vmem>>, vector<1x32xf32>
    %c0_64 = arith.constant 0 : index
    %c0_65 = arith.constant 0 : index
    %161 = vector.load %arg11[%c0_64, %c0_65] : memref<1x32xf32, #tpu.memory_space<vmem>>, vector<1x32xf32>
    %cst_66 = arith.constant dense<0.000000e+00> : vector<16xf32>
    %162 = vector.multi_reduction <add>, %159, %cst_66 [1] : vector<16x32xf32> to vector<16xf32>
    %163 = vector.shape_cast %162 : vector<16xf32> to vector<16x1xf32>
    %cst_67 = arith.constant 3.200000e+01 : f32
    %164 = vector.broadcast %cst_67 : f32 to vector<16x1xf32>
    %165 = arith.divf %163, %164 : vector<16x1xf32>
    %166 = vector.broadcast %165 : vector<16x1xf32> to vector<16x32xf32>
    %167 = arith.subf %159, %166 : vector<16x32xf32>
    %168 = vector.broadcast %165 : vector<16x1xf32> to vector<16x32xf32>
    %169 = arith.subf %159, %168 : vector<16x32xf32>
    %170 = arith.mulf %167, %169 : vector<16x32xf32>
    %cst_68 = arith.constant dense<0.000000e+00> : vector<16xf32>
    %171 = vector.multi_reduction <add>, %170, %cst_68 [1] : vector<16x32xf32> to vector<16xf32>
    %172 = vector.shape_cast %171 : vector<16xf32> to vector<16x1xf32>
    %cst_69 = arith.constant 3.200000e+01 : f32
    %173 = vector.broadcast %cst_69 : f32 to vector<16x1xf32>
    %174 = arith.divf %172, %173 : vector<16x1xf32>
    %175 = vector.broadcast %165 : vector<16x1xf32> to vector<16x32xf32>
    %176 = arith.subf %159, %175 : vector<16x32xf32>
    %cst_70 = arith.constant 9.99999974E-6 : f32
    %177 = vector.broadcast %cst_70 : f32 to vector<16x1xf32>
    %178 = arith.addf %174, %177 : vector<16x1xf32>
    %179 = math.rsqrt %178 : vector<16x1xf32>
    %180 = vector.broadcast %179 : vector<16x1xf32> to vector<16x32xf32>
    %181 = arith.mulf %176, %180 : vector<16x32xf32>
    %182 = vector.broadcast %160 : vector<1x32xf32> to vector<16x32xf32>
    %183 = arith.mulf %181, %182 : vector<16x32xf32>
    %184 = vector.broadcast %161 : vector<1x32xf32> to vector<16x32xf32>
    %185 = arith.addf %183, %184 : vector<16x32xf32>
    %c0_71 = arith.constant 0 : index
    %c0_72 = arith.constant 0 : index
    %186 = vector.load %arg12[%c0_71, %c0_72] : memref<16x32xf32, #tpu.memory_space<vmem>>, vector<16x32xf32>
    tpu.vector_store %arg12[%c0_71, %c0_72], %185 {strides = array<i32>} : memref<16x32xf32, #tpu.memory_space<vmem>>, vector<16x32xf32>,
    return
  }
}

module attributes {stable_mosaic.version = 11 : i64} {
  func.func @_attn_block_kernel(%arg0: memref<16x32xf32, #tpu.memory_space<vmem>>, %arg1: memref<32x32xf32, #tpu.memory_space<vmem>>, %arg2: memref<32x32xf32, #tpu.memory_space<vmem>>, %arg3: memref<1x32xf32, #tpu.memory_space<vmem>>, %arg4: memref<32x32xf32, #tpu.memory_space<vmem>>, %arg5: memref<1x32xf32, #tpu.memory_space<vmem>>, %arg6: memref<32x32xf32, #tpu.memory_space<vmem>>, %arg7: memref<1x32xf32, #tpu.memory_space<vmem>>, %arg8: memref<32x32xf32, #tpu.memory_space<vmem>>, %arg9: memref<1x32xf32, #tpu.memory_space<vmem>>, %arg10: memref<1x32xf32, #tpu.memory_space<vmem>>, %arg11: memref<1x32xf32, #tpu.memory_space<vmem>>, %arg12: memref<16x32xf32, #tpu.memory_space<vmem>>) attributes {dimension_semantics = [], scalar_prefetch = 0 : i64, scratch_operands = 0 : i64, tpu.core_type = #tpu.core_type<tc>} {
    %c0 = arith.constant 0 : index
    %c0_0 = arith.constant 0 : index
    %0 = vector.load %arg0[%c0, %c0_0] : memref<16x32xf32, #tpu.memory_space<vmem>>, vector<16x32xf32>
    %c0_1 = arith.constant 0 : index
    %c0_2 = arith.constant 0 : index
    %1 = vector.load %arg1[%c0_1, %c0_2] : memref<32x32xf32, #tpu.memory_space<vmem>>, vector<32x32xf32>
    %c0_3 = arith.constant 0 : index
    %c0_4 = arith.constant 0 : index
    %2 = vector.load %arg2[%c0_3, %c0_4] : memref<32x32xf32, #tpu.memory_space<vmem>>, vector<32x32xf32>
    %cst = arith.constant dense<0.000000e+00> : vector<16x32xf32>
    %3 = tpu.matmul %0, %2, %cst {dimension_numbers = #tpu.dot_dimension_numbers<[1], [0], [0], [1], [0, 0, 1, 1], [], []>} : vector<16x32xf32>, vector<32x32xf32>, vector<16x32xf32> -> vector<16x32xf32>
    %c0_5 = arith.constant 0 : index
    %c0_6 = arith.constant 0 : index
    %4 = vector.load %arg3[%c0_5, %c0_6] : memref<1x32xf32, #tpu.memory_space<vmem>>, vector<1x32xf32>
    %5 = vector.broadcast %4 : vector<1x32xf32> to vector<16x32xf32>
    %6 = arith.addf %3, %5 : vector<16x32xf32>
    %c0_7 = arith.constant 0 : index
    %c0_8 = arith.constant 0 : index
    %7 = vector.load %arg4[%c0_7, %c0_8] : memref<32x32xf32, #tpu.memory_space<vmem>>, vector<32x32xf32>
    %cst_9 = arith.constant dense<0.000000e+00> : vector<32x32xf32>
    %8 = tpu.matmul %1, %7, %cst_9 {dimension_numbers = #tpu.dot_dimension_numbers<[1], [0], [0], [1], [0, 0, 1, 1], [], []>} : vector<32x32xf32>, vector<32x32xf32>, vector<32x32xf32> -> vector<32x32xf32>
    %c0_10 = arith.constant 0 : index
    %c0_11 = arith.constant 0 : index
    %9 = vector.load %arg5[%c0_10, %c0_11] : memref<1x32xf32, #tpu.memory_space<vmem>>, vector<1x32xf32>
    %10 = vector.broadcast %9 : vector<1x32xf32> to vector<32x32xf32>
    %11 = arith.addf %8, %10 : vector<32x32xf32>
    %c0_12 = arith.constant 0 : index
    %c0_13 = arith.constant 0 : index
    %12 = vector.load %arg6[%c0_12, %c0_13] : memref<32x32xf32, #tpu.memory_space<vmem>>, vector<32x32xf32>
    %cst_14 = arith.constant dense<0.000000e+00> : vector<32x32xf32>
    %13 = tpu.matmul %1, %12, %cst_14 {dimension_numbers = #tpu.dot_dimension_numbers<[1], [0], [0], [1], [0, 0, 1, 1], [], []>} : vector<32x32xf32>, vector<32x32xf32>, vector<32x32xf32> -> vector<32x32xf32>
    %c0_15 = arith.constant 0 : index
    %c0_16 = arith.constant 0 : index
    %14 = vector.load %arg7[%c0_15, %c0_16] : memref<1x32xf32, #tpu.memory_space<vmem>>, vector<1x32xf32>
    %15 = vector.broadcast %14 : vector<1x32xf32> to vector<32x32xf32>
    %16 = arith.addf %13, %15 : vector<32x32xf32>
    %17 = vector.extract_strided_slice %6 {offsets = [0, 0], sizes = [8, 32], strides = [1, 1]} : vector<16x32xf32> to vector<8x32xf32>
    %18 = vector.extract_strided_slice %11 {offsets = [0, 0], sizes = [16, 32], strides = [1, 1]} : vector<32x32xf32> to vector<16x32xf32>
    %19 = vector.extract_strided_slice %16 {offsets = [0, 0], sizes = [16, 32], strides = [1, 1]} : vector<32x32xf32> to vector<16x32xf32>
    %20 = vector.extract_strided_slice %17 {offsets = [0, 0], sizes = [8, 8], strides = [1, 1]} : vector<8x32xf32> to vector<8x8xf32>
    %21 = vector.extract_strided_slice %18 {offsets = [0, 0], sizes = [16, 8], strides = [1, 1]} : vector<16x32xf32> to vector<16x8xf32>
    %22 = vector.extract_strided_slice %19 {offsets = [0, 0], sizes = [16, 8], strides = [1, 1]} : vector<16x32xf32> to vector<16x8xf32>
    "tpu.trace_start"() <{level = 10 : i32, message = "qd,kd->qk"}> : () -> ()
    %cst_17 = arith.constant dense<0.000000e+00> : vector<8x16xf32>
    %23 = tpu.matmul %20, %21, %cst_17 {dimension_numbers = #tpu.dot_dimension_numbers<[1], [1], [0], [0], [0, 0, 1, 0], [], []>} : vector<8x8xf32>, vector<16x8xf32>, vector<8x16xf32> -> vector<8x16xf32>
    "tpu.trace_stop"() : () -> ()
    %cst_18 = arith.constant 0.353553385 : f32
    %24 = vector.broadcast %cst_18 : f32 to vector<8x16xf32>
    %25 = arith.mulf %23, %24 : vector<8x16xf32>
    %cst_19 = arith.constant dense<0xFF800000> : vector<8xf32>
    %26 = vector.multi_reduction <maximumf>, %25, %cst_19 [1] : vector<8x16xf32> to vector<8xf32>
    %27 = vector.shape_cast %26 : vector<8xf32> to vector<8x1xf32>
    %28 = vector.broadcast %27 : vector<8x1xf32> to vector<8x16xf32>
    %29 = arith.subf %25, %28 : vector<8x16xf32>
    %30 = math.exp %29 : vector<8x16xf32>
    %cst_20 = arith.constant dense<0.000000e+00> : vector<8xf32>
    %31 = vector.multi_reduction <add>, %30, %cst_20 [1] : vector<8x16xf32> to vector<8xf32>
    %32 = vector.shape_cast %31 : vector<8xf32> to vector<8x1xf32>
    %33 = vector.broadcast %32 : vector<8x1xf32> to vector<8x16xf32>
    %34 = arith.divf %30, %33 : vector<8x16xf32>
    %cst_21 = arith.constant dense<0.000000e+00> : vector<8x8xf32>
    %35 = tpu.matmul %34, %22, %cst_21 {dimension_numbers = #tpu.dot_dimension_numbers<[1], [0], [0], [1], [0, 0, 1, 1], [], []>} : vector<8x16xf32>, vector<16x8xf32>, vector<8x8xf32> -> vector<8x8xf32>
    %36 = vector.extract_strided_slice %17 {offsets = [0, 8], sizes = [8, 8], strides = [1, 1]} : vector<8x32xf32> to vector<8x8xf32>
    %37 = vector.extract_strided_slice %18 {offsets = [0, 8], sizes = [16, 8], strides = [1, 1]} : vector<16x32xf32> to vector<16x8xf32>
    %38 = vector.extract_strided_slice %19 {offsets = [0, 8], sizes = [16, 8], strides = [1, 1]} : vector<16x32xf32> to vector<16x8xf32>
    "tpu.trace_start"() <{level = 10 : i32, message = "qd,kd->qk"}> : () -> ()
    %cst_22 = arith.constant dense<0.000000e+00> : vector<8x16xf32>
    %39 = tpu.matmul %36, %37, %cst_22 {dimension_numbers = #tpu.dot_dimension_numbers<[1], [1], [0], [0], [0, 0, 1, 0], [], []>} : vector<8x8xf32>, vector<16x8xf32>, vector<8x16xf32> -> vector<8x16xf32>
    "tpu.trace_stop"() : () -> ()
    %cst_23 = arith.constant 0.353553385 : f32
    %40 = vector.broadcast %cst_23 : f32 to vector<8x16xf32>
    %41 = arith.mulf %39, %40 : vector<8x16xf32>
    %cst_24 = arith.constant dense<0xFF800000> : vector<8xf32>
    %42 = vector.multi_reduction <maximumf>, %41, %cst_24 [1] : vector<8x16xf32> to vector<8xf32>
    %43 = vector.shape_cast %42 : vector<8xf32> to vector<8x1xf32>
    %44 = vector.broadcast %43 : vector<8x1xf32> to vector<8x16xf32>
    %45 = arith.subf %41, %44 : vector<8x16xf32>
    %46 = math.exp %45 : vector<8x16xf32>
    %cst_25 = arith.constant dense<0.000000e+00> : vector<8xf32>
    %47 = vector.multi_reduction <add>, %46, %cst_25 [1] : vector<8x16xf32> to vector<8xf32>
    %48 = vector.shape_cast %47 : vector<8xf32> to vector<8x1xf32>
    %49 = vector.broadcast %48 : vector<8x1xf32> to vector<8x16xf32>
    %50 = arith.divf %46, %49 : vector<8x16xf32>
    %cst_26 = arith.constant dense<0.000000e+00> : vector<8x8xf32>
    %51 = tpu.matmul %50, %38, %cst_26 {dimension_numbers = #tpu.dot_dimension_numbers<[1], [0], [0], [1], [0, 0, 1, 1], [], []>} : vector<8x16xf32>, vector<16x8xf32>, vector<8x8xf32> -> vector<8x8xf32>
    %52 = vector.extract_strided_slice %17 {offsets = [0, 16], sizes = [8, 8], strides = [1, 1]} : vector<8x32xf32> to vector<8x8xf32>
    %53 = vector.extract_strided_slice %18 {offsets = [0, 16], sizes = [16, 8], strides = [1, 1]} : vector<16x32xf32> to vector<16x8xf32>
    %54 = vector.extract_strided_slice %19 {offsets = [0, 16], sizes = [16, 8], strides = [1, 1]} : vector<16x32xf32> to vector<16x8xf32>
    "tpu.trace_start"() <{level = 10 : i32, message = "qd,kd->qk"}> : () -> ()
    %cst_27 = arith.constant dense<0.000000e+00> : vector<8x16xf32>
    %55 = tpu.matmul %52, %53, %cst_27 {dimension_numbers = #tpu.dot_dimension_numbers<[1], [1], [0], [0], [0, 0, 1, 0], [], []>} : vector<8x8xf32>, vector<16x8xf32>, vector<8x16xf32> -> vector<8x16xf32>
    "tpu.trace_stop"() : () -> ()
    %cst_28 = arith.constant 0.353553385 : f32
    %56 = vector.broadcast %cst_28 : f32 to vector<8x16xf32>
    %57 = arith.mulf %55, %56 : vector<8x16xf32>
    %cst_29 = arith.constant dense<0xFF800000> : vector<8xf32>
    %58 = vector.multi_reduction <maximumf>, %57, %cst_29 [1] : vector<8x16xf32> to vector<8xf32>
    %59 = vector.shape_cast %58 : vector<8xf32> to vector<8x1xf32>
    %60 = vector.broadcast %59 : vector<8x1xf32> to vector<8x16xf32>
    %61 = arith.subf %57, %60 : vector<8x16xf32>
    %62 = math.exp %61 : vector<8x16xf32>
    %cst_30 = arith.constant dense<0.000000e+00> : vector<8xf32>
    %63 = vector.multi_reduction <add>, %62, %cst_30 [1] : vector<8x16xf32> to vector<8xf32>
    %64 = vector.shape_cast %63 : vector<8xf32> to vector<8x1xf32>
    %65 = vector.broadcast %64 : vector<8x1xf32> to vector<8x16xf32>
    %66 = arith.divf %62, %65 : vector<8x16xf32>
    %cst_31 = arith.constant dense<0.000000e+00> : vector<8x8xf32>
    %67 = tpu.matmul %66, %54, %cst_31 {dimension_numbers = #tpu.dot_dimension_numbers<[1], [0], [0], [1], [0, 0, 1, 1], [], []>} : vector<8x16xf32>, vector<16x8xf32>, vector<8x8xf32> -> vector<8x8xf32>
    %68 = vector.extract_strided_slice %17 {offsets = [0, 24], sizes = [8, 8], strides = [1, 1]} : vector<8x32xf32> to vector<8x8xf32>
    %69 = vector.extract_strided_slice %18 {offsets = [0, 24], sizes = [16, 8], strides = [1, 1]} : vector<16x32xf32> to vector<16x8xf32>
    %70 = vector.extract_strided_slice %19 {offsets = [0, 24], sizes = [16, 8], strides = [1, 1]} : vector<16x32xf32> to vector<16x8xf32>
    "tpu.trace_start"() <{level = 10 : i32, message = "qd,kd->qk"}> : () -> ()
    %cst_32 = arith.constant dense<0.000000e+00> : vector<8x16xf32>
    %71 = tpu.matmul %68, %69, %cst_32 {dimension_numbers = #tpu.dot_dimension_numbers<[1], [1], [0], [0], [0, 0, 1, 0], [], []>} : vector<8x8xf32>, vector<16x8xf32>, vector<8x16xf32> -> vector<8x16xf32>
    "tpu.trace_stop"() : () -> ()
    %cst_33 = arith.constant 0.353553385 : f32
    %72 = vector.broadcast %cst_33 : f32 to vector<8x16xf32>
    %73 = arith.mulf %71, %72 : vector<8x16xf32>
    %cst_34 = arith.constant dense<0xFF800000> : vector<8xf32>
    %74 = vector.multi_reduction <maximumf>, %73, %cst_34 [1] : vector<8x16xf32> to vector<8xf32>
    %75 = vector.shape_cast %74 : vector<8xf32> to vector<8x1xf32>
    %76 = vector.broadcast %75 : vector<8x1xf32> to vector<8x16xf32>
    %77 = arith.subf %73, %76 : vector<8x16xf32>
    %78 = math.exp %77 : vector<8x16xf32>
    %cst_35 = arith.constant dense<0.000000e+00> : vector<8xf32>
    %79 = vector.multi_reduction <add>, %78, %cst_35 [1] : vector<8x16xf32> to vector<8xf32>
    %80 = vector.shape_cast %79 : vector<8xf32> to vector<8x1xf32>
    %81 = vector.broadcast %80 : vector<8x1xf32> to vector<8x16xf32>
    %82 = arith.divf %78, %81 : vector<8x16xf32>
    %cst_36 = arith.constant dense<0.000000e+00> : vector<8x8xf32>
    %83 = tpu.matmul %82, %70, %cst_36 {dimension_numbers = #tpu.dot_dimension_numbers<[1], [0], [0], [1], [0, 0, 1, 1], [], []>} : vector<8x16xf32>, vector<16x8xf32>, vector<8x8xf32> -> vector<8x8xf32>
    %84 = tpu.concatenate %35, %51, %67, %83 in 1 : vector<8x8xf32>, vector<8x8xf32>, vector<8x8xf32>, vector<8x8xf32> -> vector<8x32xf32>
    %85 = vector.extract_strided_slice %6 {offsets = [8, 0], sizes = [8, 32], strides = [1, 1]} : vector<16x32xf32> to vector<8x32xf32>
    %86 = vector.extract_strided_slice %11 {offsets = [16, 0], sizes = [16, 32], strides = [1, 1]} : vector<32x32xf32> to vector<16x32xf32>
    %87 = vector.extract_strided_slice %16 {offsets = [16, 0], sizes = [16, 32], strides = [1, 1]} : vector<32x32xf32> to vector<16x32xf32>
    %88 = vector.extract_strided_slice %85 {offsets = [0, 0], sizes = [8, 8], strides = [1, 1]} : vector<8x32xf32> to vector<8x8xf32>
    %89 = vector.extract_strided_slice %86 {offsets = [0, 0], sizes = [16, 8], strides = [1, 1]} : vector<16x32xf32> to vector<16x8xf32>
    %90 = vector.extract_strided_slice %87 {offsets = [0, 0], sizes = [16, 8], strides = [1, 1]} : vector<16x32xf32> to vector<16x8xf32>
    "tpu.trace_start"() <{level = 10 : i32, message = "qd,kd->qk"}> : () -> ()
    %cst_37 = arith.constant dense<0.000000e+00> : vector<8x16xf32>
    %91 = tpu.matmul %88, %89, %cst_37 {dimension_numbers = #tpu.dot_dimension_numbers<[1], [1], [0], [0], [0, 0, 1, 0], [], []>} : vector<8x8xf32>, vector<16x8xf32>, vector<8x16xf32> -> vector<8x16xf32>
    "tpu.trace_stop"() : () -> ()
    %cst_38 = arith.constant 0.353553385 : f32
    %92 = vector.broadcast %cst_38 : f32 to vector<8x16xf32>
    %93 = arith.mulf %91, %92 : vector<8x16xf32>
    %cst_39 = arith.constant dense<0xFF800000> : vector<8xf32>
    %94 = vector.multi_reduction <maximumf>, %93, %cst_39 [1] : vector<8x16xf32> to vector<8xf32>
    %95 = vector.shape_cast %94 : vector<8xf32> to vector<8x1xf32>
    %96 = vector.broadcast %95 : vector<8x1xf32> to vector<8x16xf32>
    %97 = arith.subf %93, %96 : vector<8x16xf32>
    %98 = math.exp %97 : vector<8x16xf32>
    %cst_40 = arith.constant dense<0.000000e+00> : vector<8xf32>
    %99 = vector.multi_reduction <add>, %98, %cst_40 [1] : vector<8x16xf32> to vector<8xf32>
    %100 = vector.shape_cast %99 : vector<8xf32> to vector<8x1xf32>
    %101 = vector.broadcast %100 : vector<8x1xf32> to vector<8x16xf32>
    %102 = arith.divf %98, %101 : vector<8x16xf32>
    %cst_41 = arith.constant dense<0.000000e+00> : vector<8x8xf32>
    %103 = tpu.matmul %102, %90, %cst_41 {dimension_numbers = #tpu.dot_dimension_numbers<[1], [0], [0], [1], [0, 0, 1, 1], [], []>} : vector<8x16xf32>, vector<16x8xf32>, vector<8x8xf32> -> vector<8x8xf32>
    %104 = vector.extract_strided_slice %85 {offsets = [0, 8], sizes = [8, 8], strides = [1, 1]} : vector<8x32xf32> to vector<8x8xf32>
    %105 = vector.extract_strided_slice %86 {offsets = [0, 8], sizes = [16, 8], strides = [1, 1]} : vector<16x32xf32> to vector<16x8xf32>
    %106 = vector.extract_strided_slice %87 {offsets = [0, 8], sizes = [16, 8], strides = [1, 1]} : vector<16x32xf32> to vector<16x8xf32>
    "tpu.trace_start"() <{level = 10 : i32, message = "qd,kd->qk"}> : () -> ()
    %cst_42 = arith.constant dense<0.000000e+00> : vector<8x16xf32>
    %107 = tpu.matmul %104, %105, %cst_42 {dimension_numbers = #tpu.dot_dimension_numbers<[1], [1], [0], [0], [0, 0, 1, 0], [], []>} : vector<8x8xf32>, vector<16x8xf32>, vector<8x16xf32> -> vector<8x16xf32>
    "tpu.trace_stop"() : () -> ()
    %cst_43 = arith.constant 0.353553385 : f32
    %108 = vector.broadcast %cst_43 : f32 to vector<8x16xf32>
    %109 = arith.mulf %107, %108 : vector<8x16xf32>
    %cst_44 = arith.constant dense<0xFF800000> : vector<8xf32>
    %110 = vector.multi_reduction <maximumf>, %109, %cst_44 [1] : vector<8x16xf32> to vector<8xf32>
    %111 = vector.shape_cast %110 : vector<8xf32> to vector<8x1xf32>
    %112 = vector.broadcast %111 : vector<8x1xf32> to vector<8x16xf32>
    %113 = arith.subf %109, %112 : vector<8x16xf32>
    %114 = math.exp %113 : vector<8x16xf32>
    %cst_45 = arith.constant dense<0.000000e+00> : vector<8xf32>
    %115 = vector.multi_reduction <add>, %114, %cst_45 [1] : vector<8x16xf32> to vector<8xf32>
    %116 = vector.shape_cast %115 : vector<8xf32> to vector<8x1xf32>
    %117 = vector.broadcast %116 : vector<8x1xf32> to vector<8x16xf32>
    %118 = arith.divf %114, %117 : vector<8x16xf32>
    %cst_46 = arith.constant dense<0.000000e+00> : vector<8x8xf32>
    %119 = tpu.matmul %118, %106, %cst_46 {dimension_numbers = #tpu.dot_dimension_numbers<[1], [0], [0], [1], [0, 0, 1, 1], [], []>} : vector<8x16xf32>, vector<16x8xf32>, vector<8x8xf32> -> vector<8x8xf32>
    %120 = vector.extract_strided_slice %85 {offsets = [0, 16], sizes = [8, 8], strides = [1, 1]} : vector<8x32xf32> to vector<8x8xf32>
    %121 = vector.extract_strided_slice %86 {offsets = [0, 16], sizes = [16, 8], strides = [1, 1]} : vector<16x32xf32> to vector<16x8xf32>
    %122 = vector.extract_strided_slice %87 {offsets = [0, 16], sizes = [16, 8], strides = [1, 1]} : vector<16x32xf32> to vector<16x8xf32>
    "tpu.trace_start"() <{level = 10 : i32, message = "qd,kd->qk"}> : () -> ()
    %cst_47 = arith.constant dense<0.000000e+00> : vector<8x16xf32>
    %123 = tpu.matmul %120, %121, %cst_47 {dimension_numbers = #tpu.dot_dimension_numbers<[1], [1], [0], [0], [0, 0, 1, 0], [], []>} : vector<8x8xf32>, vector<16x8xf32>, vector<8x16xf32> -> vector<8x16xf32>
    "tpu.trace_stop"() : () -> ()
    %cst_48 = arith.constant 0.353553385 : f32
    %124 = vector.broadcast %cst_48 : f32 to vector<8x16xf32>
    %125 = arith.mulf %123, %124 : vector<8x16xf32>
    %cst_49 = arith.constant dense<0xFF800000> : vector<8xf32>
    %126 = vector.multi_reduction <maximumf>, %125, %cst_49 [1] : vector<8x16xf32> to vector<8xf32>
    %127 = vector.shape_cast %126 : vector<8xf32> to vector<8x1xf32>
    %128 = vector.broadcast %127 : vector<8x1xf32> to vector<8x16xf32>
    %129 = arith.subf %125, %128 : vector<8x16xf32>
    %130 = math.exp %129 : vector<8x16xf32>
    %cst_50 = arith.constant dense<0.000000e+00> : vector<8xf32>
    %131 = vector.multi_reduction <add>, %130, %cst_50 [1] : vector<8x16xf32> to vector<8xf32>
    %132 = vector.shape_cast %131 : vector<8xf32> to vector<8x1xf32>
    %133 = vector.broadcast %132 : vector<8x1xf32> to vector<8x16xf32>
    %134 = arith.divf %130, %133 : vector<8x16xf32>
    %cst_51 = arith.constant dense<0.000000e+00> : vector<8x8xf32>
    %135 = tpu.matmul %134, %122, %cst_51 {dimension_numbers = #tpu.dot_dimension_numbers<[1], [0], [0], [1], [0, 0, 1, 1], [], []>} : vector<8x16xf32>, vector<16x8xf32>, vector<8x8xf32> -> vector<8x8xf32>
    %136 = vector.extract_strided_slice %85 {offsets = [0, 24], sizes = [8, 8], strides = [1, 1]} : vector<8x32xf32> to vector<8x8xf32>
    %137 = vector.extract_strided_slice %86 {offsets = [0, 24], sizes = [16, 8], strides = [1, 1]} : vector<16x32xf32> to vector<16x8xf32>
    %138 = vector.extract_strided_slice %87 {offsets = [0, 24], sizes = [16, 8], strides = [1, 1]} : vector<16x32xf32> to vector<16x8xf32>
    "tpu.trace_start"() <{level = 10 : i32, message = "qd,kd->qk"}> : () -> ()
    %cst_52 = arith.constant dense<0.000000e+00> : vector<8x16xf32>
    %139 = tpu.matmul %136, %137, %cst_52 {dimension_numbers = #tpu.dot_dimension_numbers<[1], [1], [0], [0], [0, 0, 1, 0], [], []>} : vector<8x8xf32>, vector<16x8xf32>, vector<8x16xf32> -> vector<8x16xf32>
    "tpu.trace_stop"() : () -> ()
    %cst_53 = arith.constant 0.353553385 : f32
    %140 = vector.broadcast %cst_53 : f32 to vector<8x16xf32>
    %141 = arith.mulf %139, %140 : vector<8x16xf32>
    %cst_54 = arith.constant dense<0xFF800000> : vector<8xf32>
    %142 = vector.multi_reduction <maximumf>, %141, %cst_54 [1] : vector<8x16xf32> to vector<8xf32>
    %143 = vector.shape_cast %142 : vector<8xf32> to vector<8x1xf32>
    %144 = vector.broadcast %143 : vector<8x1xf32> to vector<8x16xf32>
    %145 = arith.subf %141, %144 : vector<8x16xf32>
    %146 = math.exp %145 : vector<8x16xf32>
    %cst_55 = arith.constant dense<0.000000e+00> : vector<8xf32>
    %147 = vector.multi_reduction <add>, %146, %cst_55 [1] : vector<8x16xf32> to vector<8xf32>
    %148 = vector.shape_cast %147 : vector<8xf32> to vector<8x1xf32>
    %149 = vector.broadcast %148 : vector<8x1xf32> to vector<8x16xf32>
    %150 = arith.divf %146, %149 : vector<8x16xf32>
    %cst_56 = arith.constant dense<0.000000e+00> : vector<8x8xf32>
    %151 = tpu.matmul %150, %138, %cst_56 {dimension_numbers = #tpu.dot_dimension_numbers<[1], [0], [0], [1], [0, 0, 1, 1], [], []>} : vector<8x16xf32>, vector<16x8xf32>, vector<8x8xf32> -> vector<8x8xf32>
    %152 = tpu.concatenate %103, %119, %135, %151 in 1 : vector<8x8xf32>, vector<8x8xf32>, vector<8x8xf32>, vector<8x8xf32> -> vector<8x32xf32>
    %153 = tpu.concatenate %84, %152 in 0 : vector<8x32xf32>, vector<8x32xf32> -> vector<16x32xf32>
    %c0_57 = arith.constant 0 : index
    %c0_58 = arith.constant 0 : index
    %154 = vector.load %arg8[%c0_57, %c0_58] : memref<32x32xf32, #tpu.memory_space<vmem>>, vector<32x32xf32>
    %cst_59 = arith.constant dense<0.000000e+00> : vector<16x32xf32>
    %155 = tpu.matmul %153, %154, %cst_59 {dimension_numbers = #tpu.dot_dimension_numbers<[1], [0], [0], [1], [0, 0, 1, 1], [], []>} : vector<16x32xf32>, vector<32x32xf32>, vector<16x32xf32> -> vector<16x32xf32>
    %c0_60 = arith.constant 0 : index
    %c0_61 = arith.constant 0 : index
    %156 = vector.load %arg9[%c0_60, %c0_61] : memref<1x32xf32, #tpu.memory_space<vmem>>, vector<1x32xf32>
    %157 = vector.broadcast %156 : vector<1x32xf32> to vector<16x32xf32>
    %158 = arith.addf %155, %157 : vector<16x32xf32>
    %159 = arith.addf %0, %158 : vector<16x32xf32>
    %c0_62 = arith.constant 0 : index
    %c0_63 = arith.constant 0 : index
    %160 = vector.load %arg10[%c0_62, %c0_63] : memref<1x32xf32, #tpu.memory_space<vmem>>, vector<1x32xf32>
    %c0_64 = arith.constant 0 : index
    %c0_65 = arith.constant 0 : index
    %161 = vector.load %arg11[%c0_64, %c0_65] : memref<1x32xf32, #tpu.memory_space<vmem>>, vector<1x32xf32>
    %cst_66 = arith.constant dense<0.000000e+00> : vector<16xf32>
    %162 = vector.multi_reduction <add>, %159, %cst_66 [1] : vector<16x32xf32> to vector<16xf32>
    %163 = vector.shape_cast %162 : vector<16xf32> to vector<16x1xf32>
    %cst_67 = arith.constant 3.200000e+01 : f32
    %164 = vector.broadcast %cst_67 : f32 to vector<16x1xf32>
    %165 = arith.divf %163, %164 : vector<16x1xf32>
    %166 = vector.broadcast %165 : vector<16x1xf32> to vector<16x32xf32>
    %167 = arith.subf %159, %166 : vector<16x32xf32>
    %168 = vector.broadcast %165 : vector<16x1xf32> to vector<16x32xf32>
    %169 = arith.subf %159, %168 : vector<16x32xf32>
    %170 = arith.mulf %167, %169 : vector<16x32xf32>
    %cst_68 = arith.constant dense<0.000000e+00> : vector<16xf32>
    %171 = vector.multi_reduction <add>, %170, %cst_68 [1] : vector<16x32xf32> to vector<16xf32>
    %172 = vector.shape_cast %171 : vector<16xf32> to vector<16x1xf32>
    %cst_69 = arith.constant 3.200000e+01 : f32
    %173 = vector.broadcast %cst_69 : f32 to vector<16x1xf32>
    %174 = arith.divf %172, %173 : vector<16x1xf32>
    %175 = vector.broadcast %165 : vector<16x1xf32> to vector<16x32xf32>
    %176 = arith.subf %159, %175 : vector<16x32xf32>
    %cst_70 = arith.constant 9.99999974E-6 : f32
    %177 = vector.broadcast %cst_70 : f32 to vector<16x1xf32>
    %178 = arith.addf %174, %177 : vector<16x1xf32>
    %179 = math.rsqrt %178 : vector<16x1xf32>
    %180 = vector.broadcast %179 : vector<16x1xf32> to vector<16x32xf32>
    %181 = arith.mulf %176, %180 : vector<16x32xf32>
    %182 = vector.broadcast %160 : vector<1x32xf32> to vector<16x32xf32>
    %183 = arith.mulf %181, %182 : vector<16x32xf32>
    %184 = vector.broadcast %161 : vector<1x32xf32> to vector<16x32xf32>
    %185 = arith.addf %183, %184 : vector<16x32xf32>
    %c0_71 = arith.constant 0 : index
    %c0_72 = arith.constant 0 : index
    %186 = vector.load %arg12[%c0_71, %c0_72] : memref<16x32xf32, #tpu.memory_space<vmem>>, vector<16x32xf32>
    tpu.vector_store %arg12[%c0_71, %c0_72], %185 {strides = array<i32>} : memref<16x32xf32, #tpu.memory_space<vmem>>, vector<16x32xf32>,
    return
  }
}

</mosaic_0001>

<bundles_post_ra>
// kernel: transformer_decoder_forward.6
= control target key start
LH: loop header
LB: loop body
LE: loop exit
PB: predicated region body
PF: predicated region fallthrough
CT: control target
= control target key end

     0   :  { %vm56_vm0 = vcmask 261120   ;;  %v2108_v16 = vmov 0.0   ;;  %vm2109_vm1 = vmmov 0   ;;  %vm316_vm2 = vcmask 64512   ;;  %s2110_s27 = smov 120   ;;  %s2115_s25 = smov 24   ;;  %s2440_s4 = inlined_call_operand.vmem [shape: f32[32,32], index: 4, kind: input, shape index: {}]   ;;  %s2441_s2 = inlined_call_operand.vmem [shape: f32[32,32], index: 2, kind: input, shape index: {}]   ;;  %s2442_s1 = inlined_call_operand.vmem [shape: f32[16,32], index: 1, kind: input, shape index: {}, may-alias: {0,1}]   ;;  %s2443_s0 = inlined_call_operand.vmem [shape: f32[16,32], index: 0, kind: input, shape index: {}, may-alias: {0,1}]   ;;  %s2444_s5 = inlined_call_operand.vmem [shape: f32[1,32], index: 5, kind: input, shape index: {}]   ;;  %s2445_s3 = inlined_call_operand.vmem [shape: f32[1,32], index: 3, kind: input, shape index: {}]   ;;  %s2446_s6 = inlined_call_operand.vmem [shape: f32[32,32], index: 6, kind: input, shape index: {}]   ;;  %s2447_s7 = inlined_call_operand.vmem [shape: f32[1,32], index: 7, kind: input, shape index: {}]   ;;  %s2448_s8 = inlined_call_operand.vmem [shape: f32[32,32], index: 8, kind: input, shape index: {}]   ;;  %s2449_s9 = inlined_call_operand.vmem [shape: f32[1,32], index: 9, kind: input, shape index: {}]   ;;  %s2450_s10 = inlined_call_operand.vmem [shape: f32[1,32], index: 10, kind: input, shape index: {}]   ;;  %s2451_s11 = inlined_call_operand.vmem [shape: f32[1,32], index: 11, kind: input, shape index: {}]   ;;  %s2452_s12 = inlined_call_operand.vmem [shape: f32[16,32], index: 12, kind: output, shape index: {}]  }
   0x1   :  { %v138_v0 = vld [vmem:[%s2440_s4] sm:$0xff]  ;;  %v139_v1 = vld [vmem:[%s2440_s4 + $0x8] sm:$0xff]  ;;  %v140_v5 = vld [vmem:[%s2440_s4 + $0x10] sm:$0xff]  ;;  %vm990_vm3 = vcmask 130048   ;;  %vm992_vm4 = vcmask 195584  }
   0x2   :  { %v45_v2 = vld [vmem:[%s2441_s2] sm:$0xff]  ;;  %v2040_v3 = vpack.c.bf16 %v139_v1, %v138_v0  ;;  %v46_v4 = vld [vmem:[%s2441_s2 + $0x8] sm:$0xff]  ;;  %v141_v6 = vld [vmem:[%s2440_s4 + $0x18] sm:$0xff] }
   0x3   :  { %v2032_v7 = vpack.c.bf16 %v46_v4, %v45_v2  ;;  %v2044_v8 = vpack.c.bf16 %v141_v6, %v140_v5  ;;  %v47_v9 = vld [vmem:[%s2441_s2 + $0x10] sm:$0xff]  ;;  %v48_v10 = vld [vmem:[%s2441_s2 + $0x18] sm:$0xff]  ;;  %v43_v11 = vld [vmem:[%s2442_s1] sm:$0xff]  ;;  %s2114_s2 = smov 16  }
   0x4   :  { %2041 = vmatprep.subr.bf16.mxu1 %v2040_v3  ;;  %v2036_v12 = vpack.c.bf16 %v48_v10, %v47_v9  ;;  %1927 = vmatprep.mubr.msk.f32.mxu1 %vm56_vm0, %v43_v11  ;;  %v2212_v13 = vld [vmem:[%s2443_s0] sm:$0xff]  ;;  %v44_v14 = vld [vmem:[%s2442_s1 + $0x8] sm:$0xff]  ;;  %v232_v29 = vld [vmem:[%s2446_s6 + $0x10] sm:$0xff] }
   0x5   :  { %2043 = vmatpush3.bf16.msra.mxu1 %v2040_v3  ;;  %2033 = vmatprep.subr.bf16.mxu0 %v2032_v7  ;;  %v2222_v15 = vld [vmem:[%s2443_s0 + $0x8] sm:$0xff]  ;;  %v1817_v17 = vld [vmem:[%s2444_s5] ss:$0 sm:$0xff]  ;;  %s2112_s5 = smov 104   ;;  %v233_v31 = vld [vmem:[%s2446_s6 + $0x18] sm:$0xff] }
   0x6   :  { %2035 = vmatpush3.bf16.msra.mxu0 %v2032_v7  ;;  %2045 = vmatprep.subr.bf16.mxu1 %v2044_v8  ;;  %v1814_v19 = vld [vmem:[%s2445_s3] ss:$0 sm:$0xff]  ;;  %s2111_s3 = smov 112   ;;  %v231_v28 = vld [vmem:[%s2446_s6 + $0x8] sm:$0xff]  ;;  %v2052_v32 = vpack.c.bf16 %v233_v31, %v232_v29 }
   0x7   :  { %2037 = vmatprep.subr.bf16.mxu0 %v2036_v12  ;;  %1916 = vmatprep.mubr.msk.f32.mxu0 %vm56_vm0, %v2212_v13  ;;  %v230_v27 = vld [vmem:[%s2446_s6] sm:$0xff] }
   0x8   :  { %v2048_v30 = vpack.c.bf16 %v231_v28, %v230_v27  ;;  %v1820_v43 = vld [vmem:[%s2447_s7] ss:$0 sm:$0xff]  ;;  %s2113_s7 = smov 8  }
   0x9   :  { %2047 = vmatpush3.bf16.msra.mxu1 %v2044_v8 }
   0xa   :  { %2039 = vmatpush3.bf16.msra.mxu0 %v2036_v12  ;;  %1941 = vmatprep.subr.mxu1 %v2108_v16 }
   0xb   :  { %2049 = vmatprep.subr.bf16.mxu0 %v2048_v30 }
   0xc   :  { %1928 = vmatmul.mubr.msk.f32.vlgmr.msra.gmra.mrb[0].mxu1 %vm56_vm0, %v44_v14 }
   0xd   :  { %1917 = vmatmul.mubr.msk.f32.vlgmr.msra.gmra.mrb[0].mxu0 %vm56_vm0, %v2222_v15  ;;  %1943 = vmatprep.mubr.msk.f32.mxu1 %vm2109_vm1, %v2108_v16 }
   0xe   :  { %1938 = vmatprep.mubr.msk.f32.mxu0 %vm56_vm0, %v43_v11  ;;  %2051 = vmatpush3.bf16.msra.mxu0 %v2048_v30 }
   0xf   :  { %2053 = vmatprep.subr.bf16.mxu0 %v2052_v32 }
  0x12   :  { %2055 = vmatpush3.bf16.msra.mxu0 %v2052_v32 }
  0x13   :  { %1961 = vmatprep.subr.mxu0 %v2108_v16 }
  0x15   :  { %1939 = vmatmul.mubr.msk.f32.vlgmr.msra.gmra.mrb[2].mxu0 %vm56_vm0, %v44_v14 }
  0x16   :  { %1963 = vmatprep.mubr.msk.f32.mxu0 %vm2109_vm1, %v2108_v16 }
  0xdf   :  { %v1929_v18 = vpop.f32.mrb[0].mxu1 }
  0xe0   :  { %v221_v20 = vpop.f32.mrb[1].mxu1  ;;  %v1918_v21 = vpop.f32.mrb[0].mxu0  ;;  %v227_v25 = vadd.f32 %v1929_v18, %v1817_v17 }
  0xe1   :  { %v222_v22 = vadd.f32 %v1817_v17, %v221_v20  ;;  %v129_v23 = vpop.f32.mrb[1].mxu0  ;;  %v2248_v26 = vadd.f32 %v1918_v21, %v1814_v19 }
  0xe2   :  { %v130_v24 = vadd.f32 %v1814_v19, %v129_v23 }
  0xe3   :  { %480 = vrot.lane.b32.xlu1 %v222_v22, %s2110_s27  ;;  %1942 = vmatpush3.xpose.msk.msra.mxu1 %vm316_vm2, %v222_v22 }
  0xe4   :  { %1946 = vmatprep.subr.mxu1 %v2108_v16 }
  0xe6   :  { %1944 = vmatmul.mubr.msk.f32.vlgmr.msra.gmra.mrb[2].mxu1 %vm316_vm2, %v130_v24 }
  0xe7   :  { %478 = vrot.lane.b32.xlu1 %v130_v24, %s2110_s27  ;;  %1948 = vmatprep.mubr.msk.f32.mxu1 %vm2109_vm1, %v2108_v16 }
  0xe8   :  { %v1940_v42 = vpop.f32.mrb[2].mxu0 }
  0xe9   :  { %v307_v44 = vpop.f32.mrb[3].mxu0  ;;  %v2280_v46 = vadd.f32 %v1940_v42, %v1820_v43 }
  0xea   :  { %v2275_v45 = vadd.f32 %v1820_v43, %v307_v44 }
  0xeb   :  { %645 = vrot.lane.b32.xlu1 %v130_v24, %s2111_s3 }
  0xec   :  { %1947 = vmatpush3.msra.mxu1 %v2275_v45 }
  0xed   :  { %1951 = vmatprep.subr.mxu1 %v2108_v16 }
  0xef   :  { %813 = vrot.lane.b32.xlu1 %v222_v22, %s2112_s5 }
  0xf3   :  { %811 = vrot.lane.b32.xlu1 %v130_v24, %s2112_s5 }
  0xf7   :  { %1157 = vrot.lane.b32.xlu1 %v227_v25, %s2110_s27 }
  0xfb   :  { %1155 = vrot.lane.b32.xlu1 %v2248_v26, %s2110_s27 }
  0xff   :  { %1324 = vrot.lane.b32.xlu1 %v227_v25, %s2111_s3 }
 0x103   :  { %1490 = vrot.lane.b32.xlu1 %v227_v25, %s2112_s5 }
 0x155   :  { %v481_v47 = vpop.permute.xlu1 %480 }
 0x159   :  { %v479_v48 = vpop.permute.xlu1 %478 }
 0x15d   :  { %v646_v49 = vpop.permute.xlu1 %645 }
 0x161   :  { %v814_v50 = vpop.permute.xlu1 %813 }
 0x165   :  { %v812_v51 = vpop.permute.xlu1 %811 }
 0x169   :  { %v1158_v54 = vpop.permute.xlu1 %1157 }
 0x16d   :  { %v1156_v56 = vpop.permute.xlu1 %1155 }
 0x171   :  { %v1325_v58 = vpop.permute.xlu1 %1324 }
 0x175   :  { %v1491_v60 = vpop.permute.xlu1 %1490 }
 0x1b9   :  { %v389_v33 = vpop.f32.mrb[2].mxu1 }
 0x1ba   :  { %v393_v34 = vmul.f32 0.35355338, %v389_v33  ;;  %v1945_v35 = vpop.f32.mrb[3].mxu1 }
 0x1bc   :  { %v394_v36 = vsel %vm316_vm2, %v393_v34, -inf }
 0x1bd   :  { %395 = vmax.xlane.f32.xlu0 %v394_v36 }
 0x24a   :  { %v396_v37 = vpop.xlane.xlu0 %395 }
 0x24b   :  { %v397_v38 = vsub.f32 %v393_v34, %v396_v37 }
 0x24d   :  { %v398_v39 = vmul.f32 1.442695, %v397_v38 }
 0x24f   :  { %2072 = vpow2.f32 %v398_v39 }
 0x259   :  { %v2073_v40 = vpop.eup %2072 }
 0x25a   :  { %v400_v41 = vsel %vm316_vm2, %v2073_v40, 0.0 }
 0x25b   :  { %401 = vadd.xlane.f32.xlu0 %v400_v41 }
 0x271   :  { %647 = vrot.lane.b32.xlu0 %v222_v22, %s2111_s3 }
 0x275   :  { %1322 = vrot.lane.b32.xlu0 %v2248_v26, %s2111_s3 }
 0x279   :  { %1488 = vrot.lane.b32.xlu0 %v2248_v26, %s2112_s5 }
 0x2e8   :  { %v402_v52 = vpop.xlane.xlu0 %401 }
 0x2e9   :  { %2074 = vrcp.f32 %v402_v52 }
 0x2ec   :  { %v648_v53 = vpop.permute.xlu0 %647 }
 0x2ed   :  { %1962 = vmatpush3.xpose.msk.msra.mxu0 %vm316_vm2, %v648_v53 }
 0x2ee   :  { %1971 = vmatprep.subr.mxu0 %v2108_v16 }
 0x2f0   :  { %1964 = vmatmul.mubr.msk.f32.vlgmr.msra.gmra.mrb[4].mxu0 %vm316_vm2, %v646_v49  ;;  %v1323_v59 = vpop.permute.xlu0 %1322 }
 0x2f1   :  { %1972 = vmatpush3.xpose.msk.msra.mxu0 %vm316_vm2, %v814_v50  ;;  %1973 = vmatprep.mubr.msk.f32.mxu0 %vm2109_vm1, %v2108_v16 }
 0x2f2   :  { %1981 = vmatprep.subr.mxu0 %v2108_v16 }
 0x2f3   :  { %v2075_v55 = vpop.eup %2074 }
 0x2f4   :  { %v404_v57 = vmul.f32 %v2075_v55, %v2073_v40  ;;  %1974 = vmatmul.mubr.msk.f32.vlgmr.msra.gmra.mrb[6].mxu0 %vm316_vm2, %v812_v51  ;;  %v1489_v61 = vpop.permute.xlu0 %1488 }
 0x2f5   :  { %1982 = vmatpush3.xpose.msk.msra.mxu0 %vm316_vm2, %v227_v25  ;;  %1983 = vmatprep.mubr.msk.f32.mxu0 %vm2109_vm1, %v2108_v16 }
 0x2f6   :  { %1949 = vmatmul.mubr.msk.f32.vlgmr.msra.gmra.mrb[4].mxu1 %vm316_vm2, %v404_v57  ;;  %1991 = vmatprep.subr.mxu0 %v2108_v16 }
 0x2f7   :  { %1952 = vmatpush3.xpose.msk.msra.mxu1 %vm316_vm2, %v481_v47  ;;  %1953 = vmatprep.mubr.msk.f32.mxu1 %vm2109_vm1, %v2108_v16 }
 0x2f8   :  { %1984 = vmatmul.mubr.msk.f32.vlgmr.msra.gmra.mrb[8].mxu0 %vm316_vm2, %v2248_v26  ;;  %1956 = vmatprep.subr.mxu1 %v2108_v16 }
 0x2f9   :  { %1992 = vmatpush3.xpose.msk.msra.mxu0 %vm316_vm2, %v1158_v54  ;;  %1993 = vmatprep.mubr.msk.f32.mxu0 %vm2109_vm1, %v2108_v16 }
 0x2fa   :  { %1954 = vmatmul.mubr.msk.f32.vlgmr.msra.gmra.mrb[6].mxu1 %vm316_vm2, %v479_v48  ;;  %2001 = vmatprep.subr.mxu0 %v2108_v16 }
 0x2fb   :  { %1958 = vmatprep.mubr.msk.f32.mxu1 %vm2109_vm1, %v2108_v16 }
 0x2fc   :  { %1994 = vmatmul.mubr.msk.f32.vlgmr.msra.gmra.mrb[10].mxu0 %vm316_vm2, %v1156_v56 }
 0x2fd   :  { %2002 = vmatpush3.xpose.msk.msra.mxu0 %vm316_vm2, %v1325_v58  ;;  %2003 = vmatprep.mubr.msk.f32.mxu0 %vm2109_vm1, %v2108_v16 }
 0x2fe   :  { %2011 = vmatprep.subr.mxu0 %v2108_v16 }
 0x300   :  { %2004 = vmatmul.mubr.msk.f32.vlgmr.msra.gmra.mrb[12].mxu0 %vm316_vm2, %v1323_v59 }
 0x301   :  { %2012 = vmatpush3.xpose.msk.msra.mxu0 %vm316_vm2, %v1491_v60  ;;  %2013 = vmatprep.mubr.msk.f32.mxu0 %vm2109_vm1, %v2108_v16 }
 0x304   :  { %2014 = vmatmul.mubr.msk.f32.vlgmr.msra.gmra.mrb[14].mxu0 %vm316_vm2, %v1489_v61 }
 0x3c3   :  { %v719_v62 = vpop.f32.mrb[4].mxu0 }
 0x3c4   :  { %v723_v63 = vmul.f32 0.35355338, %v719_v62  ;;  %v1965_v0 = vpop.f32.mrb[5].mxu0 }
 0x3c6   :  { %v724_v1 = vsel %vm316_vm2, %v723_v63, -inf }
 0x3c7   :  { %725 = vmax.xlane.f32.xlu0 %v724_v1  ;;  %v885_v2 = vpop.f32.mrb[6].mxu0 }
 0x3c8   :  { %v889_v3 = vmul.f32 0.35355338, %v885_v2  ;;  %v1975_v4 = vpop.f32.mrb[7].mxu0 }
 0x3c9   :  { %v2323_v5 = vpop.f32.mrb[4].mxu1 }
 0x3ca   :  { %v1950_v6 = vpop.f32.mrb[5].mxu1  ;;  %v890_v7 = vsel %vm316_vm2, %v889_v3, -inf }
 0x3cb   :  { %891 = vmax.xlane.f32.xlu0 %v890_v7  ;;  %v1066_v8 = vpop.f32.mrb[8].mxu0 }
 0x3cc   :  { %v1985_v9 = vpop.f32.mrb[9].mxu0  ;;  %v1070_v17 = vmul.f32 0.35355338, %v1066_v8 }
 0x3cd   :  { %v552_v10 = vpop.f32.mrb[6].mxu1 }
 0x3ce   :  { %v2326_v11 = vmul.f32 0.35355338, %v552_v10  ;;  %v1955_v12 = vpop.f32.mrb[7].mxu1  ;;  %v1071_v25 = vsel %vm316_vm2, %v1070_v17, -inf }
 0x3cf   :  { %v1229_v14 = vpop.f32.mrb[10].mxu0 }
 0x3d0   :  { %v1233_v18 = vmul.f32 0.35355338, %v1229_v14  ;;  %v1995_v19 = vpop.f32.mrb[11].mxu0  ;;  %v557_v20 = vsel %vm316_vm2, %v2326_v11, -inf }
 0x3d1   :  { %558 = vmax.xlane.f32.xlu1 %v557_v20 }
 0x3d2   :  { %v1234_v21 = vsel %vm316_vm2, %v1233_v18, -inf }
 0x3d3   :  { %1235 = vmax.xlane.f32.xlu0 %v1234_v21  ;;  %v1396_v22 = vpop.f32.mrb[12].mxu0 }
 0x3d4   :  { %v1400_v23 = vmul.f32 0.35355338, %v1396_v22  ;;  %v2005_v24 = vpop.f32.mrb[13].mxu0 }
 0x3d5   :  { %1072 = vmax.xlane.f32.xlu1 %v1071_v25 }
 0x3d6   :  { %v1401_v29 = vsel %vm316_vm2, %v1400_v23, -inf }
 0x3d7   :  { %v1562_v26 = vpop.f32.mrb[14].mxu0 }
 0x3d8   :  { %v1566_v27 = vmul.f32 0.35355338, %v1562_v26  ;;  %v2015_v28 = vpop.f32.mrb[15].mxu0 }
 0x3d9   :  { %1402 = vmax.xlane.f32.xlu1 %v1401_v29 }
 0x3da   :  { %v1567_v30 = vsel %vm316_vm2, %v1566_v27, -inf }
 0x3db   :  { %1568 = vmax.xlane.f32.xlu0 %v1567_v30 }
 0x454   :  { %v726_v31 = vpop.xlane.xlu0 %725 }
 0x455   :  { %v727_v32 = vsub.f32 %v723_v63, %v726_v31 }
 0x457   :  { %v728_v33 = vmul.f32 1.442695, %v727_v32 }
 0x458   :  { %v892_v34 = vpop.xlane.xlu0 %891 }
 0x459   :  { %2076 = vpow2.f32 %v728_v33  ;;  %v893_v35 = vsub.f32 %v889_v3, %v892_v34 }
 0x45b   :  { %v894_v36 = vmul.f32 1.442695, %v893_v35  ;;  %v1669_v35 = vld [vmem:[%s2448_s8] sm:$0xff] }
 0x45d   :  { %2078 = vpow2.f32 %v894_v36  ;;  %v1670_v36 = vld [vmem:[%s2448_s8 + $0x8] sm:$0xff] }
 0x45e   :  { %v559_v37 = vpop.xlane.xlu1 %558 }
 0x45f   :  { %v560_v0 = vsub.f32 %v2326_v11, %v559_v37 }
 0x460   :  { %v1236_v38 = vpop.xlane.xlu0 %1235 }
 0x461   :  { %v1237_v39 = vsub.f32 %v1233_v18, %v1236_v38  ;;  %v561_v1 = vmul.f32 1.442695, %v560_v0  ;;  %v2056_v38 = vpack.c.bf16 %v1670_v36, %v1669_v35 }
 0x462   :  { %v1073_v40 = vpop.xlane.xlu1 %1072 }
 0x463   :  { %v2334_v41 = vpop.eup %2076  ;;  %v1238_v42 = vmul.f32 1.442695, %v1237_v39  ;;  %v1074_v43 = vsub.f32 %v1070_v17, %v1073_v40  ;;  %2057 = vmatprep.subr.bf16.mxu0 %v2056_v38  ;;  %v1671_v39 = vld [vmem:[%s2448_s8 + $0x10] sm:$0xff]  ;;  %v1672_v40 = vld [vmem:[%s2448_s8 + $0x18] sm:$0xff] }
 0x464   :  { %v730_v44 = vsel %vm316_vm2, %v2334_v41, 0.0  ;;  %2059 = vmatpush3.bf16.msra.mxu0 %v2056_v38 }
 0x465   :  { %2080 = vpow2.f32 %v1238_v42  ;;  %v1075_v47 = vmul.f32 1.442695, %v1074_v43  ;;  %731 = vadd.xlane.f32.xlu0 %v730_v44  ;;  %v2060_v42 = vpack.c.bf16 %v1672_v40, %v1671_v39 }
 0x466   :  { %v1403_v48 = vpop.xlane.xlu1 %1402 }
 0x467   :  { %v2338_v49 = vpop.eup %2078  ;;  %2082 = vpow2.f32 %v1075_v47  ;;  %v1404_v50 = vsub.f32 %v1400_v23, %v1403_v48  ;;  %2061 = vmatprep.subr.bf16.mxu0 %v2060_v42 }
 0x468   :  { %v1569_v51 = vpop.xlane.xlu0 %1568  ;;  %v896_v52 = vsel %vm316_vm2, %v2338_v49, 0.0  ;;  %2063 = vmatpush3.bf16.msra.mxu0 %v2060_v42 }
 0x469   :  { %v1405_v53 = vmul.f32 1.442695, %v1404_v50  ;;  %v1570_v54 = vsub.f32 %v1566_v27, %v1569_v51  ;;  %897 = vadd.xlane.f32.xlu1 %v896_v52 }
 0x46b   :  { %2084 = vpow2.f32 %v1405_v53  ;;  %v1571_v55 = vmul.f32 1.442695, %v1570_v54 }
 0x46d   :  { %2086 = vpow2.f32 %v1571_v55 }
 0x46e   :  { %2088 = vpow2.f32 %v561_v1 }
 0x46f   :  { %v2342_v56 = vpop.eup %2080 }
 0x470   :  { %v1240_v57 = vsel %vm316_vm2, %v2342_v56, 0.0 }
 0x471   :  { %v2083_v58 = vpop.eup %2082  ;;  %1241 = vadd.xlane.f32.xlu1 %v1240_v57 }
 0x472   :  { %v1077_v59 = vsel %vm316_vm2, %v2083_v58, 0.0 }
 0x473   :  { %1078 = vadd.xlane.f32.xlu0 %v1077_v59 }
 0x475   :  { %v2347_v60 = vpop.eup %2084 }
 0x476   :  { %v1407_v61 = vsel %vm316_vm2, %v2347_v60, 0.0 }
 0x477   :  { %v2351_v62 = vpop.eup %2086  ;;  %1408 = vadd.xlane.f32.xlu0 %v1407_v61 }
 0x478   :  { %v1573_v63 = vsel %vm316_vm2, %v2351_v62, 0.0  ;;  %v2089_v2 = vpop.eup %2088 }
 0x479   :  { %1574 = vadd.xlane.f32.xlu1 %v1573_v63  ;;  %v563_v3 = vsel %vm316_vm2, %v2089_v2, 0.0 }
 0x48a   :  { %735 = vrot.lane.b32.xlu1 %v2275_v45, %s2111_s3 }
 0x48d   :  { %569 = vrot.lane.b32.xlu0 %v2275_v45, %s2110_s27 }
 0x491   :  { %1246 = vrot.lane.b32.xlu0 %v2280_v46, %s2110_s27 }
 0x495   :  { %1578 = vrot.lane.b32.xlu0 %v2280_v46, %s2112_s5 }
 0x4ae   :  { %564 = vadd.xlane.f32.xlu1 %v563_v3 }
 0x4bf   :  { %901 = vrot.lane.b32.xlu1 %v2275_v45, %s2112_s5 }
 0x4c3   :  { %1412 = vrot.lane.b32.xlu1 %v2280_v46, %s2111_s3 }
 0x4f2   :  { %v732_v4 = vpop.xlane.xlu0 %731 }
 0x4f6   :  { %v898_v9 = vpop.xlane.xlu1 %897 }
 0x4fe   :  { %v1242_v10 = vpop.xlane.xlu1 %1241 }
 0x500   :  { %v1079_v6 = vpop.xlane.xlu0 %1078 }
 0x504   :  { %v1409_v7 = vpop.xlane.xlu0 %1408 }
 0x506   :  { %v1575_v11 = vpop.xlane.xlu1 %1574 }
 0x508   :  { %v570_v8 = vpop.permute.xlu0 %569 }
 0x509   :  { %1957 = vmatpush3.msra.mxu1 %v570_v8 }
 0x50a   :  { %1966 = vmatprep.subr.mxu1 %v2108_v16  ;;  %v736_v12 = vpop.permute.xlu1 %735 }
 0x50c   :  { %v1247_v26 = vpop.permute.xlu0 %1246 }
 0x510   :  { %v1579_v31 = vpop.permute.xlu0 %1578 }
 0x53b   :  { %v565_v14 = vpop.xlane.xlu1 %564 }
 0x53c   :  { %2090 = vrcp.f32 %v565_v14 }
 0x53d   :  { %2092 = vrcp.f32 %v732_v4 }
 0x53e   :  { %2094 = vrcp.f32 %v898_v9 }
 0x53f   :  { %2096 = vrcp.f32 %v1079_v6  ;;  %v902_v21 = vpop.permute.xlu1 %901 }
 0x540   :  { %2098 = vrcp.f32 %v1242_v10 }
 0x541   :  { %2100 = vrcp.f32 %v1409_v7 }
 0x542   :  { %2102 = vrcp.f32 %v1575_v11 }
 0x546   :  { %v2091_v17 = vpop.eup %2090 }
 0x547   :  { %v567_v45 = vmul.f32 %v2091_v17, %v2089_v2  ;;  %v2093_v18 = vpop.eup %2092  ;;  %v1847_v2 = vld [vmem:[%s2449_s9] ss:$0 sm:$0xff] }
 0x548   :  { %v734_v19 = vmul.f32 %v2093_v18, %v2334_v41  ;;  %v2095_v20 = vpop.eup %2094 }
 0x549   :  { %1959 = vmatmul.mubr.msk.f32.vlgmr.msra.gmra.mrb[8].mxu1 %vm316_vm2, %v567_v45  ;;  %v900_v22 = vmul.f32 %v2095_v20, %v2338_v49  ;;  %v2097_v23 = vpop.eup %2096 }
 0x54a   :  { %1967 = vmatpush3.msra.mxu1 %v736_v12  ;;  %1968 = vmatprep.mubr.msk.f32.mxu1 %vm2109_vm1, %v2108_v16  ;;  %v1081_v24 = vmul.f32 %v2097_v23, %v2083_v58  ;;  %v2099_v25 = vpop.eup %2098 }
 0x54b   :  { %1976 = vmatprep.subr.mxu1 %v2108_v16  ;;  %v1244_v27 = vmul.f32 %v2099_v25, %v2342_v56  ;;  %v2101_v28 = vpop.eup %2100 }
 0x54c   :  { %v1411_v29 = vmul.f32 %v2101_v28, %v2347_v60  ;;  %v2103_v30 = vpop.eup %2102  ;;  %v1850_v28 = vld [vmem:[%s2450_s10] ss:$0 sm:$0xff] }
 0x54d   :  { %1969 = vmatmul.mubr.msk.f32.vlgmr.msra.gmra.mrb[10].mxu1 %vm316_vm2, %v734_v19  ;;  %v1577_v32 = vmul.f32 %v2103_v30, %v2351_v62  ;;  %v1851_v30 = vld [vmem:[%s2451_s11] ss:$0 sm:$0xff] }
 0x54e   :  { %1977 = vmatpush3.msra.mxu1 %v902_v21  ;;  %1978 = vmatprep.mubr.msk.f32.mxu1 %vm2109_vm1, %v2108_v16 }
 0x54f   :  { %1986 = vmatprep.subr.mxu1 %v2108_v16 }
 0x551   :  { %1979 = vmatmul.mubr.msk.f32.vlgmr.msra.gmra.mrb[12].mxu1 %vm316_vm2, %v900_v22 }
 0x552   :  { %1987 = vmatpush3.msra.mxu1 %v2280_v46  ;;  %1988 = vmatprep.mubr.msk.f32.mxu1 %vm2109_vm1, %v2108_v16  ;;  %v1413_v46 = vpop.permute.xlu1 %1412 }
 0x553   :  { %1996 = vmatprep.subr.mxu1 %v2108_v16 }
 0x555   :  { %1989 = vmatmul.mubr.msk.f32.vlgmr.msra.gmra.mrb[14].mxu1 %vm316_vm2, %v1081_v24 }
 0x556   :  { %1997 = vmatpush3.msra.mxu1 %v1247_v26  ;;  %1998 = vmatprep.mubr.msk.f32.mxu1 %vm2109_vm1, %v2108_v16 }
 0x557   :  { %2006 = vmatprep.subr.mxu1 %v2108_v16 }
 0x559   :  { %1999 = vmatmul.mubr.msk.f32.vlgmr.msra.gmra.mrb[16].mxu1 %vm316_vm2, %v1244_v27 }
 0x55a   :  { %2007 = vmatpush3.msra.mxu1 %v1413_v46  ;;  %2008 = vmatprep.mubr.msk.f32.mxu1 %vm2109_vm1, %v2108_v16 }
 0x55b   :  { %2016 = vmatprep.subr.mxu1 %v2108_v16 }
 0x55d   :  { %2009 = vmatmul.mubr.msk.f32.vlgmr.msra.gmra.mrb[18].mxu1 %vm316_vm2, %v1411_v29 }
 0x55e   :  { %2017 = vmatpush3.msra.mxu1 %v1579_v31  ;;  %2018 = vmatprep.mubr.msk.f32.mxu1 %vm2109_vm1, %v2108_v16 }
 0x561   :  { %2019 = vmatmul.mubr.msk.f32.vlgmr.msra.gmra.mrb[20].mxu1 %vm316_vm2, %v1577_v32 }
 0x61c   :  { %v641_v33 = vpop.f32.mrb[8].mxu1 }
 0x61d   :  { %978 = vrot.lane.b32.xlu1 %v641_v33, %s2113_s7  ;;  %v1960_v34 = vpop.f32.mrb[9].mxu1 }
 0x620   :  { %v807_v37 = vpop.f32.mrb[10].mxu1 }
 0x621   :  { %982 = vrot.lane.b32.xlu0 %v807_v37, %s2114_s2  ;;  %v1970_v16 = vpop.f32.mrb[11].mxu1 }
 0x624   :  { %v973_v41 = vpop.f32.mrb[12].mxu1 }
 0x625   :  { %986 = vrot.lane.b32.xlu0 %v973_v41, %s2115_s25  ;;  %v1980_v43 = vpop.f32.mrb[13].mxu1 }
 0x628   :  { %v1151_v44 = vpop.f32.mrb[14].mxu1 }
 0x629   :  { %v1990_v47 = vpop.f32.mrb[15].mxu1 }
 0x62c   :  { %v1318_v48 = vpop.f32.mrb[16].mxu1 }
 0x62d   :  { %1655 = vrot.lane.b32.xlu1 %v1318_v48, %s2113_s7  ;;  %v2000_v49 = vpop.f32.mrb[17].mxu1 }
 0x630   :  { %v1484_v50 = vpop.f32.mrb[18].mxu1 }
 0x631   :  { %1659 = vrot.lane.b32.xlu1 %v1484_v50, %s2114_s2  ;;  %v2010_v51 = vpop.f32.mrb[19].mxu1 }
 0x634   :  { %v1650_v52 = vpop.f32.mrb[20].mxu1 }
 0x635   :  { %1663 = vrot.lane.b32.xlu0 %v1650_v52, %s2115_s25  ;;  %v2020_v53 = vpop.f32.mrb[21].mxu1 }
 0x68f   :  { %v979_v54 = vpop.permute.xlu1 %978 }
 0x690   :  { %v989_v56 = vsel %vm316_vm2, %v2323_v5, %v979_v54 }
 0x693   :  { %v983_v55 = vpop.permute.xlu0 %982 }
 0x694   :  { %v991_v57 = vsel %vm990_vm3, %v989_v56, %v983_v55 }
 0x697   :  { %v987_v58 = vpop.permute.xlu0 %986 }
 0x698   :  { %v993_v59 = vsel %vm992_vm4, %v991_v57, %v987_v58 }
 0x699   :  { %2029 = vmatprep.mubr.msk.f32.mxu0 %vm56_vm0, %v993_v59 }
 0x69f   :  { %v1656_v60 = vpop.permute.xlu1 %1655 }
 0x6a0   :  { %v1666_v62 = vsel %vm316_vm2, %v1151_v44, %v1656_v60 }
 0x6a3   :  { %v1660_v61 = vpop.permute.xlu1 %1659 }
 0x6a4   :  { %v1667_v63 = vsel %vm990_vm3, %v1666_v62, %v1660_v61 }
 0x6a7   :  { %v1664_v0 = vpop.permute.xlu0 %1663 }
 0x6a8   :  { %v1668_v1 = vsel %vm992_vm4, %v1667_v63, %v1664_v0 }
 0x6a9   :  { %2030 = vmatmul.mubr.msk.f32.vlgmr.msra.gmra.mrb[16].mxu0 %vm56_vm0, %v1668_v1 }
 0x77c   :  { %v2031_v3 = vpop.f32.mrb[16].mxu0 }
 0x77d   :  { %v1758_v5 = vadd.f32 %v2031_v3, %v1847_v2  ;;  %v1752_v4 = vpop.f32.mrb[17].mxu0 }
 0x77e   :  { %v1753_v6 = vadd.f32 %v1847_v2, %v1752_v4 }
 0x77f   :  { %v1762_v7 = vadd.f32 %v1758_v5, %v2222_v15 }
 0x780   :  { %v1761_v8 = vadd.f32 %v1753_v6, %v2212_v13 }
 0x781   :  { %v1768_v9 = vsel %vm56_vm0, %v1762_v7, 0.0 }
 0x782   :  { %1769 = vadd.xlane.f32.xlu0 %v1768_v9  ;;  %v1765_v10 = vsel %vm56_vm0, %v1761_v8, 0.0 }
 0x783   :  { %1766 = vadd.xlane.f32.xlu1 %v1765_v10 }
 0x80f   :  { %v1770_v11 = vpop.xlane.xlu0 %1769 }
 0x810   :  { %v1773_v12 = vmul.f32 0.03125, %v1770_v11  ;;  %v1767_v14 = vpop.xlane.xlu1 %1766 }
 0x811   :  { %v1772_v17 = vmul.f32 0.03125, %v1767_v14 }
 0x812   :  { %v1775_v45 = vsub.f32 %v1762_v7, %v1773_v12 }
 0x813   :  { %v1774_v18 = vsub.f32 %v1761_v8, %v1772_v17 }
 0x814   :  { %v1777_v19 = vmul.f32 %v1775_v45, %v1775_v45 }
 0x815   :  { %v1776_v20 = vmul.f32 %v1774_v18, %v1774_v18 }
 0x816   :  { %v1781_v21 = vsel %vm56_vm0, %v1777_v19, 0.0 }
 0x817   :  { %1782 = vadd.xlane.f32.xlu1 %v1781_v21  ;;  %v1778_v15 = vsel %vm56_vm0, %v1776_v20, 0.0 }
 0x818   :  { %1779 = vadd.xlane.f32.xlu0 %v1778_v15 }
 0x8a4   :  { %v1783_v13 = vpop.xlane.xlu1 %1782 }
 0x8a5   :  { %v1785_v22 = vmul.f32 0.03125, %v1783_v13  ;;  %v1780_v23 = vpop.xlane.xlu0 %1779 }
 0x8a6   :  { %v1784_v24 = vmul.f32 0.03125, %v1780_v23 }
 0x8a7   :  { %v1787_v25 = vadd.f32 1e-05, %v1785_v22 }
 0x8a8   :  { %v1786_v26 = vadd.f32 1e-05, %v1784_v24 }
 0x8a9   :  { %2104 = vrsqrt.f32 %v1787_v25 }
 0x8aa   :  { %2106 = vrsqrt.f32 %v1786_v26 }
 0x8b3   :  { %v2105_v27 = vpop.eup %2104 }
 0x8b4   :  { %v2107_v46 = vpop.eup %2106  ;;  %v1791_v29 = vmul.f32 %v2105_v27, %v1775_v45 }
 0x8b5   :  { %v1790_v31 = vmul.f32 %v2107_v46, %v1774_v18 }
 0x8b6   :  { %v1799_v32 = vmul.f32 %v1850_v28, %v1791_v29 }
 0x8b7   :  { %v1798_v33 = vmul.f32 %v1850_v28, %v1790_v31 }
 0x8b8   :  { %v1807_v34 = vadd.f32 %v1851_v30, %v1799_v32 }
 0x8b9   :  { %v1806_v35 = vadd.f32 %v1851_v30, %v1798_v33 }
 0x8ba   :  { %1809 = vst.msk [vmem:[%s2452_s12 + $0x8] sm:$0xff] %vm56_vm0, %v1807_v34 }
 0x8bb   :  { %1808 = vst.msk [vmem:[%s2452_s12] sm:$0xff] %vm56_vm0, %v1806_v35 }

// kernel: transformer_decoder_forward.7
= control target key start
LH: loop header
LB: loop body
LE: loop exit
PB: predicated region body
PF: predicated region fallthrough
CT: control target
= control target key end

     0   :  { %17 = vsyncpa [#allocation3], 0  ;;  %s3126_s0 = inlined_call_operand.vmem [shape: f32[16,32], index: 0, kind: input, shape index: {}]   ;;  %s3127_s1 = inlined_call_operand.vmem [shape: f32[32,32], index: 1, kind: input, shape index: {}]   ;;  %s3128_s2 = inlined_call_operand.hbm [shape: f32[32,32], index: 2, kind: input, shape index: {}]   ;;  %s3129_s3 = inlined_call_operand.hbm [shape: f32[1,32], index: 3, kind: input, shape index: {}]   ;;  %s3130_s4 = inlined_call_operand.hbm [shape: f32[32,32], index: 4, kind: input, shape index: {}]   ;;  %s3131_s5 = inlined_call_operand.hbm [shape: f32[1,32], index: 5, kind: input, shape index: {}]   ;;  %s3132_s6 = inlined_call_operand.hbm [shape: f32[32,32], index: 6, kind: input, shape index: {}]   ;;  %s3133_s7 = inlined_call_operand.hbm [shape: f32[1,32], index: 7, kind: input, shape index: {}]   ;;  %s3134_s8 = inlined_call_operand.hbm [shape: f32[32,32], index: 8, kind: input, shape index: {}]   ;;  %s3135_s9 = inlined_call_operand.hbm [shape: f32[1,32], index: 9, kind: input, shape index: {}]   ;;  %s3136_s10 = inlined_call_operand.vmem [shape: f32[1,32], index: 10, kind: input, shape index: {}]   ;;  %s3137_s11 = inlined_call_operand.vmem [shape: f32[1,32], index: 11, kind: input, shape index: {}]   ;;  %s3138_s12 = inlined_call_operand.vmem [shape: f32[16,32], index: 12, kind: output, shape index: {}]  }
   0x1   :  { %18 = vsyncpa [#allocation5], 0 }
   0x2   :  { %19 = vsyncpa [#allocation8], 0 }
   0x3   :  { %20 = vsyncpa [#allocation11], 0 }
   0x4   :  { %21 = vsyncpa [#allocation14], 0  ;;  %s2674_s21 = smov [#allocation4]   ;;  %s2675_s23 = smov [#allocation7]  }
   0x5   :  { %s44_s22 = sshll.u32 %s2674_s21, 4  ;;  %s66_s24 = sshll.u32 %s2675_s23, 4  ;;  %s45_s22 = int_to_ptr.vmem [resolvable:$true] %s44_s22  ;;  %s67_s24 = int_to_ptr.vmem [resolvable:$true] %s66_s24 }
   0x6   :  { %s2488_s27 = scalar_lea.hbm %s3129_s3, 16 }
   0x7   :  { %p2489_p0 = scmp.ne.s32.totalorder %s3129_s3, %s2488_s27  ;;  %p2492_p1 = scmp.lt.u32.totalorder %s2488_s27, %s3129_s3 }
   0x9   :  { %p2494_p2 = pnand %p2492_p1, %p2489_p0 }
   0xb   :  { %2497 = shalt.err (!%p2494_p2)
}
   0xc   :  { %s2498_s14 = scalar_lea.vmem %s45_s22, 16  ;;  %s2502_s15 = scalar_lea.vmem %s45_s22, 32 }
   0xd   :  { %p2499_p3 = scmp.ne.s32.totalorder %s45_s22, %s2498_s14  ;;  %p2503_p4 = scmp.lt.s32.totalorder %s45_s22, %s45_s22 }
   0xe   :  { %p2504_p5 = scmp.lt.s32.totalorder %s2502_s15, %s2498_s14 }
  0x10   :  { %p2505_p6 = por %p2504_p5, %p2503_p4 }
  0x12   :  { %p2506_p7 = pnand %p2505_p6, %p2499_p3 }
  0x14   :  { %2509 = shalt.err (!%p2506_p7)
}
  0x15   :  { %47 = dma.hbm_to_vmem [thread:$0]  %s3129_s3, 16, %s45_s22, [#allocation5]  }
  0x16   :  { %s2510_s20 = scalar_lea.hbm %s3131_s5, 16 }
  0x17   :  { %p2511_p8 = scmp.ne.s32.totalorder %s3131_s5, %s2510_s20  ;;  %p2514_p9 = scmp.lt.u32.totalorder %s2510_s20, %s3131_s5 }
  0x19   :  { %p2516_p10 = pnand %p2514_p9, %p2511_p8 }
  0x1b   :  { %2519 = shalt.err (!%p2516_p10)
}
  0x1c   :  { %s2520_s27 = scalar_lea.vmem %s67_s24, 16  ;;  %s2524_s28 = scalar_lea.vmem %s67_s24, 32 }
  0x1d   :  { %p2521_p11 = scmp.ne.s32.totalorder %s67_s24, %s2520_s27  ;;  %p2525_p12 = scmp.lt.s32.totalorder %s67_s24, %s67_s24 }
  0x1e   :  { %p2526_p13 = scmp.lt.s32.totalorder %s2524_s28, %s2520_s27 }
  0x20   :  { %p2527_p0 = por %p2526_p13, %p2525_p12 }
  0x22   :  { %p2528_p1 = pnand %p2527_p0, %p2521_p11 }
  0x24   :  { %2531 = shalt.err (!%p2528_p1)
}
  0x25   :  { %69 = dma.hbm_to_vmem [thread:$0]  %s3131_s5, 16, %s67_s24, [#allocation8]  }
  0x26   :  { %s2676_s29 = smov [#allocation10]   ;;  %s2677_s13 = smov [#allocation2]  }
  0x27   :  { %s88_s30 = sshll.u32 %s2676_s29, 4  ;;  %s31_s14 = sshll.u32 %s2677_s13, 4  ;;  %s89_s30 = int_to_ptr.vmem [resolvable:$true] %s88_s30  ;;  %s2781_s14 = int_to_ptr.vmem [resolvable:$true] %s31_s14 }
  0x28   :  { %s2532_s17 = scalar_lea.hbm %s3133_s7, 16 }
  0x29   :  { %p2533_p2 = scmp.ne.s32.totalorder %s3133_s7, %s2532_s17  ;;  %p2536_p3 = scmp.lt.u32.totalorder %s2532_s17, %s3133_s7 }
  0x2b   :  { %p2538_p4 = pnand %p2536_p3, %p2533_p2 }
  0x2d   :  { %2541 = shalt.err (!%p2538_p4)
}
  0x2e   :  { %s2542_s5 = scalar_lea.vmem %s89_s30, 16  ;;  %s2546_s24 = scalar_lea.vmem %s89_s30, 32 }
  0x2f   :  { %p2543_p5 = scmp.ne.s32.totalorder %s89_s30, %s2542_s5  ;;  %p2547_p6 = scmp.lt.s32.totalorder %s89_s30, %s89_s30 }
  0x30   :  { %p2548_p7 = scmp.lt.s32.totalorder %s2546_s24, %s2542_s5 }
  0x32   :  { %p2549_p8 = por %p2548_p7, %p2547_p6 }
  0x34   :  { %p2550_p9 = pnand %p2549_p8, %p2543_p5 }
  0x36   :  { %2553 = shalt.err (!%p2550_p9)
}
  0x37   :  { %91 = dma.hbm_to_vmem [thread:$0]  %s3133_s7, 16, %s89_s30, [#allocation11]  }
  0x38   :  { %s2554_s28 = scalar_lea.hbm %s3128_s2, 512 }
  0x39   :  { %p2555_p10 = scmp.ne.s32.totalorder %s3128_s2, %s2554_s28  ;;  %p2558_p11 = scmp.lt.u32.totalorder %s2554_s28, %s3128_s2 }
  0x3b   :  { %p2560_p12 = pnand %p2558_p11, %p2555_p10 }
  0x3d   :  { %2563 = shalt.err (!%p2560_p12)
}
  0x3e   :  { %s2564_s15 = scalar_lea.vmem %s2781_s14, 512  ;;  %p2569_p0 = scmp.lt.s32.totalorder %s2781_s14, %s2781_s14 }
  0x3f   :  { %p2565_p13 = scmp.ne.s32.totalorder %s2781_s14, %s2564_s15  ;;  %p2570_p1 = scmp.lt.s32.totalorder %s2564_s15, %s2564_s15 }
  0x41   :  { %p2571_p2 = por %p2570_p1, %p2569_p0 }
  0x43   :  { %p2572_p3 = pnand %p2571_p2, %p2565_p13 }
  0x45   :  { %2575 = shalt.err (!%p2572_p3)
}
  0x46   :  { %s2678_s7 = smov 128   ;;  %s2679_s30 = smov 8  }
  0x47   :  { %37 = dma.hbm_to_vmem [thread:$0]  %s3128_s2, 512, %s2781_s14, [#allocation3], %s2678_s7, %s2678_s7, %s2679_s30  }
  0x48   :  { %s2680_s18 = smov [#allocation6]   ;;  %s2681_s20 = smov [#allocation9]  }
  0x49   :  { %s53_s19 = sshll.u32 %s2680_s18, 4  ;;  %s75_s21 = sshll.u32 %s2681_s20, 4  ;;  %s54_s19 = int_to_ptr.vmem [resolvable:$true] %s53_s19  ;;  %s2815_s21 = int_to_ptr.vmem [resolvable:$true] %s75_s21 }
  0x4a   :  { %s2576_s23 = scalar_lea.hbm %s3130_s4, 512 }
  0x4b   :  { %p2577_p4 = scmp.ne.s32.totalorder %s3130_s4, %s2576_s23  ;;  %p2580_p5 = scmp.lt.u32.totalorder %s2576_s23, %s3130_s4 }
  0x4d   :  { %p2582_p6 = pnand %p2580_p5, %p2577_p4 }
  0x4f   :  { %2585 = shalt.err (!%p2582_p6)
}
  0x50   :  { %s2586_s2 = scalar_lea.vmem %s54_s19, 512  ;;  %p2591_p8 = scmp.lt.s32.totalorder %s54_s19, %s54_s19 }
  0x51   :  { %p2587_p7 = scmp.ne.s32.totalorder %s54_s19, %s2586_s2  ;;  %p2592_p9 = scmp.lt.s32.totalorder %s2586_s2, %s2586_s2 }
  0x53   :  { %p2593_p10 = por %p2592_p9, %p2591_p8 }
  0x55   :  { %p2594_p11 = pnand %p2593_p10, %p2587_p7 }
  0x57   :  { %2597 = shalt.err (!%p2594_p11)
}
  0x58   :  { %59 = dma.hbm_to_vmem [thread:$0]  %s3130_s4, 512, %s54_s19, [#allocation5], %s2678_s7, %s2678_s7, %s2679_s30  }
  0x59   :  { %s2598_s13 = scalar_lea.hbm %s3132_s6, 512 }
  0x5a   :  { %p2599_p12 = scmp.ne.s32.totalorder %s3132_s6, %s2598_s13  ;;  %p2602_p13 = scmp.lt.u32.totalorder %s2598_s13, %s3132_s6 }
  0x5c   :  { %p2604_p0 = pnand %p2602_p13, %p2599_p12 }
  0x5e   :  { %2607 = shalt.err (!%p2604_p0)
}
  0x5f   :  { %s2608_s20 = scalar_lea.vmem %s2815_s21, 512  ;;  %p2613_p2 = scmp.lt.s32.totalorder %s2815_s21, %s2815_s21 }
  0x60   :  { %p2609_p1 = scmp.ne.s32.totalorder %s2815_s21, %s2608_s20  ;;  %p2614_p3 = scmp.lt.s32.totalorder %s2608_s20, %s2608_s20 }
  0x62   :  { %p2615_p4 = por %p2614_p3, %p2613_p2 }
  0x64   :  { %p2616_p5 = pnand %p2615_p4, %p2609_p1 }
  0x66   :  { %2619 = shalt.err (!%p2616_p5)
}
  0x67   :  { %81 = dma.hbm_to_vmem [thread:$0]  %s3132_s6, 512, %s2815_s21, [#allocation8], %s2678_s7, %s2678_s7, %s2679_s30  }
  0x68   :  { %s2682_s5 = smov [#allocation12]   ;;  %s2683_s23 = smov [#allocation13]  }
  0x69   :  { %s97_s24 = sshll.u32 %s2682_s5, 4  ;;  %s110_s25 = sshll.u32 %s2683_s23, 4  ;;  %s98_s24 = int_to_ptr.vmem [resolvable:$true] %s97_s24  ;;  %s111_s25 = int_to_ptr.vmem [resolvable:$true] %s110_s25 }
  0x6a   :  { %s2620_s28 = scalar_lea.hbm %s3134_s8, 512 }
  0x6b   :  { %p2621_p6 = scmp.ne.s32.totalorder %s3134_s8, %s2620_s28  ;;  %p2624_p7 = scmp.lt.u32.totalorder %s2620_s28, %s3134_s8 }
  0x6d   :  { %p2626_p8 = pnand %p2624_p7, %p2621_p6 }
  0x6f   :  { %2629 = shalt.err (!%p2626_p8)
}
  0x70   :  { %s2630_s6 = scalar_lea.vmem %s98_s24, 512  ;;  %p2635_p10 = scmp.lt.s32.totalorder %s98_s24, %s98_s24 }
  0x71   :  { %p2631_p9 = scmp.ne.s32.totalorder %s98_s24, %s2630_s6  ;;  %p2636_p11 = scmp.lt.s32.totalorder %s2630_s6, %s2630_s6 }
  0x73   :  { %p2637_p12 = por %p2636_p11, %p2635_p10 }
  0x75   :  { %p2638_p13 = pnand %p2637_p12, %p2631_p9 }
  0x77   :  { %2641 = shalt.err (!%p2638_p13)
}
  0x78   :  { %103 = dma.hbm_to_vmem [thread:$0]  %s3134_s8, 512, %s98_s24, [#allocation11], %s2678_s7, %s2678_s7, %s2679_s30  }
  0x79   :  { %s2642_s16 = scalar_lea.hbm %s3135_s9, 16 }
  0x7a   :  { %p2643_p0 = scmp.ne.s32.totalorder %s3135_s9, %s2642_s16  ;;  %p2646_p1 = scmp.lt.u32.totalorder %s2642_s16, %s3135_s9 }
  0x7c   :  { %p2648_p2 = pnand %p2646_p1, %p2643_p0 }
  0x7e   :  { %2651 = shalt.err (!%p2648_p2)
}
  0x7f   :  { %s2652_s19 = scalar_lea.vmem %s111_s25, 16  ;;  %s2656_s5 = scalar_lea.vmem %s111_s25, 32 }
  0x80   :  { %p2653_p3 = scmp.ne.s32.totalorder %s111_s25, %s2652_s19  ;;  %p2657_p4 = scmp.lt.s32.totalorder %s111_s25, %s111_s25 }
  0x81   :  { %p2658_p5 = scmp.lt.s32.totalorder %s2656_s5, %s2652_s19 }
  0x83   :  { %p2659_p6 = por %p2658_p5, %p2657_p4 }
  0x85   :  { %p2660_p7 = pnand %p2659_p6, %p2653_p3 }
  0x87   :  { %2663 = shalt.err (!%p2660_p7)
}
  0x88   :  { %113 = dma.hbm_to_vmem [thread:$0]  %s3135_s9, 16, %s111_s25, [#allocation14]  }
  0x89   :  { %2664 = dma.done.wait [#allocation3], 512  }
  0x8a   :  { %2665 = vsyncadd [#allocation3], 4294966784 }
  0x8b   :  { %2666 = dma.done.wait [#allocation5], 528  }
  0x8c   :  { %2667 = vsyncadd [#allocation5], 4294966768 }
  0x8d   :  { %2668 = dma.done.wait [#allocation8], 528  }
  0x8e   :  { %2669 = vsyncadd [#allocation8], 4294966768 }
  0x8f   :  { %2670 = dma.done.wait [#allocation11], 528  }
  0x90   :  { %2671 = vsyncadd [#allocation11], 4294966768 }
  0x91   :  { %2672 = dma.done.wait [#allocation14], 16  }
  0x92   :  { %2673 = vsyncadd [#allocation14], 4294967280  ;;  %vm159_vm0 = vcmask 261120   ;;  %v241_v0 = vld [vmem:[#allocation6] sm:$0xff]  ;;  %v242_v1 = vld [vmem:[#allocation6 + $0x8] sm:$0xff]  ;;  %v2684_v18 = vmov 0.0|0.0  }
  0x93   :  { %v243_v2 = vld [vmem:[#allocation6 + $0x10] sm:$0xff]  ;;  %v2294_v3 = vpack.c.bf16 %v242_v1, %v241_v0  ;;  %v244_v4 = vld [vmem:[#allocation6 + $0x18] sm:$0xff]  ;;  %v149_v8 = vld [vmem:[#allocation2 + $0x8] sm:$0xff]  ;;  %vm2685_vm1 = vmmov 0   ;;  %v2686_v19 = vmov 0.0   ;;  %vm445_vm2 = vcmask 64512  }
  0x94   :  { %v144_v5 = vld [vmem:[%s3127_s1] sm:$0xff]  ;;  %v2298_v6 = vpack.c.bf16 %v244_v4, %v243_v2  ;;  %v150_v9 = vld [vmem:[#allocation2 + $0x10] sm:$0xff]  ;;  %v151_v11 = vld [vmem:[#allocation2 + $0x18] sm:$0xff]  ;;  %vm526_vm4 = vcmask 130048   ;;  %s2689_s21 = smov 104   ;;  %s2690_s29 = smov 16  }
  0x95   :  { %2143 = vmatprep.mubr.msk.f32.mxu1 %vm159_vm0, %v144_v5  ;;  %v148_v7 = vld [vmem:[#allocation2] sm:$0xff]  ;;  %2295 = vmatprep.subr.bf16.mxu1 %v2294_v3  ;;  %v2290_v13 = vpack.c.bf16 %v151_v11, %v150_v9  ;;  %v145_v14 = vld [vmem:[%s3127_s1 + $0x8] sm:$0xff]  ;;  %v146_v15 = vld [vmem:[%s3127_s1 + $0x10] sm:$0xff]  ;;  %s2691_s13 = smov 24   ;;  %vm1146_vm5 = vcmask 195584  }
  0x96   :  { %v2286_v10 = vpack.c.bf16 %v149_v8, %v148_v7  ;;  %v2886_v12 = vld [vmem:[%s3126_s0] sm:$0xff]  ;;  %2297 = vmatpush3.bf16.msra.mxu1 %v2294_v3  ;;  %v2899_v16 = vld [vmem:[%s3126_s0 + $0x8] sm:$0xff]  ;;  %v147_v17 = vld [vmem:[%s3127_s1 + $0x18] sm:$0xff]  ;;  %s2687_s0 = smov 112   ;;  %s2688_s1 = smov 120  }
  0x97   :  { %2132 = vmatprep.mubr.msk.f32.mxu0 %vm159_vm0, %v2886_v12  ;;  %2299 = vmatprep.subr.bf16.mxu1 %v2298_v6  ;;  %v349_v20 = vld [vmem:[#allocation9] sm:$0xff]  ;;  %v350_v21 = vld [vmem:[#allocation9 + $0x8] sm:$0xff]  ;;  %v351_v22 = vld [vmem:[#allocation9 + $0x10] sm:$0xff] }
  0x98   :  { %2287 = vmatprep.subr.bf16.mxu0 %v2286_v10  ;;  %v2302_v23 = vpack.c.bf16 %v350_v21, %v349_v20  ;;  %v352_v24 = vld [vmem:[#allocation9 + $0x18] sm:$0xff]  ;;  %vm2925_vm3 = vmpackc.low %vm445_vm2, %vm445_vm2  ;;  %v2006_v43 = vld [vmem:[#allocation10] ss:$0 sm:$0xff] }
  0x99   :  { %2289 = vmatpush3.bf16.msra.mxu0 %v2286_v10  ;;  %v2306_v25 = vpack.c.bf16 %v352_v24, %v351_v22  ;;  %v2001_v26 = vld [vmem:[#allocation7] ss:$0 sm:$0xff]  ;;  %v1998_v32 = vld [vmem:[#allocation4] ss:$0 sm:$0xff] }
  0x9a   :  { %2291 = vmatprep.subr.bf16.mxu0 %v2290_v13  ;;  %2301 = vmatpush3.bf16.msra.mxu1 %v2298_v6 }
  0x9b   :  { %2310 = vmatprep.subr.bf16.mxu1 %v2684_v18 }
  0x9d   :  { %2293 = vmatpush3.bf16.msra.mxu0 %v2290_v13  ;;  %2144 = vmatmul.mubr.msk.f32.vlgmr.msra.gmra.mrb[0].mxu1 %vm159_vm0, %v145_v14 }
  0x9e   :  { %2146 = vmatprep.mubr.msk.f32.mxu1 %vm159_vm0, %v146_v15  ;;  %2303 = vmatprep.subr.bf16.mxu0 %v2302_v23 }
  0xa0   :  { %2133 = vmatmul.mubr.msk.f32.vlgmr.msra.gmra.mrb[0].mxu0 %vm159_vm0, %v2899_v16 }
  0xa1   :  { %2157 = vmatprep.mubr.msk.f32.mxu0 %vm159_vm0, %v144_v5  ;;  %2147 = vmatmul.mubr.msk.f32.gmra.mrb[2].mxu1 %vm159_vm0, %v147_v17 }
  0xa2   :  { %2167 = vmatprep.mubr.msk.f32.mxu1 %vm2685_vm1, %v2686_v19  ;;  %2305 = vmatpush3.bf16.msra.mxu0 %v2302_v23 }
  0xa3   :  { %2307 = vmatprep.subr.bf16.mxu0 %v2306_v25 }
  0xa6   :  { %2309 = vmatpush3.bf16.msra.mxu0 %v2306_v25 }
  0xa7   :  { %2317 = vmatprep.subr.bf16.mxu0 %v2684_v18 }
  0xa9   :  { %2158 = vmatmul.mubr.msk.f32.vlgmr.msra.gmra.mrb[2].mxu0 %vm159_vm0, %v145_v14 }
  0xaa   :  { %2160 = vmatprep.mubr.msk.f32.mxu0 %vm159_vm0, %v146_v15 }
  0xad   :  { %2161 = vmatmul.mubr.msk.f32.gmra.mrb[4].mxu0 %vm159_vm0, %v147_v17 }
  0xae   :  { %2181 = vmatprep.mubr.msk.f32.mxu0 %vm2685_vm1, %v2686_v19 }
 0x170   :  { %v2145_v27 = vpop.f32.mrb[0].mxu1 }
 0x171   :  { %v336_v28 = vadd.f32 %v2145_v27, %v2001_v26  ;;  %v330_v29 = vpop.f32.mrb[1].mxu1 }
 0x172   :  { %v331_v30 = vadd.f32 %v2001_v26, %v330_v29 }
 0x173   :  { %v2134_v31 = vpop.f32.mrb[0].mxu0 }
 0x174   :  { %v2919_v33 = vadd.f32 %v2134_v31, %v1998_v32  ;;  %v232_v34 = vpop.f32.mrb[1].mxu0  ;;  %v2311_v35 = vpack.c.bf16 %v336_v28, %v331_v30  ;;  %v2921_v36 = vpack.i.bf16 %v336_v28, %v331_v30  ;;  %v2148_v38 = vpop.f32.mrb[2].mxu1 }
 0x175   :  { %v2933_v39 = vadd.f32 %v2148_v38, %v2001_v26  ;;  %v340_v40 = vpop.f32.mrb[3].mxu1  ;;  %v2939_v42 = vadd.f32 %v1998_v32, %v232_v34 }
 0x176   :  { %2398 = vrot.lane.b32.xlu1 %v2921_v36, %s2687_s0  ;;  %2393 = vrot.lane.b32.xlu0 %v2921_v36, %s2688_s1  ;;  %v2937_v41 = vadd.f32 %v2001_v26, %v340_v40 }
 0x177   :  { %2313 = vmatpush3.bf16.xpose.msk.msra.mxu1 %vm2925_vm3, %v2311_v35 }
 0x178   :  { %2314 = vmatprep.subr.bf16.mxu1 %v2684_v18  ;;  %v2339_v62 = vpack.c.bf16 %v2933_v39, %v2937_v41 }
 0x17a   :  { %786 = vrot.lane.b32.xlu1 %v2939_v42, %s2687_s0  ;;  %611 = vrot.lane.b32.xlu0 %v2939_v42, %s2688_s1 }
 0x17c   :  { %v2159_v44 = vpop.f32.mrb[2].mxu0 }
 0x17d   :  { %v432_v45 = vadd.f32 %v2159_v44, %v2006_v43  ;;  %v426_v46 = vpop.f32.mrb[3].mxu0 }
 0x17e   :  { %2168 = vmatmul.mubr.msk.f32.vlgmr.msra.gmra.mrb[4].mxu1 %vm445_vm2, %v2939_v42  ;;  %v427_v47 = vadd.f32 %v2006_v43, %v426_v46 }
 0x17f   :  { %2174 = vmatprep.mubr.msk.f32.mxu1 %vm2685_vm1, %v2686_v19 }
 0x180   :  { %v2162_v48 = vpop.f32.mrb[4].mxu0  ;;  %v2315_v49 = vpack.c.bf16 %v432_v45, %v427_v47  ;;  %v2402_v20 = vpack.i.bf16 %v432_v45, %v427_v47 }
 0x181   :  { %v2950_v50 = vadd.f32 %v2162_v48, %v2006_v43  ;;  %v436_v51 = vpop.f32.mrb[5].mxu0 }
 0x182   :  { %v2952_v52 = vadd.f32 %v2006_v43, %v436_v51  ;;  %2316 = vmatpush3.bf16.msra.mxu1 %v2315_v49 }
 0x183   :  { %2321 = vmatprep.subr.bf16.mxu1 %v2684_v18 }
 0x184   :  { %v2343_v0 = vpack.c.bf16 %v2950_v50, %v2952_v52  ;;  %v2980_v1 = vpack.i.bf16 %v2950_v50, %v2952_v52 }
 0x1e8   :  { %v2394_v53 = vpop.permute.xlu0 %2393  ;;  %v2399_v57 = vpop.permute.xlu1 %2398 }
 0x1e9   :  { %v2396_v54 = vunpack.i.h.bf16 %v2394_v53  ;;  %v2395_v55 = vunpack.i.l.bf16 %v2394_v53  ;;  %v2401_v58 = vunpack.i.h.bf16 %v2399_v57  ;;  %v2400_v59 = vunpack.i.l.bf16 %v2399_v57 }
 0x1eb   :  { %v2318_v56 = vpack.c.bf16 %v2396_v54, %v2395_v55  ;;  %v2325_v61 = vpack.c.bf16 %v2401_v58, %v2400_v59 }
 0x1ec   :  { %v612_v60 = vpop.permute.xlu0 %611  ;;  %v787_v63 = vpop.permute.xlu1 %786 }
 0x1ed   :  { %2320 = vmatpush3.bf16.xpose.msk.msra.mxu0 %vm2925_vm3, %v2318_v56 }
 0x1ee   :  { %2324 = vmatprep.subr.bf16.mxu0 %v2684_v18 }
 0x1f4   :  { %2182 = vmatmul.mubr.msk.f32.vlgmr.msra.gmra.mrb[6].mxu0 %vm445_vm2, %v612_v60 }
 0x1f5   :  { %2327 = vmatpush3.bf16.xpose.msk.msra.mxu0 %vm2925_vm3, %v2325_v61  ;;  %2195 = vmatprep.mubr.msk.f32.mxu0 %vm2685_vm1, %v2686_v19 }
 0x1f6   :  { %2338 = vmatprep.subr.bf16.mxu0 %v2684_v18 }
 0x1fc   :  { %2196 = vmatmul.mubr.msk.f32.vlgmr.msra.gmra.mrb[8].mxu0 %vm445_vm2, %v787_v63 }
 0x1fd   :  { %2341 = vmatpush3.bf16.xpose.msk.msra.mxu0 %vm2925_vm3, %v2339_v62  ;;  %2223 = vmatprep.mubr.msk.f32.mxu0 %vm2685_vm1, %v2686_v19 }
 0x1fe   :  { %2349 = vmatprep.subr.bf16.mxu0 %v2684_v18 }
 0x204   :  { %2224 = vmatmul.mubr.msk.f32.vlgmr.msra.gmra.mrb[10].mxu0 %vm445_vm2, %v2919_v33 }
 0x205   :  { %2244 = vmatprep.mubr.msk.f32.mxu0 %vm2685_vm1, %v2686_v19 }
 0x251   :  { %v521_v2 = vpop.f32.mrb[4].mxu1 }
 0x252   :  { %v525_v3 = vmul.f32 0.35355338, %v521_v2  ;;  %v2169_v4 = vpop.f32.mrb[5].mxu1 }
 0x254   :  { %v527_v5 = vsel %vm526_vm4, %v525_v3, -inf }
 0x255   :  { %528 = vmax.xlane.f32.xlu0 %v527_v5 }
 0x2c7   :  { %v689_v6 = vpop.f32.mrb[6].mxu0 }
 0x2c8   :  { %v693_v7 = vmul.f32 0.35355338, %v689_v6  ;;  %v2183_v8 = vpop.f32.mrb[7].mxu0 }
 0x2ca   :  { %v694_v9 = vsel %vm526_vm4, %v693_v7, -inf }
 0x2cb   :  { %695 = vmax.xlane.f32.xlu1 %v694_v9 }
 0x2cf   :  { %v864_v10 = vpop.f32.mrb[8].mxu0 }
 0x2d0   :  { %v868_v11 = vmul.f32 0.35355338, %v864_v10  ;;  %v2197_v13 = vpop.f32.mrb[9].mxu0 }
 0x2d2   :  { %v869_v14 = vsel %vm526_vm4, %v868_v11, -inf }
 0x2d3   :  { %870 = vmax.xlane.f32.xlu0 %v869_v14 }
 0x2d7   :  { %v1223_v15 = vpop.f32.mrb[10].mxu0 }
 0x2d8   :  { %v2225_v17 = vpop.f32.mrb[11].mxu0 }
 0x2dc   :  { %2403 = vrot.lane.b32.xlu1 %v2402_v20, %s2688_s1 }
 0x2e2   :  { %v529_v21 = vpop.xlane.xlu0 %528 }
 0x2e3   :  { %v530_v22 = vsub.f32 %v525_v3, %v529_v21 }
 0x2e5   :  { %v531_v23 = vmul.f32 1.442695, %v530_v22 }
 0x2e7   :  { %2452 = vpow2.f32 %v531_v23 }
 0x2f1   :  { %v2453_v24 = vpop.eup %2452 }
 0x2f2   :  { %v533_v25 = vsel %vm526_vm4, %v2453_v24, 0.0 }
 0x2f3   :  { %534 = vadd.xlane.f32.xlu0 %v533_v25 }
 0x358   :  { %v696_v26 = vpop.xlane.xlu1 %695 }
 0x359   :  { %v697_v27 = vsub.f32 %v693_v7, %v696_v26 }
 0x35b   :  { %v698_v28 = vmul.f32 1.442695, %v697_v27 }
 0x35c   :  { %v2404_v43 = vpop.permute.xlu1 %2403 }
 0x35d   :  { %2454 = vpow2.f32 %v698_v28  ;;  %v2406_v44 = vunpack.i.h.bf16 %v2404_v43  ;;  %v2405_v45 = vunpack.i.l.bf16 %v2404_v43 }
 0x35f   :  { %v2322_v48 = vpack.c.bf16 %v2406_v44, %v2405_v45 }
 0x360   :  { %v871_v29 = vpop.xlane.xlu0 %870 }
 0x361   :  { %v872_v30 = vsub.f32 %v868_v11, %v871_v29 }
 0x363   :  { %v873_v31 = vmul.f32 1.442695, %v872_v30 }
 0x365   :  { %2456 = vpow2.f32 %v873_v31 }
 0x367   :  { %v2455_v32 = vpop.eup %2454 }
 0x368   :  { %v700_v34 = vsel %vm526_vm4, %v2455_v32, 0.0 }
 0x369   :  { %701 = vadd.xlane.f32.xlu1 %v700_v34 }
 0x36f   :  { %v2457_v35 = vpop.eup %2456 }
 0x370   :  { %v875_v38 = vsel %vm526_vm4, %v2457_v35, 0.0 }
 0x371   :  { %876 = vadd.xlane.f32.xlu0 %v875_v38 }
 0x37a   :  { %2413 = vrot.lane.b32.xlu1 %v2921_v36, %s2689_s21  ;;  %v1227_v36 = vmul.f32 0.35355338, %v1223_v15 }
 0x37e   :  { %959 = vrot.lane.b32.xlu1 %v2939_v42, %s2689_s21  ;;  %v1228_v42 = vsel %vm526_vm4, %v1227_v36, -inf }
 0x380   :  { %v535_v40 = vpop.xlane.xlu0 %534 }
 0x381   :  { %2458 = vrcp.f32 %v535_v40 }
 0x387   :  { %2408 = vrot.lane.b32.xlu0 %v2402_v20, %s2687_s0 }
 0x38b   :  { %v2459_v46 = vpop.eup %2458 }
 0x38c   :  { %v537_v47 = vmul.f32 %v2459_v46, %v2453_v24 }
 0x38e   :  { %2175 = vmatmul.mubr.msk.f32.vlgmr.msra.gmra.mrb[6].mxu1 %vm526_vm4, %v537_v47 }
 0x38f   :  { %2323 = vmatpush3.bf16.msra.mxu1 %v2322_v48  ;;  %2188 = vmatprep.mubr.msk.f32.mxu1 %vm2685_vm1, %v2686_v19 }
 0x390   :  { %2328 = vmatprep.subr.bf16.mxu1 %v2684_v18 }
 0x3a2   :  { %1229 = vmax.xlane.f32.xlu1 %v1228_v42 }
 0x3b3   :  { %2418 = vrot.lane.b32.xlu1 %v2402_v20, %s2689_s21 }
 0x3b7   :  { %1312 = vrot.lane.b32.xlu1 %v2919_v33, %s2688_s1 }
 0x3f6   :  { %v702_v49 = vpop.xlane.xlu1 %701 }
 0x3f7   :  { %2460 = vrcp.f32 %v702_v49 }
 0x3fa   :  { %v2414_v59 = vpop.permute.xlu1 %2413 }
 0x3fb   :  { %v2416_v61 = vunpack.i.h.bf16 %v2414_v59  ;;  %v2415_v62 = vunpack.i.l.bf16 %v2414_v59 }
 0x3fd   :  { %v2332_v2 = vpack.c.bf16 %v2416_v61, %v2415_v62 }
 0x3fe   :  { %v877_v51 = vpop.xlane.xlu0 %876  ;;  %v960_v3 = vpop.permute.xlu1 %959 }
 0x3ff   :  { %2462 = vrcp.f32 %v877_v51 }
 0x401   :  { %v2461_v53 = vpop.eup %2460 }
 0x402   :  { %v704_v54 = vmul.f32 %v2461_v53, %v2455_v32  ;;  %v2409_v55 = vpop.permute.xlu0 %2408  ;;  %v3027_v32 = vpack.i.bf16 %v2933_v39, %v2937_v41 }
 0x403   :  { %v2411_v56 = vunpack.i.h.bf16 %v2409_v55  ;;  %v2410_v57 = vunpack.i.l.bf16 %v2409_v55 }
 0x404   :  { %2189 = vmatmul.mubr.msk.f32.vlgmr.msra.gmra.mrb[8].mxu1 %vm526_vm4, %v704_v54 }
 0x405   :  { %v2329_v58 = vpack.c.bf16 %v2411_v56, %v2410_v57  ;;  %2202 = vmatprep.mubr.msk.f32.mxu1 %vm2685_vm1, %v2686_v19 }
 0x407   :  { %2330 = vmatpush3.bf16.msra.mxu1 %v2329_v58 }
 0x408   :  { %2331 = vmatprep.subr.bf16.mxu1 %v2684_v18 }
 0x409   :  { %v2463_v60 = vpop.eup %2462 }
 0x40a   :  { %v879_v63 = vmul.f32 %v2463_v60, %v2457_v35 }
 0x40c   :  { %2203 = vmatmul.mubr.msk.f32.vlgmr.msra.gmra.mrb[10].mxu1 %vm526_vm4, %v879_v63 }
 0x40d   :  { %2209 = vmatprep.mubr.msk.f32.mxu1 %vm2685_vm1, %v2686_v19 }
 0x410   :  { %2334 = vmatpush3.bf16.xpose.msk.msra.mxu1 %vm2925_vm3, %v2332_v2 }
 0x411   :  { %2335 = vmatprep.subr.bf16.mxu1 %v2684_v18 }
 0x417   :  { %2210 = vmatmul.mubr.msk.f32.vlgmr.msra.gmra.mrb[12].mxu1 %vm445_vm2, %v960_v3 }
 0x418   :  { %2216 = vmatprep.mubr.msk.f32.mxu1 %vm2685_vm1, %v2686_v19 }
 0x42f   :  { %v1230_v4 = vpop.xlane.xlu1 %1229 }
 0x430   :  { %v1231_v23 = vsub.f32 %v1227_v36, %v1230_v4 }
 0x432   :  { %v1232_v26 = vmul.f32 1.442695, %v1231_v23 }
 0x433   :  { %v2419_v5 = vpop.permute.xlu1 %2418 }
 0x434   :  { %v2421_v6 = vunpack.i.h.bf16 %v2419_v5  ;;  %v2420_v7 = vunpack.i.l.bf16 %v2419_v5 }
 0x436   :  { %v2336_v8 = vpack.c.bf16 %v2421_v6, %v2420_v7 }
 0x437   :  { %v1313_v50 = vpop.permute.xlu1 %1312 }
 0x438   :  { %2337 = vmatpush3.bf16.msra.mxu1 %v2336_v8 }
 0x439   :  { %2342 = vmatprep.subr.bf16.mxu1 %v2684_v18 }
 0x461   :  { %v3016_v9 = vpop.f32.mrb[6].mxu1 }
 0x462   :  { %v2176_v10 = vpop.f32.mrb[7].mxu1 }
 0x4d7   :  { %v3018_v11 = vpop.f32.mrb[8].mxu1 }
 0x4d8   :  { %v2190_v13 = vpop.f32.mrb[9].mxu1 }
 0x4df   :  { %v3020_v14 = vpop.f32.mrb[10].mxu1 }
 0x4e0   :  { %v2204_v15 = vpop.f32.mrb[11].mxu1 }
 0x4ea   :  { %v1037_v17 = vpop.f32.mrb[12].mxu1 }
 0x4eb   :  { %v1041_v20 = vmul.f32 0.35355338, %v1037_v17  ;;  %v2211_v21 = vpop.f32.mrb[13].mxu1 }
 0x4ed   :  { %v1042_v22 = vsel %vm526_vm4, %v1041_v20, -inf }
 0x4ee   :  { %1043 = vmax.xlane.f32.xlu0 %v1042_v22 }
 0x57b   :  { %v1044_v24 = vpop.xlane.xlu0 %1043 }
 0x57c   :  { %v1045_v25 = vsub.f32 %v1041_v20, %v1044_v24 }
 0x57e   :  { %v1046_v27 = vmul.f32 1.442695, %v1045_v25 }
 0x580   :  { %2464 = vpow2.f32 %v1046_v27 }
 0x581   :  { %2466 = vpow2.f32 %v1232_v26 }
 0x58a   :  { %v2465_v28 = vpop.eup %2464 }
 0x58b   :  { %v1048_v29 = vsel %vm526_vm4, %v2465_v28, 0.0  ;;  %v2467_v30 = vpop.eup %2466 }
 0x58c   :  { %1049 = vadd.xlane.f32.xlu0 %v1048_v29  ;;  %v1234_v31 = vsel %vm526_vm4, %v2467_v30, 0.0 }
 0x590   :  { %1235 = vadd.xlane.f32.xlu0 %v1234_v31 }
 0x5a6   :  { %2423 = vrot.lane.b32.xlu0 %v3027_v32, %s2688_s1 }
 0x619   :  { %v1050_v34 = vpop.xlane.xlu0 %1049 }
 0x61a   :  { %2468 = vrcp.f32 %v1050_v34 }
 0x61d   :  { %v1236_v35 = vpop.xlane.xlu0 %1235 }
 0x61e   :  { %2470 = vrcp.f32 %v1236_v35 }
 0x621   :  { %v2424_v44 = vpop.permute.xlu0 %2423 }
 0x622   :  { %v2426_v41 = vunpack.i.h.bf16 %v2424_v44  ;;  %v2425_v45 = vunpack.i.l.bf16 %v2424_v44 }
 0x624   :  { %v2469_v38 = vpop.eup %2468  ;;  %v2346_v46 = vpack.c.bf16 %v2426_v41, %v2425_v45 }
 0x625   :  { %v1052_v40 = vmul.f32 %v2469_v38, %v2465_v28 }
 0x627   :  { %2217 = vmatmul.mubr.msk.f32.vlgmr.msra.gmra.mrb[14].mxu1 %vm526_vm4, %v1052_v40 }
 0x628   :  { %v2471_v43 = vpop.eup %2470  ;;  %2344 = vmatpush3.bf16.msra.mxu1 %v2343_v0  ;;  %2230 = vmatprep.mubr.msk.f32.mxu1 %vm2685_vm1, %v2686_v19 }
 0x629   :  { %v1238_v39 = vmul.f32 %v2471_v43, %v2467_v30  ;;  %2345 = vmatprep.subr.bf16.mxu1 %v2684_v18 }
 0x62b   :  { %2231 = vmatmul.mubr.msk.f32.vlgmr.msra.gmra.mrb[16].mxu1 %vm526_vm4, %v1238_v39 }
 0x62c   :  { %2237 = vmatprep.mubr.msk.f32.mxu1 %vm2685_vm1, %v2686_v19 }
 0x631   :  { %2348 = vmatpush3.bf16.xpose.msk.msra.mxu1 %vm2925_vm3, %v2346_v46 }
 0x632   :  { %2356 = vmatprep.subr.bf16.mxu1 %v2684_v18 }
 0x638   :  { %2238 = vmatmul.mubr.msk.f32.vlgmr.msra.gmra.mrb[18].mxu1 %vm445_vm2, %v1313_v50 }
 0x639   :  { %2258 = vmatprep.mubr.msk.f32.mxu1 %vm2685_vm1, %v2686_v19 }
 0x6fa   :  { %v3047_v52 = vpop.f32.mrb[14].mxu1 }
 0x6fb   :  { %v2218_v0 = vpop.f32.mrb[15].mxu1 }
 0x6fe   :  { %v3049_v47 = vpop.f32.mrb[16].mxu1 }
 0x6ff   :  { %v2232_v48 = vpop.f32.mrb[17].mxu1 }
 0x70b   :  { %v1390_v36 = vpop.f32.mrb[18].mxu1 }
 0x70c   :  { %v1394_v42 = vmul.f32 0.35355338, %v1390_v36  ;;  %v2239_v49 = vpop.f32.mrb[19].mxu1 }
 0x70e   :  { %v1395_v51 = vsel %vm526_vm4, %v1394_v42, -inf }
 0x70f   :  { %1396 = vmax.xlane.f32.xlu1 %v1395_v51 }
 0x720   :  { %2433 = vrot.lane.b32.xlu1 %v3027_v32, %s2687_s0 }
 0x724   :  { %1487 = vrot.lane.b32.xlu1 %v2919_v33, %s2687_s0 }
 0x79c   :  { %v1397_v53 = vpop.xlane.xlu1 %1396 }
 0x79d   :  { %v1398_v54 = vsub.f32 %v1394_v42, %v1397_v53 }
 0x79f   :  { %v1399_v55 = vmul.f32 1.442695, %v1398_v54 }
 0x7a0   :  { %v2434_v63 = vpop.permute.xlu1 %2433 }
 0x7a1   :  { %2472 = vpow2.f32 %v1399_v55  ;;  %v2436_v3 = vunpack.i.h.bf16 %v2434_v63  ;;  %v2435_v4 = vunpack.i.l.bf16 %v2434_v63 }
 0x7a3   :  { %v2353_v6 = vpack.c.bf16 %v2436_v3, %v2435_v4 }
 0x7a4   :  { %v1488_v7 = vpop.permute.xlu1 %1487 }
 0x7ab   :  { %v2473_v56 = vpop.eup %2472 }
 0x7ac   :  { %v1401_v57 = vsel %vm526_vm4, %v2473_v56, 0.0 }
 0x7ad   :  { %1402 = vadd.xlane.f32.xlu0 %v1401_v57  ;;  %v1848_v57 = vld [vmem:[#allocation12] sm:$0xff] }
 0x7c3   :  { %2428 = vrot.lane.b32.xlu0 %v2980_v1, %s2688_s1 }
 0x83a   :  { %v1403_v58 = vpop.xlane.xlu0 %1402 }
 0x83b   :  { %2474 = vrcp.f32 %v1403_v58  ;;  %v1849_v58 = vld [vmem:[#allocation12 + $0x8] sm:$0xff] }
 0x83e   :  { %v2429_v59 = vpop.permute.xlu0 %2428 }
 0x83f   :  { %v2431_v60 = vunpack.i.h.bf16 %v2429_v59  ;;  %v2430_v61 = vunpack.i.l.bf16 %v2429_v59  ;;  %v1850_v59 = vld [vmem:[#allocation12 + $0x10] sm:$0xff] }
 0x841   :  { %v2350_v62 = vpack.c.bf16 %v2431_v60, %v2430_v61  ;;  %v2366_v60 = vpack.c.bf16 %v1849_v58, %v1848_v57  ;;  %v1851_v61 = vld [vmem:[#allocation12 + $0x18] sm:$0xff] }
 0x843   :  { %2351 = vmatpush3.bf16.msra.mxu0 %v2350_v62  ;;  %v2370_v62 = vpack.c.bf16 %v1851_v61, %v1850_v59 }
 0x844   :  { %2352 = vmatprep.subr.bf16.mxu0 %v2684_v18 }
 0x845   :  { %v2475_v2 = vpop.eup %2474 }
 0x846   :  { %v1405_v5 = vmul.f32 %v2475_v2, %v2473_v56 }
 0x848   :  { %2245 = vmatmul.mubr.msk.f32.vlgmr.msra.gmra.mrb[12].mxu0 %vm526_vm4, %v1405_v5 }
 0x849   :  { %2251 = vmatprep.mubr.msk.f32.mxu0 %vm2685_vm1, %v2686_v19 }
 0x84c   :  { %2355 = vmatpush3.bf16.xpose.msk.msra.mxu0 %vm2925_vm3, %v2353_v6 }
 0x84d   :  { %2363 = vmatprep.subr.bf16.mxu0 %v2684_v18 }
 0x853   :  { %2252 = vmatmul.mubr.msk.f32.vlgmr.msra.gmra.mrb[14].mxu0 %vm445_vm2, %v1488_v7 }
 0x854   :  { %2272 = vmatprep.mubr.msk.f32.mxu0 %vm2685_vm1, %v2686_v19 }
 0x91b   :  { %v1483_v8 = vpop.f32.mrb[12].mxu0 }
 0x91c   :  { %v2246_v10 = vpop.f32.mrb[13].mxu0 }
 0x926   :  { %v1565_v13 = vpop.f32.mrb[14].mxu0 }
 0x927   :  { %v1569_v15 = vmul.f32 0.35355338, %v1565_v13  ;;  %v2253_v17 = vpop.f32.mrb[15].mxu0 }
 0x929   :  { %v1570_v20 = vsel %vm526_vm4, %v1569_v15, -inf }
 0x92a   :  { %1571 = vmax.xlane.f32.xlu0 %v1570_v20 }
 0x940   :  { %2438 = vrot.lane.b32.xlu0 %v2980_v1, %s2687_s0 }
 0x944   :  { %1660 = vrot.lane.b32.xlu0 %v2919_v33, %s2689_s21 }
 0x9b7   :  { %v1572_v21 = vpop.xlane.xlu0 %1571 }
 0x9b8   :  { %v1573_v22 = vsub.f32 %v1569_v15, %v1572_v21 }
 0x9ba   :  { %v1574_v23 = vmul.f32 1.442695, %v1573_v22 }
 0x9bb   :  { %v2439_v24 = vpop.permute.xlu0 %2438 }
 0x9bc   :  { %2476 = vpow2.f32 %v1574_v23  ;;  %v2441_v25 = vunpack.i.h.bf16 %v2439_v24  ;;  %v2440_v26 = vunpack.i.l.bf16 %v2439_v24 }
 0x9be   :  { %v2357_v27 = vpack.c.bf16 %v2441_v25, %v2440_v26 }
 0x9c0   :  { %2358 = vmatpush3.bf16.msra.mxu1 %v2357_v27 }
 0x9c1   :  { %2359 = vmatprep.subr.bf16.mxu1 %v2684_v18  ;;  %v1661_v18 = vpop.permute.xlu0 %1660 }
 0x9c6   :  { %v2477_v28 = vpop.eup %2476 }
 0x9c7   :  { %v1576_v29 = vsel %vm526_vm4, %v2477_v28, 0.0 }
 0x9c8   :  { %1577 = vadd.xlane.f32.xlu1 %v1576_v29 }
 0x9d9   :  { %2443 = vrot.lane.b32.xlu1 %v3027_v32, %s2689_s21 }
 0xa55   :  { %v1578_v30 = vpop.xlane.xlu1 %1577 }
 0xa56   :  { %2478 = vrcp.f32 %v1578_v30 }
 0xa59   :  { %v2444_v33 = vpop.permute.xlu1 %2443 }
 0xa5a   :  { %v2446_v31 = vunpack.i.h.bf16 %v2444_v33  ;;  %v2445_v34 = vunpack.i.l.bf16 %v2444_v33 }
 0xa5c   :  { %v2360_v40 = vpack.c.bf16 %v2446_v31, %v2445_v34 }
 0xa60   :  { %v2479_v35 = vpop.eup %2478 }
 0xa61   :  { %v1580_v38 = vmul.f32 %v2479_v35, %v2477_v28 }
 0xa63   :  { %2259 = vmatmul.mubr.msk.f32.vlgmr.msra.gmra.mrb[20].mxu1 %vm526_vm4, %v1580_v38 }
 0xa64   :  { %2362 = vmatpush3.bf16.xpose.msk.msra.mxu1 %vm2925_vm3, %v2360_v40  ;;  %2265 = vmatprep.mubr.msk.f32.mxu1 %vm2685_vm1, %v2686_v19 }
 0xa6b   :  { %2266 = vmatmul.mubr.msk.f32.vlgmr.msra.gmra.mrb[22].mxu1 %vm445_vm2, %v1661_v18 }
 0xb36   :  { %v1656_v32 = vpop.f32.mrb[20].mxu1 }
 0xb37   :  { %v2260_v43 = vpop.f32.mrb[21].mxu1 }
 0xb3e   :  { %v1738_v44 = vpop.f32.mrb[22].mxu1 }
 0xb3f   :  { %v1742_v39 = vmul.f32 0.35355338, %v1738_v44  ;;  %v2267_v41 = vpop.f32.mrb[23].mxu1  ;;  %v2047_v44 = vld [vmem:[%s3137_s11] ss:$0 sm:$0xff] }
 0xb41   :  { %v1743_v45 = vsel %vm526_vm4, %v1742_v39, -inf }
 0xb42   :  { %1744 = vmax.xlane.f32.xlu1 %v1743_v45 }
 0xb53   :  { %1133 = vrot.lane.b32.xlu1 %v3018_v11, %s2679_s30 }
 0xb57   :  { %1137 = vrot.lane.b32.xlu1 %v3020_v14, %s2690_s29 }
 0xb5b   :  { %1141 = vrot.lane.b32.xlu1 %v3047_v52, %s2691_s13 }
 0xbcf   :  { %v1745_v19 = vpop.xlane.xlu1 %1744 }
 0xbd0   :  { %v1746_v37 = vsub.f32 %v1742_v39, %v1745_v19 }
 0xbd2   :  { %v1747_v46 = vmul.f32 1.442695, %v1746_v37 }
 0xbd3   :  { %v1134_v11 = vpop.permute.xlu1 %1133 }
 0xbd4   :  { %2480 = vpow2.f32 %v1747_v46  ;;  %v1144_v54 = vsel %vm445_vm2, %v3016_v9, %v1134_v11 }
 0xbd7   :  { %v1138_v36 = vpop.permute.xlu1 %1137 }
 0xbdb   :  { %v1142_v53 = vpop.permute.xlu1 %1141 }
 0xbde   :  { %v2481_v50 = vpop.eup %2480 }
 0xbdf   :  { %v1749_v0 = vsel %vm526_vm4, %v2481_v50, 0.0 }
 0xbe0   :  { %1750 = vadd.xlane.f32.xlu0 %v1749_v0 }
 0xbf6   :  { %2448 = vrot.lane.b32.xlu0 %v2980_v1, %s2689_s21  ;;  %v1145_v1 = vsel %vm526_vm4, %v1144_v54, %v1138_v36 }
 0xbf7   :  { %v1147_v56 = vsel %vm1146_vm5, %v1145_v1, %v1142_v53 }
 0xbfa   :  { %1834 = vrot.lane.b32.xlu0 %v1483_v8, %s2679_s30  ;;  %v2043_v8 = vld [vmem:[#allocation13] ss:$0 sm:$0xff] }
 0xbfe   :  { %1838 = vrot.lane.b32.xlu0 %v1656_v32, %s2690_s29  ;;  %v2046_v32 = vld [vmem:[%s3136_s10] ss:$0 sm:$0xff] }
 0xc6d   :  { %v1751_v14 = vpop.xlane.xlu0 %1750 }
 0xc6e   :  { %2482 = vrcp.f32 %v1751_v14 }
 0xc71   :  { %v2449_v48 = vpop.permute.xlu0 %2448 }
 0xc72   :  { %v2451_v52 = vunpack.i.h.bf16 %v2449_v48  ;;  %v2450_v42 = vunpack.i.l.bf16 %v2449_v48 }
 0xc74   :  { %v2364_v49 = vpack.c.bf16 %v2451_v52, %v2450_v42 }
 0xc75   :  { %v1835_v2 = vpop.permute.xlu0 %1834 }
 0xc76   :  { %2365 = vmatpush3.bf16.msra.mxu0 %v2364_v49  ;;  %v1845_v4 = vsel %vm445_vm2, %v3049_v47, %v1835_v2 }
 0xc77   :  { %2367 = vmatprep.subr.bf16.mxu0 %v2366_v60 }
 0xc78   :  { %v2483_v51 = vpop.eup %2482 }
 0xc79   :  { %v1753_v55 = vmul.f32 %v2483_v51, %v2481_v50  ;;  %v1839_v3 = vpop.permute.xlu0 %1838 }
 0xc7a   :  { %v1846_v5 = vsel %vm526_vm4, %v1845_v4, %v1839_v3 }
 0xc7b   :  { %2273 = vmatmul.mubr.msk.f32.vlgmr.msra.gmra.mrb[16].mxu0 %vm526_vm4, %v1753_v55 }
 0xc7c   :  { %2283 = vmatprep.mubr.msk.f32.mxu0 %vm159_vm0, %v1147_v56  ;;  %2369 = vmatpush3.bf16.msra.mxu0 %v2366_v60 }
 0xc7d   :  { %2371 = vmatprep.subr.bf16.mxu0 %v2370_v62 }
 0xc80   :  { %2373 = vmatpush3.bf16.msra.mxu0 %v2370_v62 }
 0xd4e   :  { %v1829_v9 = vpop.f32.mrb[16].mxu0 }
 0xd4f   :  { %1842 = vrot.lane.b32.xlu1 %v1829_v9, %s2691_s13  ;;  %v2274_v63 = vpop.f32.mrb[17].mxu0 }
 0xdc1   :  { %v1843_v6 = vpop.permute.xlu1 %1842 }
 0xdc2   :  { %v1847_v7 = vsel %vm1146_vm5, %v1846_v5, %v1843_v6 }
 0xdc3   :  { %2284 = vmatmul.mubr.msk.f32.vlgmr.msra.gmra.mrb[18].mxu0 %vm159_vm0, %v1847_v7 }
 0xe96   :  { %v2285_v10 = vpop.f32.mrb[18].mxu0 }
 0xe97   :  { %v1937_v13 = vadd.f32 %v2285_v10, %v2043_v8  ;;  %v1931_v15 = vpop.f32.mrb[19].mxu0 }
 0xe98   :  { %v1932_v17 = vadd.f32 %v2043_v8, %v1931_v15 }
 0xe99   :  { %v1941_v20 = vadd.f32 %v1937_v13, %v2899_v16 }
 0xe9a   :  { %v1940_v21 = vadd.f32 %v1932_v17, %v2886_v12 }
 0xe9b   :  { %v1947_v22 = vsel %vm159_vm0, %v1941_v20, 0.0 }
 0xe9c   :  { %1948 = vadd.xlane.f32.xlu1 %v1947_v22  ;;  %v1944_v47 = vsel %vm159_vm0, %v1940_v21, 0.0 }
 0xe9d   :  { %1945 = vadd.xlane.f32.xlu0 %v1944_v47 }
 0xf29   :  { %v1949_v23 = vpop.xlane.xlu1 %1948 }
 0xf2a   :  { %v1952_v24 = vmul.f32 0.03125, %v1949_v23  ;;  %v1946_v25 = vpop.xlane.xlu0 %1945 }
 0xf2b   :  { %v1951_v26 = vmul.f32 0.03125, %v1946_v25 }
 0xf2c   :  { %v1954_v27 = vsub.f32 %v1941_v20, %v1952_v24 }
 0xf2d   :  { %v1953_v28 = vsub.f32 %v1940_v21, %v1951_v26 }
 0xf2e   :  { %v1956_v33 = vmul.f32 %v1954_v27, %v1954_v27 }
 0xf2f   :  { %v1955_v29 = vmul.f32 %v1953_v28, %v1953_v28 }
 0xf30   :  { %v1960_v16 = vsel %vm159_vm0, %v1956_v33, 0.0 }
 0xf31   :  { %v1957_v30 = vsel %vm159_vm0, %v1955_v29, 0.0 }
 0xf32   :  { %1958 = vadd.xlane.f32.xlu0 %v1957_v30 }
 0xf36   :  { %1961 = vadd.xlane.f32.xlu0 %v1960_v16 }
 0xfbf   :  { %v1959_v12 = vpop.xlane.xlu0 %1958 }
 0xfc0   :  { %v1963_v31 = vmul.f32 0.03125, %v1959_v12 }
 0xfc2   :  { %v1965_v34 = vadd.f32 1e-05, %v1963_v31 }
 0xfc3   :  { %v1962_v35 = vpop.xlane.xlu0 %1961 }
 0xfc4   :  { %2484 = vrsqrt.f32 %v1965_v34  ;;  %v1964_v38 = vmul.f32 0.03125, %v1962_v35 }
 0xfc6   :  { %v1966_v40 = vadd.f32 1e-05, %v1964_v38 }
 0xfc8   :  { %2486 = vrsqrt.f32 %v1966_v40 }
 0xfce   :  { %v2485_v18 = vpop.eup %2484 }
 0xfcf   :  { %v1969_v43 = vmul.f32 %v2485_v18, %v1953_v28 }
 0xfd1   :  { %v1977_v39 = vmul.f32 %v2046_v32, %v1969_v43 }
 0xfd2   :  { %v2487_v41 = vpop.eup %2486 }
 0xfd3   :  { %v1985_v45 = vadd.f32 %v2047_v44, %v1977_v39  ;;  %v1970_v19 = vmul.f32 %v2487_v41, %v1954_v27 }
 0xfd5   :  { %1987 = vst.msk [vmem:[%s3138_s12] sm:$0xff] %vm159_vm0, %v1985_v45  ;;  %v1978_v37 = vmul.f32 %v2046_v32, %v1970_v19 }
 0xfd7   :  { %v1986_v46 = vadd.f32 %v2047_v44, %v1978_v37 }
 0xfd9   :  { %1988 = vst.msk [vmem:[%s3138_s12 + $0x8] sm:$0xff] %vm159_vm0, %v1986_v46 }
 0xfda   :  { %1993 = vsyncpa [#allocation3], 1 }
 0xfdb   :  { %1994 = vsyncpa [#allocation5], 1 }
 0xfdc   :  { %1995 = vsyncpa [#allocation8], 1 }
 0xfdd   :  { %1996 = vsyncpa [#allocation11], 1 }
 0xfde   :  { %1997 = vsyncpa [#allocation14], 1 }

// kernel: transformer_decoder_forward.8
= control target key start
LH: loop header
LB: loop body
LE: loop exit
PB: predicated region body
PF: predicated region fallthrough
CT: control target
= control target key end

     0   :  { %v2397_v3 = vmov 0.0   ;;  %vm176_vm0 = vcmask 261120   ;;  %s3625_s1 = inlined_call_operand.vmem [shape: f32[32,2048], index: 1, kind: input, shape index: {}]   ;;  %s3626_s0 = inlined_call_operand.vmem [shape: f32[16,32], index: 0, kind: input, shape index: {}]   ;;  %s3627_s3 = inlined_call_operand.vmem [shape: f32[2048,32], index: 3, kind: input, shape index: {}]   ;;  %s3628_s2 = inlined_call_operand.vmem [shape: f32[1,2048], index: 2, kind: input, shape index: {}]   ;;  %s3629_s4 = inlined_call_operand.vmem [shape: f32[1,32], index: 4, kind: input, shape index: {}]   ;;  %s3630_s5 = inlined_call_operand.vmem [shape: f32[1,32], index: 5, kind: input, shape index: {}]   ;;  %s3631_s6 = inlined_call_operand.vmem [shape: f32[1,32], index: 6, kind: input, shape index: {}]   ;;  %s3632_s7 = inlined_call_operand.vmem [shape: f32[16,32], index: 7, kind: output, shape index: {}]  }
   0x1   :  { %v29_v0 = vld [vmem:[%s3625_s1 + $0x8] sm:$0xff]  ;;  %v31_v2 = vld [vmem:[%s3625_s1 + $0x18] sm:$0xff]  ;;  %247 = vmatprep.mubr.f32.mxu0 %v2397_v3  ;;  %324 = vmatprep.mubr.f32.mxu1 %v2397_v3  ;;  %v28_v6 = vld [vmem:[%s3625_s1] sm:$0xff] }
   0x2   :  { %v45_v1 = vld [vmem:[%s3625_s1 + $0x88] sm:$0xff]  ;;  %v47_v5 = vld [vmem:[%s3625_s1 + $0x98] sm:$0xff]  ;;  %v44_v7 = vld [vmem:[%s3625_s1 + $0x80] sm:$0xff] }
   0x3   :  { %v2070_v4 = vpack.c.bf16 %v45_v1, %v29_v0  ;;  %v2078_v8 = vpack.c.bf16 %v47_v5, %v31_v2  ;;  %v2072_v9 = vpack.c.bf16 %v44_v7, %v28_v6  ;;  %v30_v10 = vld [vmem:[%s3625_s1 + $0x10] sm:$0xff]  ;;  %v61_v12 = vld [vmem:[%s3625_s1 + $0x108] sm:$0xff]  ;;  %v63_v15 = vld [vmem:[%s3625_s1 + $0x118] sm:$0xff] }
   0x4   :  { %v46_v11 = vld [vmem:[%s3625_s1 + $0x90] sm:$0xff]  ;;  %v77_v14 = vld [vmem:[%s3625_s1 + $0x188] sm:$0xff]  ;;  %v79_v16 = vld [vmem:[%s3625_s1 + $0x198] sm:$0xff] }
   0x5   :  { %2071 = vmatprep.subr.bf16.mxu0 %v2070_v4  ;;  %v2080_v13 = vpack.c.bf16 %v46_v11, %v30_v10  ;;  %2079 = vmatprep.subr.bf16.mxu1 %v2078_v8  ;;  %v2074_v17 = vpack.c.bf16 %v77_v14, %v61_v12  ;;  %v2082_v18 = vpack.c.bf16 %v79_v16, %v63_v15  ;;  %v60_v19 = vld [vmem:[%s3625_s1 + $0x100] sm:$0xff]  ;;  %v62_v21 = vld [vmem:[%s3625_s1 + $0x110] sm:$0xff]  ;;  %v33_v24 = vld [vmem:[%s3625_s1 + $0x28] sm:$0xff] }
   0x6   :  { %2073 = vmatpush1.bf16.msra.mxu0 %v2072_v9  ;;  %v76_v20 = vld [vmem:[%s3625_s1 + $0x180] sm:$0xff]  ;;  %v78_v23 = vld [vmem:[%s3625_s1 + $0x190] sm:$0xff]  ;;  %v49_v26 = vld [vmem:[%s3625_s1 + $0xa8] sm:$0xff] }
   0x7   :  { %2081 = vmatpush1.bf16.msra.mxu1 %v2080_v13  ;;  %v2076_v22 = vpack.c.bf16 %v76_v20, %v60_v19  ;;  %2075 = vmatprep.subr.bf16.mxu0 %v2074_v17  ;;  %v2084_v25 = vpack.c.bf16 %v78_v23, %v62_v21  ;;  %v35_v27 = vld [vmem:[%s3625_s1 + $0x38] sm:$0xff]  ;;  %v2086_v29 = vpack.c.bf16 %v49_v26, %v33_v24  ;;  %v32_v31 = vld [vmem:[%s3625_s1 + $0x20] sm:$0xff]  ;;  %v34_v33 = vld [vmem:[%s3625_s1 + $0x30] sm:$0xff] }
   0x8   :  { %2083 = vmatprep.subr.bf16.mxu1 %v2082_v18  ;;  %v51_v28 = vld [vmem:[%s3625_s1 + $0xb8] sm:$0xff]  ;;  %v48_v32 = vld [vmem:[%s3625_s1 + $0xa0] sm:$0xff]  ;;  %v50_v35 = vld [vmem:[%s3625_s1 + $0xb0] sm:$0xff] }
   0x9   :  { %v2094_v30 = vpack.c.bf16 %v51_v28, %v35_v27  ;;  %v2512_v34 = vld [vmem:[%s3626_s0] sm:$0xff]  ;;  %v65_v36 = vld [vmem:[%s3625_s1 + $0x128] sm:$0xff]  ;;  %v2088_v37 = vpack.c.bf16 %v48_v32, %v32_v31  ;;  %v2096_v38 = vpack.c.bf16 %v50_v35, %v34_v33  ;;  %v67_v40 = vld [vmem:[%s3625_s1 + $0x138] sm:$0xff] }
   0xa   :  { %2077 = vmatpush1.bf16.msra.mxu0 %v2076_v22  ;;  %v81_v39 = vld [vmem:[%s3625_s1 + $0x1a8] sm:$0xff]  ;;  %v83_v41 = vld [vmem:[%s3625_s1 + $0x1b8] sm:$0xff]  ;;  %v64_v43 = vld [vmem:[%s3625_s1 + $0x120] sm:$0xff] }
   0xb   :  { %2085 = vmatpush1.bf16.msra.mxu1 %v2084_v25  ;;  %2087 = vmatprep.subr.bf16.mxu0 %v2086_v29  ;;  %v2090_v42 = vpack.c.bf16 %v81_v39, %v65_v36  ;;  %v80_v44 = vld [vmem:[%s3625_s1 + $0x1a0] sm:$0xff]  ;;  %v66_v45 = vld [vmem:[%s3625_s1 + $0x130] sm:$0xff]  ;;  %v2098_v46 = vpack.c.bf16 %v83_v41, %v67_v40  ;;  %v37_v48 = vld [vmem:[%s3625_s1 + $0x48] sm:$0xff] }
   0xc   :  { %2095 = vmatprep.subr.bf16.mxu1 %v2094_v30  ;;  %v82_v47 = vld [vmem:[%s3625_s1 + $0x1b0] sm:$0xff]  ;;  %v53_v49 = vld [vmem:[%s3625_s1 + $0xc8] sm:$0xff]  ;;  %v39_v51 = vld [vmem:[%s3625_s1 + $0x58] sm:$0xff]  ;;  %v2092_v53 = vpack.c.bf16 %v80_v44, %v64_v43 }
   0xd   :  { %1747 = vmatmul.mubr.msk.f32.vlgmr.msra.gmra.mrb[0].mxu0 %vm176_vm0, %v2512_v34  ;;  %v2555_v50 = vld [vmem:[%s3626_s0 + $0x8] sm:$0xff]  ;;  %v55_v52 = vld [vmem:[%s3625_s1 + $0xd8] sm:$0xff]  ;;  %v2100_v54 = vpack.c.bf16 %v82_v47, %v66_v45  ;;  %v2102_v55 = vpack.c.bf16 %v53_v49, %v37_v48  ;;  %v36_v56 = vld [vmem:[%s3625_s1 + $0x40] sm:$0xff] }
   0xe   :  { %1749 = vmatmul.mubr.msk.f32.vlgmr.msra.gmra.mrb[0].mxu1 %vm176_vm0, %v2512_v34  ;;  %253 = vmatprep.mubr.f32.mxu0 %v2397_v3  ;;  %v52_v57 = vld [vmem:[%s3625_s1 + $0xc0] sm:$0xff]  ;;  %v2110_v58 = vpack.c.bf16 %v55_v52, %v39_v51  ;;  %v38_v59 = vld [vmem:[%s3625_s1 + $0x50] sm:$0xff]  ;;  %v69_v61 = vld [vmem:[%s3625_s1 + $0x148] sm:$0xff] }
   0xf   :  { %2089 = vmatpush1.bf16.msra.mxu0 %v2088_v37  ;;  %2097 = vmatpush1.bf16.msra.mxu1 %v2096_v38  ;;  %v54_v60 = vld [vmem:[%s3625_s1 + $0xd0] sm:$0xff]  ;;  %v85_v62 = vld [vmem:[%s3625_s1 + $0x1c8] sm:$0xff]  ;;  %v71_v63 = vld [vmem:[%s3625_s1 + $0x158] sm:$0xff]  ;;  %v2104_v1 = vpack.c.bf16 %v52_v57, %v36_v56 }
  0x10   :  { %330 = vmatprep.mubr.f32.mxu1 %v2397_v3  ;;  %2091 = vmatprep.subr.bf16.mxu0 %v2090_v42  ;;  %v87_v0 = vld [vmem:[%s3625_s1 + $0x1d8] sm:$0xff]  ;;  %v2112_v2 = vpack.c.bf16 %v54_v60, %v38_v59  ;;  %v68_v4 = vld [vmem:[%s3625_s1 + $0x140] sm:$0xff]  ;;  %v2106_v6 = vpack.c.bf16 %v85_v62, %v69_v61  ;;  %v70_v8 = vld [vmem:[%s3625_s1 + $0x150] sm:$0xff] }
  0x11   :  { %1748 = vmatmul.mubr.msk.f32.gmra.mrb[2].mxu0 %vm176_vm0, %v2555_v50  ;;  %2099 = vmatprep.subr.bf16.mxu1 %v2098_v46  ;;  %v84_v5 = vld [vmem:[%s3625_s1 + $0x1c0] sm:$0xff]  ;;  %v2114_v7 = vpack.c.bf16 %v87_v0, %v71_v63  ;;  %v86_v9 = vld [vmem:[%s3625_s1 + $0x1d0] sm:$0xff]  ;;  %v41_v10 = vld [vmem:[%s3625_s1 + $0x68] sm:$0xff] }
  0x12   :  { %1750 = vmatmul.mubr.msk.f32.gmra.mrb[2].mxu1 %vm176_vm0, %v2555_v50  ;;  %401 = vmatprep.mubr.f32.mxu0 %v2397_v3  ;;  %v57_v11 = vld [vmem:[%s3625_s1 + $0xe8] sm:$0xff]  ;;  %v43_v12 = vld [vmem:[%s3625_s1 + $0x78] sm:$0xff]  ;;  %v2108_v14 = vpack.c.bf16 %v84_v5, %v68_v4  ;;  %v2116_v15 = vpack.c.bf16 %v86_v9, %v70_v8  ;;  %v40_v17 = vld [vmem:[%s3625_s1 + $0x60] sm:$0xff] }
  0x13   :  { %2093 = vmatpush1.bf16.msra.mxu0 %v2092_v53  ;;  %2101 = vmatpush1.bf16.msra.mxu1 %v2100_v54  ;;  %v59_v13 = vld [vmem:[%s3625_s1 + $0xf8] sm:$0xff]  ;;  %v2118_v16 = vpack.c.bf16 %v57_v11, %v41_v10  ;;  %v56_v18 = vld [vmem:[%s3625_s1 + $0xe0] sm:$0xff]  ;;  %v42_v20 = vld [vmem:[%s3625_s1 + $0x70] sm:$0xff] }
  0x14   :  { %478 = vmatprep.mubr.f32.mxu1 %v2397_v3  ;;  %2103 = vmatprep.subr.bf16.mxu0 %v2102_v55  ;;  %v2126_v19 = vpack.c.bf16 %v59_v13, %v43_v12  ;;  %v58_v21 = vld [vmem:[%s3625_s1 + $0xf0] sm:$0xff]  ;;  %v73_v22 = vld [vmem:[%s3625_s1 + $0x168] sm:$0xff]  ;;  %v75_v24 = vld [vmem:[%s3625_s1 + $0x178] sm:$0xff]  ;;  %v2120_v26 = vpack.c.bf16 %v56_v18, %v40_v17 }
  0x15   :  { %2111 = vmatprep.subr.bf16.mxu1 %v2110_v58  ;;  %v89_v23 = vld [vmem:[%s3625_s1 + $0x1e8] sm:$0xff]  ;;  %v91_v25 = vld [vmem:[%s3625_s1 + $0x1f8] sm:$0xff]  ;;  %v2128_v27 = vpack.c.bf16 %v58_v21, %v42_v20  ;;  %v72_v28 = vld [vmem:[%s3625_s1 + $0x160] sm:$0xff] }
  0x16   :  { %1751 = vmatmul.mubr.msk.f32.vlgmr.msra.gmra.mrb[4].mxu0 %vm176_vm0, %v2512_v34  ;;  %1753 = vmatmul.mubr.msk.f32.vlgmr.msra.gmra.mrb[4].mxu1 %vm176_vm0, %v2512_v34  ;;  %v88_v29 = vld [vmem:[%s3625_s1 + $0x1e0] sm:$0xff]  ;;  %v2122_v30 = vpack.c.bf16 %v89_v23, %v73_v22  ;;  %v2130_v31 = vpack.c.bf16 %v91_v25, %v75_v24  ;;  %v74_v32 = vld [vmem:[%s3625_s1 + $0x170] sm:$0xff]  ;;  %v848_v36 = vld [vmem:[%s3627_s3 + $0x88] sm:$0xff] }
  0x17   :  { %407 = vmatprep.mubr.f32.mxu0 %v2397_v3  ;;  %484 = vmatprep.mubr.f32.mxu1 %v2397_v3  ;;  %v90_v33 = vld [vmem:[%s3625_s1 + $0x1f0] sm:$0xff]  ;;  %v847_v35 = vld [vmem:[%s3627_s3 + $0x80] sm:$0xff]  ;;  %v880_v38 = vld [vmem:[%s3627_s3 + $0x188] sm:$0xff]  ;;  %v2124_v39 = vpack.c.bf16 %v88_v29, %v72_v28 }
  0x18   :  { %2105 = vmatpush1.bf16.msra.mxu0 %v2104_v1  ;;  %2113 = vmatpush1.bf16.msra.mxu1 %v2112_v2  ;;  %v879_v37 = vld [vmem:[%s3627_s3 + $0x180] sm:$0xff]  ;;  %v2132_v40 = vpack.c.bf16 %v90_v33, %v74_v32  ;;  %v2134_v41 = vpack.c.bf16 %v848_v36, %v847_v35  ;;  %v832_v44 = vld [vmem:[%s3627_s3 + $0x8] sm:$0xff]  ;;  %v849_v47 = vld [vmem:[%s3627_s3 + $0x90] sm:$0xff] }
  0x19   :  { %2107 = vmatprep.subr.bf16.mxu0 %v2106_v6  ;;  %2115 = vmatprep.subr.bf16.mxu1 %v2114_v7  ;;  %v2166_v42 = vpack.c.bf16 %v880_v38, %v879_v37  ;;  %v831_v43 = vld [vmem:[%s3627_s3] sm:$0xff]  ;;  %v864_v46 = vld [vmem:[%s3627_s3 + $0x108] sm:$0xff]  ;;  %v850_v48 = vld [vmem:[%s3627_s3 + $0x98] sm:$0xff] }
  0x1a   :  { %1752 = vmatmul.mubr.msk.f32.gmra.mrb[6].mxu0 %vm176_vm0, %v2555_v50  ;;  %1754 = vmatmul.mubr.msk.f32.gmra.mrb[6].mxu1 %vm176_vm0, %v2555_v50  ;;  %v863_v45 = vld [vmem:[%s3627_s3 + $0x100] sm:$0xff]  ;;  %v881_v49 = vld [vmem:[%s3627_s3 + $0x190] sm:$0xff]  ;;  %v882_v51 = vld [vmem:[%s3627_s3 + $0x198] sm:$0xff]  ;;  %v2136_v52 = vpack.c.bf16 %v832_v44, %v831_v43  ;;  %v2138_v56 = vpack.c.bf16 %v850_v48, %v849_v47 }
  0x1b   :  { %555 = vmatprep.mubr.f32.mxu0 %v2397_v3  ;;  %632 = vmatprep.mubr.f32.mxu1 %v2397_v3  ;;  %v2168_v53 = vpack.c.bf16 %v864_v46, %v863_v45  ;;  %v833_v54 = vld [vmem:[%s3627_s3 + $0x10] sm:$0xff]  ;;  %v834_v55 = vld [vmem:[%s3627_s3 + $0x18] sm:$0xff]  ;;  %v2170_v57 = vpack.c.bf16 %v882_v51, %v881_v49  ;;  %v851_v60 = vld [vmem:[%s3627_s3 + $0xa0] sm:$0xff] }
  0x1c   :  { %2109 = vmatpush1.bf16.msra.mxu0 %v2108_v14  ;;  %2117 = vmatpush1.bf16.msra.mxu1 %v2116_v15  ;;  %v865_v58 = vld [vmem:[%s3627_s3 + $0x110] sm:$0xff]  ;;  %v866_v59 = vld [vmem:[%s3627_s3 + $0x118] sm:$0xff]  ;;  %v852_v61 = vld [vmem:[%s3627_s3 + $0xa8] sm:$0xff]  ;;  %v2140_v0 = vpack.c.bf16 %v834_v55, %v833_v54 }
  0x1d   :  { %2119 = vmatprep.subr.bf16.mxu0 %v2118_v16  ;;  %2127 = vmatprep.subr.bf16.mxu1 %v2126_v19  ;;  %v883_v62 = vld [vmem:[%s3627_s3 + $0x1a0] sm:$0xff]  ;;  %v884_v63 = vld [vmem:[%s3627_s3 + $0x1a8] sm:$0xff]  ;;  %v2142_v4 = vpack.c.bf16 %v852_v61, %v851_v60  ;;  %v853_v7 = vld [vmem:[%s3627_s3 + $0xb0] sm:$0xff] }
  0x1e   :  { %v835_v1 = vld [vmem:[%s3627_s3 + $0x20] sm:$0xff]  ;;  %v836_v2 = vld [vmem:[%s3627_s3 + $0x28] sm:$0xff]  ;;  %v2174_v5 = vpack.c.bf16 %v884_v63, %v883_v62  ;;  %v854_v8 = vld [vmem:[%s3627_s3 + $0xb8] sm:$0xff] }
  0x1f   :  { %1755 = vmatmul.mubr.msk.f32.vlgmr.msra.gmra.mrb[8].mxu0 %vm176_vm0, %v2512_v34  ;;  %1757 = vmatmul.mubr.msk.f32.vlgmr.msra.gmra.mrb[8].mxu1 %vm176_vm0, %v2512_v34  ;;  %v868_v6 = vld [vmem:[%s3627_s3 + $0x128] sm:$0xff]  ;;  %v885_v9 = vld [vmem:[%s3627_s3 + $0x1b0] sm:$0xff]  ;;  %v886_v10 = vld [vmem:[%s3627_s3 + $0x1b8] sm:$0xff]  ;;  %v2144_v11 = vpack.c.bf16 %v836_v2, %v835_v1  ;;  %v2146_v14 = vpack.c.bf16 %v854_v8, %v853_v7 }
  0x20   :  { %561 = vmatprep.mubr.f32.mxu0 %v2397_v3  ;;  %638 = vmatprep.mubr.f32.mxu1 %v2397_v3  ;;  %v838_v13 = vld [vmem:[%s3627_s3 + $0x38] sm:$0xff]  ;;  %v2178_v15 = vpack.c.bf16 %v886_v10, %v885_v9  ;;  %v869_v16 = vld [vmem:[%s3627_s3 + $0x130] sm:$0xff]  ;;  %v855_v18 = vld [vmem:[%s3627_s3 + $0xc0] sm:$0xff] }
  0x21   :  { %2121 = vmatpush1.bf16.msra.mxu0 %v2120_v26  ;;  %2129 = vmatpush1.bf16.msra.mxu1 %v2128_v27  ;;  %v870_v17 = vld [vmem:[%s3627_s3 + $0x138] sm:$0xff]  ;;  %v856_v19 = vld [vmem:[%s3627_s3 + $0xc8] sm:$0xff]  ;;  %v887_v20 = vld [vmem:[%s3627_s3 + $0x1c0] sm:$0xff] }
  0x22   :  { %2123 = vmatprep.subr.bf16.mxu0 %v2122_v30  ;;  %2131 = vmatprep.subr.bf16.mxu1 %v2130_v31  ;;  %v888_v21 = vld [vmem:[%s3627_s3 + $0x1c8] sm:$0xff]  ;;  %v2180_v23 = vpack.c.bf16 %v870_v17, %v869_v16  ;;  %v839_v24 = vld [vmem:[%s3627_s3 + $0x40] sm:$0xff]  ;;  %v2150_v26 = vpack.c.bf16 %v856_v19, %v855_v18  ;;  %v857_v30 = vld [vmem:[%s3627_s3 + $0xd0] sm:$0xff] }
  0x23   :  { %1756 = vmatmul.mubr.msk.f32.gmra.mrb[10].mxu0 %vm176_vm0, %v2555_v50  ;;  %1758 = vmatmul.mubr.msk.f32.gmra.mrb[10].mxu1 %vm176_vm0, %v2555_v50  ;;  %v840_v25 = vld [vmem:[%s3627_s3 + $0x48] sm:$0xff]  ;;  %v2182_v27 = vpack.c.bf16 %v888_v21, %v887_v20  ;;  %v871_v28 = vld [vmem:[%s3627_s3 + $0x140] sm:$0xff]  ;;  %v858_v31 = vld [vmem:[%s3627_s3 + $0xd8] sm:$0xff] }
  0x24   :  { %709 = vmatprep.mubr.f32.mxu0 %v2397_v3  ;;  %786 = vmatprep.mubr.f32.mxu1 %v2397_v3  ;;  %v872_v29 = vld [vmem:[%s3627_s3 + $0x148] sm:$0xff]  ;;  %v889_v32 = vld [vmem:[%s3627_s3 + $0x1d0] sm:$0xff]  ;;  %v890_v33 = vld [vmem:[%s3627_s3 + $0x1d8] sm:$0xff]  ;;  %v2152_v35 = vpack.c.bf16 %v840_v25, %v839_v24 }
  0x25   :  { %2125 = vmatpush1.bf16.msra.mxu0 %v2124_v39  ;;  %2133 = vmatpush1.bf16.msra.mxu1 %v2132_v40  ;;  %v2184_v36 = vpack.c.bf16 %v872_v29, %v871_v28  ;;  %v841_v37 = vld [vmem:[%s3627_s3 + $0x50] sm:$0xff]  ;;  %v842_v38 = vld [vmem:[%s3627_s3 + $0x58] sm:$0xff]  ;;  %v2154_v39 = vpack.c.bf16 %v858_v31, %v857_v30  ;;  %v2186_v40 = vpack.c.bf16 %v890_v33, %v889_v32  ;;  %v859_v43 = vld [vmem:[%s3627_s3 + $0xe0] sm:$0xff] }
  0x26   :  { %2135 = vmatprep.subr.bf16.mxu0 %v2134_v41  ;;  %2167 = vmatprep.subr.bf16.mxu1 %v2166_v42  ;;  %v873_v41 = vld [vmem:[%s3627_s3 + $0x150] sm:$0xff]  ;;  %v874_v42 = vld [vmem:[%s3627_s3 + $0x158] sm:$0xff]  ;;  %v860_v44 = vld [vmem:[%s3627_s3 + $0xe8] sm:$0xff]  ;;  %v2156_v47 = vpack.c.bf16 %v842_v38, %v841_v37 }
  0x27   :  { %v891_v45 = vld [vmem:[%s3627_s3 + $0x1e0] sm:$0xff]  ;;  %v892_v46 = vld [vmem:[%s3627_s3 + $0x1e8] sm:$0xff]  ;;  %v2188_v48 = vpack.c.bf16 %v874_v42, %v873_v41  ;;  %v2158_v51 = vpack.c.bf16 %v860_v44, %v859_v43  ;;  %v893_v60 = vld [vmem:[%s3627_s3 + $0x1f0] sm:$0xff] }
  0x28   :  { %1759 = vmatmul.mubr.msk.f32.vlgmr.msra.gmra.mrb[12].mxu0 %vm176_vm0, %v2512_v34  ;;  %1761 = vmatmul.mubr.msk.f32.vlgmr.msra.gmra.mrb[12].mxu1 %vm176_vm0, %v2512_v34  ;;  %v2172_v34 = vpack.c.bf16 %v866_v59, %v865_v58  ;;  %v843_v49 = vld [vmem:[%s3627_s3 + $0x60] sm:$0xff]  ;;  %v876_v55 = vld [vmem:[%s3627_s3 + $0x168] sm:$0xff]  ;;  %v861_v58 = vld [vmem:[%s3627_s3 + $0xf0] sm:$0xff] }
  0x29   :  { %715 = vmatprep.mubr.f32.mxu0 %v2397_v3  ;;  %792 = vmatprep.mubr.f32.mxu1 %v2397_v3  ;;  %v867_v3 = vld [vmem:[%s3627_s3 + $0x120] sm:$0xff]  ;;  %v862_v59 = vld [vmem:[%s3627_s3 + $0xf8] sm:$0xff]  ;;  %v845_v63 = vld [vmem:[%s3627_s3 + $0x70] sm:$0xff] }
  0x2a   :  { %2137 = vmatpush3.bf16.msra.mxu0 %v2136_v52  ;;  %2169 = vmatpush3.bf16.msra.mxu1 %v2168_v53  ;;  %v2176_v12 = vpack.c.bf16 %v868_v6, %v867_v3  ;;  %v2190_v52 = vpack.c.bf16 %v892_v46, %v891_v45  ;;  %v844_v53 = vld [vmem:[%s3627_s3 + $0x68] sm:$0xff]  ;;  %v875_v54 = vld [vmem:[%s3627_s3 + $0x160] sm:$0xff]  ;;  %v2162_v61 = vpack.c.bf16 %v862_v59, %v861_v58  ;;  %v894_v62 = vld [vmem:[%s3627_s3 + $0x1f8] sm:$0xff] }
  0x2b   :  { %2139 = vmatprep.subr.bf16.mxu0 %v2138_v56  ;;  %2171 = vmatprep.subr.bf16.mxu1 %v2170_v57  ;;  %v2160_v56 = vpack.c.bf16 %v844_v53, %v843_v49  ;;  %v2192_v57 = vpack.c.bf16 %v876_v55, %v875_v54  ;;  %v877_v2 = vld [vmem:[%s3627_s3 + $0x170] sm:$0xff]  ;;  %v911_v3 = vld [vmem:[%s3627_s3 + $0x280] sm:$0xff]  ;;  %v912_v6 = vld [vmem:[%s3627_s3 + $0x288] sm:$0xff] }
  0x2c   :  { %1760 = vmatmul.mubr.msk.f32.gmra.mrb[14].mxu0 %vm176_vm0, %v2555_v50  ;;  %1762 = vmatmul.mubr.msk.f32.gmra.mrb[14].mxu1 %vm176_vm0, %v2555_v50  ;;  %v837_v50 = vld [vmem:[%s3627_s3 + $0x30] sm:$0xff]  ;;  %v943_v7 = vld [vmem:[%s3627_s3 + $0x380] sm:$0xff]  ;;  %v2198_v8 = vpack.c.bf16 %v912_v6, %v911_v3  ;;  %v944_v9 = vld [vmem:[%s3627_s3 + $0x388] sm:$0xff] }
  0x2d   :  { %v2148_v22 = vpack.c.bf16 %v838_v13, %v837_v50  ;;  %v2230_v10 = vpack.c.bf16 %v944_v9, %v943_v7  ;;  %v2898_v13 = vld [vmem:[%s3628_s2] sm:$0xff]  ;;  %v928_v28 = vld [vmem:[%s3627_s3 + $0x308] sm:$0xff]  ;;  %v913_v32 = vld [vmem:[%s3627_s3 + $0x290] sm:$0xff] }
  0x2e   :  { %2141 = vmatpush3.bf16.msra.mxu0 %v2140_v0  ;;  %2173 = vmatpush3.bf16.msra.mxu1 %v2172_v34  ;;  %v846_v0 = vld [vmem:[%s3627_s3 + $0x78] sm:$0xff]  ;;  %v2194_v34 = vpack.c.bf16 %v894_v62, %v893_v60  ;;  %v897_v44 = vld [vmem:[%s3627_s3 + $0x210] sm:$0xff]  ;;  %v916_v58 = vld [vmem:[%s3627_s3 + $0x2a8] sm:$0xff] }
  0x2f   :  { %2143 = vmatprep.subr.bf16.mxu0 %v2142_v4  ;;  %2175 = vmatprep.subr.bf16.mxu1 %v2174_v5  ;;  %v2164_v1 = vpack.c.bf16 %v846_v0, %v845_v63  ;;  %v878_v4 = vld [vmem:[%s3627_s3 + $0x178] sm:$0xff]  ;;  %v947_v62 = vld [vmem:[%s3627_s3 + $0x3a0] sm:$0xff]  ;;  %v948_v63 = vld [vmem:[%s3627_s3 + $0x3a8] sm:$0xff] }
  0x30   :  { %v2196_v5 = vpack.c.bf16 %v878_v4, %v877_v2  ;;  %v914_v33 = vld [vmem:[%s3627_s3 + $0x298] sm:$0xff]  ;;  %v900_v9 = vld [vmem:[%s3627_s3 + $0x228] sm:$0xff] }
  0x31   :  { %v946_v37 = vld [vmem:[%s3627_s3 + $0x398] sm:$0xff] }
  0x32   :  { %2145 = vmatpush3.bf16.msra.mxu0 %v2144_v11  ;;  %2177 = vmatpush3.bf16.msra.mxu1 %v2176_v12  ;;  %v96_v11 = vlaneseq  ;;  %v898_v49 = vld [vmem:[%s3627_s3 + $0x218] sm:$0xff] }
  0x33   :  { %2147 = vmatprep.subr.bf16.mxu0 %v2146_v14  ;;  %2179 = vmatprep.subr.bf16.mxu1 %v2178_v15  ;;  %v2204_v4 = vpack.c.bf16 %v898_v49, %v897_v44  ;;  %v934_v44 = vld [vmem:[%s3627_s3 + $0x338] sm:$0xff]  ;;  %v951_v49 = vld [vmem:[%s3627_s3 + $0x3c0] sm:$0xff] }
  0x34   :  { %v2892_v12 = vshrl.u32 %v96_v11, 7 }
  0x36   :  { %2149 = vmatpush3.bf16.msra.mxu0 %v2148_v22  ;;  %2181 = vmatpush3.bf16.msra.mxu1 %v2180_v23  ;;  %v98_v50 = vsub.s32 0, %v2892_v12  ;;  %v106_v14 = vsub.s32 2, %v2892_v12  ;;  %v102_v15 = vsub.s32 1, %v2892_v12  ;;  %v110_v16 = vsub.s32 3, %v2892_v12  ;;  %v895_v22 = vld [vmem:[%s3627_s3 + $0x200] sm:$0xff] }
  0x37   :  { %2151 = vmatprep.subr.bf16.mxu0 %v2150_v26  ;;  %2183 = vmatprep.subr.bf16.mxu1 %v2182_v27  ;;  %v896_v26 = vld [vmem:[%s3627_s3 + $0x208] sm:$0xff]  ;;  %v927_v27 = vld [vmem:[%s3627_s3 + $0x300] sm:$0xff]  ;;  %v118_v38 = vsub.s32 5, %v2892_v12 }
  0x38   :  { %v99_v17 = vrot.slane %v2898_v13, %v98_v50  ;;  %v107_v18 = vrot.slane %v2898_v13, %v106_v14  ;;  %v103_v19 = vrot.slane %v2898_v13, %v102_v15  ;;  %v111_v20 = vrot.slane %v2898_v13, %v110_v16 }
  0x39   :  { %v2200_v42 = vpack.c.bf16 %v896_v26, %v895_v22  ;;  %v2232_v43 = vpack.c.bf16 %v928_v28, %v927_v27  ;;  %v918_v22 = vld [vmem:[%s3627_s3 + $0x2b8] sm:$0xff] }
  0x3a   :  { %2153 = vmatpush3.bf16.msra.mxu0 %v2152_v35  ;;  %2185 = vmatpush3.bf16.msra.mxu1 %v2184_v36  ;;  %v945_v36 = vld [vmem:[%s3627_s3 + $0x390] sm:$0xff]  ;;  %v950_v26 = vld [vmem:[%s3627_s3 + $0x3b8] sm:$0xff] }
  0x3b   :  { %2155 = vmatprep.subr.bf16.mxu0 %v2154_v39  ;;  %2187 = vmatprep.subr.bf16.mxu1 %v2186_v40  ;;  %v126_v39 = vsub.s32 7, %v2892_v12  ;;  %v2234_v55 = vpack.c.bf16 %v946_v37, %v945_v36  ;;  %v933_v36 = vld [vmem:[%s3627_s3 + $0x330] sm:$0xff] }
  0x3d   :  { %v2973_v2 = vrot.slane %v2898_v13, %v126_v39 }
  0x3e   :  { %2157 = vmatpush3.bf16.msra.mxu0 %v2156_v47  ;;  %2189 = vmatpush3.bf16.msra.mxu1 %v2188_v48  ;;  %v2202_v48 = vpack.c.bf16 %v914_v33, %v913_v32 }
  0x3f   :  { %2159 = vmatprep.subr.bf16.mxu0 %v2158_v51  ;;  %2191 = vmatprep.subr.bf16.mxu1 %v2190_v52  ;;  %v929_v51 = vld [vmem:[%s3627_s3 + $0x310] sm:$0xff] }
  0x42   :  { %2161 = vmatpush3.bf16.msra.mxu0 %v2160_v56  ;;  %2193 = vmatpush3.bf16.msra.mxu1 %v2192_v57  ;;  %v930_v56 = vld [vmem:[%s3627_s3 + $0x318] sm:$0xff]  ;;  %v915_v57 = vld [vmem:[%s3627_s3 + $0x2a0] sm:$0xff] }
  0x43   :  { %2163 = vmatprep.subr.bf16.mxu0 %v2162_v61  ;;  %2195 = vmatprep.subr.bf16.mxu1 %v2194_v34  ;;  %v2236_v6 = vpack.c.bf16 %v930_v56, %v929_v51  ;;  %v2206_v7 = vpack.c.bf16 %v916_v58, %v915_v57  ;;  %v952_v51 = vld [vmem:[%s3627_s3 + $0x3c8] sm:$0xff]  ;;  %v903_v57 = vld [vmem:[%s3627_s3 + $0x240] sm:$0xff] }
  0x44   :  { %v904_v58 = vld [vmem:[%s3627_s3 + $0x248] sm:$0xff] }
  0x46   :  { %2165 = vmatpush3.bf16.msra.mxu0 %v2164_v1  ;;  %2197 = vmatpush3.bf16.msra.mxu1 %v2196_v5  ;;  %v2968_v1 = vrot.slane %v2898_v13, %v118_v38 }
  0x47   :  { %2199 = vmatprep.subr.bf16.mxu0 %v2198_v8  ;;  %2231 = vmatprep.subr.bf16.mxu1 %v2230_v10  ;;  %v899_v8 = vld [vmem:[%s3627_s3 + $0x220] sm:$0xff] }
  0x48   :  { %v931_v10 = vld [vmem:[%s3627_s3 + $0x320] sm:$0xff] }
  0xe0   :  { %v249_v21 = vpop.f32.mrb[0].mxu0 }
  0xe1   :  { %v250_v23 = vadd.f32 %v249_v21, %v99_v17  ;;  %v326_v24 = vpop.f32.mrb[0].mxu1  ;;  %v251_v25 = vpop.f32.mrb[1].mxu0  ;;  %v917_v21 = vld [vmem:[%s3627_s3 + $0x2b0] sm:$0xff] }
  0xe2   :  { %v327_v29 = vadd.f32 %v326_v24, %v107_v18  ;;  %v252_v30 = vadd.f32 %v251_v25, %v103_v19  ;;  %v328_v31 = vpop.f32.mrb[1].mxu1  ;;  %v949_v25 = vld [vmem:[%s3627_s3 + $0x3b0] sm:$0xff]  ;;  %v2210_v33 = vpack.c.bf16 %v918_v22, %v917_v21  ;;  %v923_v22 = vld [vmem:[%s3627_s3 + $0x2e0] sm:$0xff] }
  0xe3   :  { %v329_v35 = vadd.f32 %v328_v31, %v111_v20  ;;  %v799_v46 = vmax.f32 %v250_v23, 0.0  ;;  %v3011_v31 = vld [vmem:[%s3628_s2 + $0x8] sm:$0xff] }
  0xe4   :  { %v801_v40 = vmax.f32 %v327_v29, 0.0  ;;  %v800_v41 = vmax.f32 %v252_v30, 0.0  ;;  %v255_v45 = vpop.f32.mrb[2].mxu0  ;;  %v2208_v29 = vpack.c.bf16 %v900_v9, %v899_v8  ;;  %v901_v30 = vld [vmem:[%s3627_s3 + $0x230] sm:$0xff] }
  0xe5   :  { %v802_v47 = vmax.f32 %v329_v35, 0.0  ;;  %v256_v52 = vadd.f32 %v255_v45, %v99_v17  ;;  %v257_v53 = vpop.f32.mrb[3].mxu0  ;;  %v332_v54 = vpop.f32.mrb[2].mxu1  ;;  %v902_v35 = vld [vmem:[%s3627_s3 + $0x238] sm:$0xff]  ;;  %v919_v45 = vld [vmem:[%s3627_s3 + $0x2c0] sm:$0xff]  ;;  %v905_v8 = vld [vmem:[%s3627_s3 + $0x250] sm:$0xff] }
  0xe6   :  { %1158 = vmatprep.mubr.f32.mxu0 %v800_v41  ;;  %v258_v59 = vadd.f32 %v257_v53, %v103_v19  ;;  %v333_v60 = vadd.f32 %v332_v54, %v107_v18  ;;  %v334_v61 = vpop.f32.mrb[3].mxu1  ;;  %v2238_v19 = vpack.c.bf16 %v948_v63, %v947_v62  ;;  %v139_v53 = vrot.slane %v3011_v31, %v106_v14 }
  0xe7   :  { %1233 = vmatprep.mubr.f32.mxu1 %v802_v47  ;;  %1159 = vmatmul.mubr.f32.vlgmr.msra.gmra.mrb[16].mxu0 %v799_v46  ;;  %v815_v0 = vmax.f32 %v256_v52, 0.0  ;;  %v335_v34 = vadd.f32 %v334_v61, %v111_v20  ;;  %v932_v20 = vld [vmem:[%s3627_s3 + $0x328] sm:$0xff]  ;;  %v131_v52 = vrot.slane %v3011_v31, %v98_v50  ;;  %v2212_v54 = vpack.c.bf16 %v902_v35, %v901_v30  ;;  %v935_v50 = vld [vmem:[%s3627_s3 + $0x340] sm:$0xff]  ;;  %v922_v61 = vld [vmem:[%s3627_s3 + $0x2d8] sm:$0xff] }
  0xe8   :  { %1234 = vmatmul.mubr.f32.vlgmr.msra.gmra.mrb[16].mxu1 %v801_v40  ;;  %2201 = vmatpush3.bf16.msra.mxu0 %v2200_v42  ;;  %v816_v5 = vmax.f32 %v258_v59, 0.0  ;;  %v817_v3 = vmax.f32 %v333_v60, 0.0  ;;  %v2240_v32 = vpack.c.bf16 %v932_v20, %v931_v10  ;;  %v920_v46 = vld [vmem:[%s3627_s3 + $0x2c8] sm:$0xff]  ;;  %v2246_v14 = vpack.c.bf16 %v952_v51, %v951_v49  ;;  %v921_v60 = vld [vmem:[%s3627_s3 + $0x2d0] sm:$0xff]  ;;  %v938_v20 = vld [vmem:[%s3627_s3 + $0x358] sm:$0xff] }
  0xe9   :  { %2233 = vmatpush3.bf16.msra.mxu1 %v2232_v43  ;;  %2203 = vmatprep.subr.bf16.mxu0 %v2202_v48  ;;  %v818_v11 = vmax.f32 %v335_v34, 0.0  ;;  %v2984_v17 = vpop.f32.mrb[4].mxu0  ;;  %v2986_v18 = vpop.f32.mrb[4].mxu1  ;;  %v2242_v43 = vpack.c.bf16 %v950_v26, %v949_v25  ;;  %v2214_v56 = vpack.c.bf16 %v920_v46, %v919_v45  ;;  %v936_v59 = vld [vmem:[%s3627_s3 + $0x348] sm:$0xff]  ;;  %v954_v34 = vld [vmem:[%s3627_s3 + $0x3d8] sm:$0xff]  ;;  %v2218_v10 = vpack.c.bf16 %v922_v61, %v921_v60  ;;  %v939_v49 = vld [vmem:[%s3627_s3 + $0x360] sm:$0xff] }
  0xea   :  { %2235 = vmatprep.subr.bf16.mxu1 %v2234_v55  ;;  %1163 = vmatprep.mubr.f32.mxu0 %v816_v5  ;;  %v405_v23 = vpop.f32.mrb[5].mxu0  ;;  %v482_v24 = vpop.f32.mrb[5].mxu1  ;;  %v2244_v55 = vpack.c.bf16 %v934_v44, %v933_v36  ;;  %v2248_v9 = vpack.c.bf16 %v936_v59, %v935_v50  ;;  %v122_v25 = vsub.s32 6, %v2892_v12  ;;  %v940_v51 = vld [vmem:[%s3627_s3 + $0x368] sm:$0xff]  ;;  %v909_v50 = vld [vmem:[%s3627_s3 + $0x270] sm:$0xff] }
  0xeb   :  { %v406_v27 = vadd.f32 %v405_v23, %v2968_v1  ;;  %v483_v28 = vadd.f32 %v482_v24, %v2973_v2  ;;  %1164 = vmatmul.mubr.f32.gmra.mrb[18].mxu0 %v815_v0  ;;  %1238 = vmatprep.mubr.f32.mxu1 %v818_v11  ;;  %v953_v0 = vld [vmem:[%s3627_s3 + $0x3d0] sm:$0xff]  ;;  %v906_v11 = vld [vmem:[%s3627_s3 + $0x258] sm:$0xff]  ;;  %v924_v23 = vld [vmem:[%s3627_s3 + $0x2e8] sm:$0xff]  ;;  %v114_v24 = vsub.s32 4, %v2892_v12  ;;  %v2256_v61 = vpack.c.bf16 %v940_v51, %v939_v49 }
  0xec   :  { %2205 = vmatpush3.bf16.msra.mxu0 %v2204_v4  ;;  %1239 = vmatmul.mubr.f32.gmra.mrb[18].mxu1 %v817_v3  ;;  %v2250_v21 = vpack.c.bf16 %v954_v34, %v953_v0  ;;  %v2220_v36 = vpack.c.bf16 %v906_v11, %v905_v8  ;;  %v155_v45 = vrot.slane %v3011_v31, %v122_v25  ;;  %v942_v0 = vld [vmem:[%s3627_s3 + $0x378] sm:$0xff]  ;;  %v976_v11 = vld [vmem:[%s3627_s3 + $0x488] sm:$0xff]  ;;  %v959_v49 = vld [vmem:[%s3627_s3 + $0x400] sm:$0xff] }
  0xed   :  { %2237 = vmatpush3.bf16.msra.mxu1 %v2236_v6  ;;  %2207 = vmatprep.subr.bf16.mxu0 %v2206_v7  ;;  %v804_v37 = vmax.f32 %v406_v27, 0.0  ;;  %v806_v40 = vmax.f32 %v483_v28, 0.0  ;;  %v3019_v41 = vpop.f32.mrb[6].mxu0  ;;  %v3021_v42 = vpop.f32.mrb[6].mxu1  ;;  %v2216_v7 = vpack.c.bf16 %v904_v58, %v903_v57  ;;  %v955_v28 = vld [vmem:[%s3627_s3 + $0x3e0] sm:$0xff]  ;;  %v147_v44 = vrot.slane %v3011_v31, %v114_v24  ;;  %v962_v12 = vld [vmem:[%s3627_s3 + $0x418] sm:$0xff] }
  0xee   :  { %2239 = vmatprep.subr.bf16.mxu1 %v2238_v19  ;;  %v3032_v47 = vpop.f32.mrb[7].mxu0  ;;  %v3034_v48 = vpop.f32.mrb[7].mxu1  ;;  %v937_v19 = vld [vmem:[%s3627_s3 + $0x350] sm:$0xff]  ;;  %v2222_v46 = vpack.c.bf16 %v924_v23, %v923_v22  ;;  %v115_v57 = vrot.slane %v2898_v13, %v114_v24  ;;  %v123_v60 = vrot.slane %v2898_v13, %v122_v25  ;;  %v1007_v25 = vld [vmem:[%s3627_s3 + $0x580] sm:$0xff] }
  0xef   :  { %1308 = vmatprep.mubr.f32.mxu0 %v804_v37  ;;  %1383 = vmatprep.mubr.f32.mxu1 %v806_v40  ;;  %v2252_v37 = vpack.c.bf16 %v938_v20, %v937_v19  ;;  %v907_v40 = vld [vmem:[%s3627_s3 + $0x260] sm:$0xff] }
  0xf0   :  { %2209 = vmatpush3.bf16.msra.mxu0 %v2208_v29  ;;  %v956_v29 = vld [vmem:[%s3627_s3 + $0x3e8] sm:$0xff]  ;;  %v404_v22 = vadd.f32 %v2984_v17, %v115_v57 }
  0xf1   :  { %2241 = vmatpush3.bf16.msra.mxu1 %v2240_v32  ;;  %2211 = vmatprep.subr.bf16.mxu0 %v2210_v33 }
  0xf2   :  { %2243 = vmatprep.subr.bf16.mxu1 %v2242_v43  ;;  %v557_v62 = vpop.f32.mrb[8].mxu0  ;;  %v634_v63 = vpop.f32.mrb[8].mxu1  ;;  %v908_v43 = vld [vmem:[%s3627_s3 + $0x268] sm:$0xff] }
  0xf3   :  { %v3072_v4 = vadd.f32 %v557_v62, %v131_v52  ;;  %v3074_v5 = vadd.f32 %v634_v63, %v139_v53  ;;  %v3076_v3 = vpop.f32.mrb[9].mxu0  ;;  %v3078_v6 = vpop.f32.mrb[9].mxu1  ;;  %v2224_v58 = vpack.c.bf16 %v908_v43, %v907_v40  ;;  %v910_v62 = vld [vmem:[%s3627_s3 + $0x278] sm:$0xff]  ;;  %v941_v63 = vld [vmem:[%s3627_s3 + $0x370] sm:$0xff] }
  0xf4   :  { %2213 = vmatpush3.bf16.msra.mxu0 %v2212_v54  ;;  %v2254_v54 = vpack.c.bf16 %v956_v29, %v955_v28  ;;  %v2228_v23 = vpack.c.bf16 %v910_v62, %v909_v50  ;;  %v2260_v24 = vpack.c.bf16 %v942_v0, %v941_v63  ;;  %v481_v29 = vadd.f32 %v2986_v18, %v123_v60  ;;  %v960_v18 = vld [vmem:[%s3627_s3 + $0x408] sm:$0xff] }
  0xf5   :  { %2245 = vmatpush3.bf16.msra.mxu1 %v2244_v55  ;;  %2215 = vmatprep.subr.bf16.mxu0 %v2214_v56  ;;  %v925_v55 = vld [vmem:[%s3627_s3 + $0x2f0] sm:$0xff]  ;;  %v926_v56 = vld [vmem:[%s3627_s3 + $0x2f8] sm:$0xff] }
  0xf6   :  { %2247 = vmatprep.subr.bf16.mxu1 %v2246_v14  ;;  %v563_v26 = vpop.f32.mrb[10].mxu0  ;;  %v640_v27 = vpop.f32.mrb[10].mxu1  ;;  %v2226_v13 = vpack.c.bf16 %v926_v56, %v925_v55  ;;  %v410_v55 = vadd.f32 %v3019_v41, %v115_v57  ;;  %v489_v56 = vadd.f32 %v3034_v48, %v2973_v2  ;;  %v805_v41 = vmax.f32 %v481_v29, 0.0  ;;  %v1013_v29 = vld [vmem:[%s3627_s3 + $0x5b0] sm:$0xff] }
  0xf7   :  { %v3106_v30 = vadd.f32 %v563_v26, %v131_v52  ;;  %v3108_v32 = vpop.f32.mrb[11].mxu0  ;;  %v3110_v33 = vadd.f32 %v640_v27, %v139_v53  ;;  %v3112_v35 = vpop.f32.mrb[11].mxu1  ;;  %v151_v52 = vrot.slane %v3011_v31, %v118_v38  ;;  %v159_v53 = vrot.slane %v3011_v31, %v126_v39  ;;  %v957_v38 = vld [vmem:[%s3627_s3 + $0x3f0] sm:$0xff]  ;;  %v958_v39 = vld [vmem:[%s3627_s3 + $0x3f8] sm:$0xff]  ;;  %v1008_v26 = vld [vmem:[%s3627_s3 + $0x588] sm:$0xff] }
  0xf8   :  { %2217 = vmatpush3.bf16.msra.mxu0 %v2216_v7  ;;  %v487_v2 = vadd.f32 %v3021_v42, %v123_v60  ;;  %v2264_v48 = vpack.c.bf16 %v960_v18, %v959_v49  ;;  %v979_v60 = vld [vmem:[%s3627_s3 + $0x4a0] sm:$0xff]  ;;  %v819_v63 = vmax.f32 %v410_v55, 0.0  ;;  %v822_v0 = vmax.f32 %v489_v56, 0.0  ;;  %v965_v18 = vld [vmem:[%s3627_s3 + $0x430] sm:$0xff]  ;;  %v984_v55 = vld [vmem:[%s3627_s3 + $0x4c8] sm:$0xff] }
  0xf9   :  { %2249 = vmatpush3.bf16.msra.mxu1 %v2248_v9  ;;  %2219 = vmatprep.subr.bf16.mxu0 %v2218_v10  ;;  %v975_v10 = vld [vmem:[%s3627_s3 + $0x480] sm:$0xff] }
  0xfa   :  { %2251 = vmatprep.subr.bf16.mxu1 %v2250_v21  ;;  %v2258_v21 = vpack.c.bf16 %v958_v39, %v957_v38  ;;  %v1009_v38 = vld [vmem:[%s3627_s3 + $0x590] sm:$0xff]  ;;  %v1010_v39 = vld [vmem:[%s3627_s3 + $0x598] sm:$0xff]  ;;  %v1015_v56 = vld [vmem:[%s3627_s3 + $0x5c0] sm:$0xff] }
  0xfb   :  { %v711_v14 = vpop.f32.mrb[12].mxu0  ;;  %v788_v59 = vpop.f32.mrb[12].mxu1  ;;  %v2298_v42 = vpack.c.bf16 %v1010_v39, %v1009_v38 }
  0xfc   :  { %2221 = vmatpush3.bf16.msra.mxu0 %v2220_v36  ;;  %v3160_v34 = vadd.f32 %v711_v14, %v147_v44  ;;  %v713_v7 = vpop.f32.mrb[13].mxu0  ;;  %v3162_v8 = vadd.f32 %v788_v59, %v155_v45  ;;  %v790_v9 = vpop.f32.mrb[13].mxu1  ;;  %v2262_v36 = vpack.c.bf16 %v976_v11, %v975_v10  ;;  %v961_v14 = vld [vmem:[%s3627_s3 + $0x410] sm:$0xff]  ;;  %v994_v59 = vld [vmem:[%s3627_s3 + $0x518] sm:$0xff]  ;;  %v821_v10 = vmax.f32 %v487_v2, 0.0  ;;  %v967_v2 = vld [vmem:[%s3627_s3 + $0x440] sm:$0xff] }
  0xfd   :  { %2253 = vmatpush3.bf16.msra.mxu1 %v2252_v37  ;;  %2223 = vmatprep.subr.bf16.mxu0 %v2222_v46  ;;  %v3170_v19 = vadd.f32 %v713_v7, %v151_v52  ;;  %v3172_v20 = vadd.f32 %v790_v9, %v159_v53  ;;  %v412_v46 = vadd.f32 %v3032_v47, %v2968_v1  ;;  %v992_v1 = vld [vmem:[%s3627_s3 + $0x508] sm:$0xff]  ;;  %v977_v47 = vld [vmem:[%s3627_s3 + $0x490] sm:$0xff]  ;;  %v1011_v7 = vld [vmem:[%s3627_s3 + $0x5a0] sm:$0xff] }
  0xfe   :  { %2255 = vmatprep.subr.bf16.mxu1 %v2254_v54  ;;  %v991_v54 = vld [vmem:[%s3627_s3 + $0x500] sm:$0xff]  ;;  %v1012_v9 = vld [vmem:[%s3627_s3 + $0x5a8] sm:$0xff]  ;;  %v2268_v11 = vpack.c.bf16 %v962_v12, %v961_v14  ;;  %v985_v12 = vld [vmem:[%s3627_s3 + $0x4d0] sm:$0xff] }
  0xff   :  { %v717_v27 = vpop.f32.mrb[14].mxu0  ;;  %v794_v28 = vpop.f32.mrb[14].mxu1  ;;  %v820_v57 = vmax.f32 %v412_v46, 0.0  ;;  %v2296_v50 = vpack.c.bf16 %v992_v1, %v991_v54  ;;  %v997_v54 = vld [vmem:[%s3627_s3 + $0x530] sm:$0xff]  ;;  %v1000_v14 = vld [vmem:[%s3627_s3 + $0x548] sm:$0xff] }
 0x100   :  { %2225 = vmatpush3.bf16.msra.mxu0 %v2224_v58  ;;  %v3182_v37 = vadd.f32 %v717_v27, %v147_v44  ;;  %v719_v40 = vpop.f32.mrb[15].mxu0  ;;  %v3184_v17 = vadd.f32 %v794_v28, %v155_v45  ;;  %v796_v43 = vpop.f32.mrb[15].mxu1  ;;  %v2294_v45 = vpack.c.bf16 %v1008_v26, %v1007_v25  ;;  %v978_v58 = vld [vmem:[%s3627_s3 + $0x498] sm:$0xff]  ;;  %v996_v25 = vld [vmem:[%s3627_s3 + $0x528] sm:$0xff]  ;;  %v981_v26 = vld [vmem:[%s3627_s3 + $0x4b0] sm:$0xff] }
 0x101   :  { %2257 = vmatpush3.bf16.msra.mxu1 %v2256_v61  ;;  %2227 = vmatprep.subr.bf16.mxu0 %v2226_v13  ;;  %v3194_v51 = vadd.f32 %v719_v40, %v151_v52  ;;  %v3196_v44 = vadd.f32 %v796_v43, %v159_v53  ;;  %v3210_v52 = vrot.slane %v3011_v31, %v102_v15  ;;  %v803_v53 = vmax.f32 %v404_v22, 0.0  ;;  %v980_v61 = vld [vmem:[%s3627_s3 + $0x4a8] sm:$0xff]  ;;  %v963_v22 = vld [vmem:[%s3627_s3 + $0x420] sm:$0xff]  ;;  %v982_v27 = vld [vmem:[%s3627_s3 + $0x4b8] sm:$0xff] }
 0x102   :  { %2259 = vmatprep.subr.bf16.mxu1 %v2258_v21  ;;  %v3227_v15 = vrot.slane %v3011_v31, %v110_v16  ;;  %v993_v16 = vld [vmem:[%s3627_s3 + $0x510] sm:$0xff]  ;;  %v2266_v31 = vpack.c.bf16 %v978_v58, %v977_v47  ;;  %v2270_v21 = vpack.c.bf16 %v980_v61, %v979_v60  ;;  %v2274_v49 = vpack.c.bf16 %v982_v27, %v981_v26  ;;  %v998_v47 = vld [vmem:[%s3627_s3 + $0x538] sm:$0xff]  ;;  %v1016_v58 = vld [vmem:[%s3627_s3 + $0x5c8] sm:$0xff] }
 0x103   :  { %v560_v62 = vadd.f32 %v3076_v3, %v3210_v52  ;;  %v2300_v3 = vpack.c.bf16 %v994_v59, %v993_v16  ;;  %v2308_v39 = vpack.c.bf16 %v998_v47, %v997_v54  ;;  %v986_v16 = vld [vmem:[%s3627_s3 + $0x4d8] sm:$0xff]  ;;  %v1004_v27 = vld [vmem:[%s3627_s3 + $0x568] sm:$0xff]  ;;  %v1005_v54 = vld [vmem:[%s3627_s3 + $0x570] sm:$0xff] }
 0x104   :  { %2229 = vmatpush3.bf16.msra.mxu0 %v2228_v23  ;;  %v637_v13 = vadd.f32 %v3078_v6, %v3227_v15  ;;  %v964_v23 = vld [vmem:[%s3627_s3 + $0x428] sm:$0xff]  ;;  %v995_v6 = vld [vmem:[%s3627_s3 + $0x520] sm:$0xff]  ;;  %v2282_v61 = vpack.c.bf16 %v986_v16, %v985_v12  ;;  %v1006_v47 = vld [vmem:[%s3627_s3 + $0x578] sm:$0xff]  ;;  %v643_v16 = vadd.f32 %v3112_v35, %v3227_v15 }
 0x105   :  { %2261 = vmatpush3.bf16.msra.mxu1 %v2260_v24  ;;  %2263 = vmatprep.subr.bf16.mxu0 %v2262_v36  ;;  %v2302_v24 = vpack.c.bf16 %v1012_v9, %v1011_v7  ;;  %v808_v28 = vmax.f32 %v560_v62, 0.0  ;;  %v1014_v36 = vld [vmem:[%s3627_s3 + $0x5b8] sm:$0xff]  ;;  %v2272_v43 = vpack.c.bf16 %v964_v23, %v963_v22  ;;  %v2304_v46 = vpack.c.bf16 %v996_v25, %v995_v6  ;;  %v969_v62 = vld [vmem:[%s3627_s3 + $0x450] sm:$0xff]  ;;  %v971_v6 = vld [vmem:[%s3627_s3 + $0x460] sm:$0xff] }
 0x106   :  { %2295 = vmatprep.subr.bf16.mxu1 %v2294_v45  ;;  %v810_v40 = vmax.f32 %v637_v13, 0.0  ;;  %v966_v45 = vld [vmem:[%s3627_s3 + $0x438] sm:$0xff]  ;;  %v2306_v1 = vpack.c.bf16 %v1014_v36, %v1013_v29  ;;  %v987_v13 = vld [vmem:[%s3627_s3 + $0x4e0] sm:$0xff]  ;;  %v1021_v36 = vld [vmem:[%s3627_s3 + $0x5f0] sm:$0xff] }
 0x107   :  { %1309 = vmatmul.mubr.f32.vlgmr.msra.gmra.mrb[20].mxu0 %v803_v53  ;;  %v983_v53 = vld [vmem:[%s3627_s3 + $0x4c0] sm:$0xff]  ;;  %v2276_v38 = vpack.c.bf16 %v966_v45, %v965_v18  ;;  %v1002_v9 = vld [vmem:[%s3627_s3 + $0x558] sm:$0xff]  ;;  %v973_v18 = vld [vmem:[%s3627_s3 + $0x470] sm:$0xff] }
 0x108   :  { %1384 = vmatmul.mubr.f32.vlgmr.msra.gmra.mrb[20].mxu1 %v805_v41  ;;  %2265 = vmatpush3.bf16.msra.mxu0 %v2264_v48  ;;  %v2278_v41 = vpack.c.bf16 %v984_v55, %v983_v53  ;;  %v968_v48 = vld [vmem:[%s3627_s3 + $0x448] sm:$0xff]  ;;  %v1003_v25 = vld [vmem:[%s3627_s3 + $0x560] sm:$0xff]  ;;  %v990_v29 = vld [vmem:[%s3627_s3 + $0x4f8] sm:$0xff] }
 0x109   :  { %2297 = vmatpush3.bf16.msra.mxu1 %v2296_v50  ;;  %1313 = vmatprep.mubr.f32.mxu0 %v820_v57  ;;  %v999_v57 = vld [vmem:[%s3627_s3 + $0x540] sm:$0xff]  ;;  %v2310_v50 = vpack.c.bf16 %v1016_v58, %v1015_v56  ;;  %v2280_v59 = vpack.c.bf16 %v968_v48, %v967_v2  ;;  %v974_v45 = vld [vmem:[%s3627_s3 + $0x478] sm:$0xff]  ;;  %v1040_v55 = vld [vmem:[%s3627_s3 + $0x688] sm:$0xff] }
 0x10a   :  { %2267 = vmatprep.subr.bf16.mxu0 %v2266_v31  ;;  %2299 = vmatprep.subr.bf16.mxu1 %v2298_v42  ;;  %v1017_v31 = vld [vmem:[%s3627_s3 + $0x5d0] sm:$0xff]  ;;  %v1018_v42 = vld [vmem:[%s3627_s3 + $0x5d8] sm:$0xff]  ;;  %v2312_v60 = vpack.c.bf16 %v1000_v14, %v999_v57  ;;  %v1039_v53 = vld [vmem:[%s3627_s3 + $0x680] sm:$0xff] }
 0x10b   :  { %1314 = vmatmul.mubr.f32.gmra.mrb[22].mxu0 %v819_v63  ;;  %1388 = vmatprep.mubr.f32.mxu1 %v822_v0  ;;  %v970_v63 = vld [vmem:[%s3627_s3 + $0x458] sm:$0xff]  ;;  %v1001_v0 = vld [vmem:[%s3627_s3 + $0x550] sm:$0xff]  ;;  %v2314_v7 = vpack.c.bf16 %v1018_v42, %v1017_v31  ;;  %v1071_v56 = vld [vmem:[%s3627_s3 + $0x780] sm:$0xff]  ;;  %v2326_v2 = vpack.c.bf16 %v1040_v55, %v1039_v53 }
 0x10c   :  { %2269 = vmatpush3.bf16.msra.mxu0 %v2268_v11  ;;  %1389 = vmatmul.mubr.f32.gmra.mrb[22].mxu1 %v821_v10  ;;  %v988_v10 = vld [vmem:[%s3627_s3 + $0x4e8] sm:$0xff]  ;;  %v1019_v11 = vld [vmem:[%s3627_s3 + $0x5e0] sm:$0xff]  ;;  %v2316_v22 = vpack.c.bf16 %v1002_v9, %v1001_v0  ;;  %v1042_v31 = vld [vmem:[%s3627_s3 + $0x698] sm:$0xff] }
 0x10d   :  { %2301 = vmatpush3.bf16.msra.mxu1 %v2300_v3  ;;  %2271 = vmatprep.subr.bf16.mxu0 %v2270_v21  ;;  %v1020_v3 = vld [vmem:[%s3627_s3 + $0x5e8] sm:$0xff]  ;;  %v2284_v21 = vpack.c.bf16 %v970_v63, %v969_v62  ;;  %v2286_v23 = vpack.c.bf16 %v988_v10, %v987_v13  ;;  %v1023_v48 = vld [vmem:[%s3627_s3 + $0x600] sm:$0xff]  ;;  %v1073_v42 = vld [vmem:[%s3627_s3 + $0x790] sm:$0xff]  ;;  %v823_v10 = vmax.f32 %v3106_v30, 0.0 }
 0x10e   :  { %2303 = vmatprep.subr.bf16.mxu1 %v2302_v24  ;;  %1458 = vmatprep.mubr.f32.mxu0 %v808_v28  ;;  %v972_v24 = vld [vmem:[%s3627_s3 + $0x468] sm:$0xff]  ;;  %v2318_v26 = vpack.c.bf16 %v1020_v3, %v1019_v11  ;;  %v989_v28 = vld [vmem:[%s3627_s3 + $0x4f0] sm:$0xff]  ;;  %v1055_v14 = vld [vmem:[%s3627_s3 + $0x700] sm:$0xff]  ;;  %v826_v11 = vmax.f32 %v643_v16, 0.0 }
 0x10f   :  { %1533 = vmatprep.mubr.f32.mxu1 %v810_v40  ;;  %v1022_v40 = vld [vmem:[%s3627_s3 + $0x5f8] sm:$0xff]  ;;  %v1072_v58 = vld [vmem:[%s3627_s3 + $0x788] sm:$0xff]  ;;  %v1025_v15 = vld [vmem:[%s3627_s3 + $0x610] sm:$0xff] }
 0x110   :  { %2273 = vmatpush3.bf16.msra.mxu0 %v2272_v43  ;;  %v2288_v43 = vpack.c.bf16 %v972_v24, %v971_v6  ;;  %v1024_v57 = vld [vmem:[%s3627_s3 + $0x608] sm:$0xff]  ;;  %v1026_v62 = vld [vmem:[%s3627_s3 + $0x618] sm:$0xff]  ;;  %v1057_v63 = vld [vmem:[%s3627_s3 + $0x710] sm:$0xff] }
 0x111   :  { %2305 = vmatpush3.bf16.msra.mxu1 %v2304_v46  ;;  %2275 = vmatprep.subr.bf16.mxu0 %v2274_v49  ;;  %v2320_v46 = vpack.c.bf16 %v1004_v27, %v1003_v25  ;;  %v2290_v49 = vpack.c.bf16 %v990_v29, %v989_v28  ;;  %v1056_v12 = vld [vmem:[%s3627_s3 + $0x708] sm:$0xff]  ;;  %v1043_v9 = vld [vmem:[%s3627_s3 + $0x6a0] sm:$0xff]  ;;  %v1045_v28 = vld [vmem:[%s3627_s3 + $0x6b0] sm:$0xff] }
 0x112   :  { %2307 = vmatprep.subr.bf16.mxu1 %v2306_v1  ;;  %v2322_v1 = vpack.c.bf16 %v1022_v40, %v1021_v36  ;;  %v2360_v35 = vpack.c.bf16 %v1056_v12, %v1055_v14  ;;  %v1044_v13 = vld [vmem:[%s3627_s3 + $0x6a8] sm:$0xff]  ;;  %v1075_v3 = vld [vmem:[%s3627_s3 + $0x7a0] sm:$0xff]  ;;  %v1046_v29 = vld [vmem:[%s3627_s3 + $0x6b8] sm:$0xff]  ;;  %v812_v36 = vmax.f32 %v3170_v19, 0.0 }
 0x113   :  { %v2334_v24 = vpack.c.bf16 %v1044_v13, %v1043_v9  ;;  %v1027_v30 = vld [vmem:[%s3627_s3 + $0x620] sm:$0xff]  ;;  %v1028_v25 = vld [vmem:[%s3627_s3 + $0x628] sm:$0xff]  ;;  %v1077_v40 = vld [vmem:[%s3627_s3 + $0x7b0] sm:$0xff] }
 0x114   :  { %2277 = vmatpush3.bf16.msra.mxu0 %v2276_v38  ;;  %v2292_v38 = vpack.c.bf16 %v974_v45, %v973_v18  ;;  %v1060_v27 = vld [vmem:[%s3627_s3 + $0x728] sm:$0xff]  ;;  %v2338_v45 = vpack.c.bf16 %v1046_v29, %v1045_v28  ;;  %v1029_v19 = vld [vmem:[%s3627_s3 + $0x630] sm:$0xff]  ;;  %v1047_v53 = vld [vmem:[%s3627_s3 + $0x6c0] sm:$0xff] }
 0x115   :  { %2309 = vmatpush3.bf16.msra.mxu1 %v2308_v39  ;;  %2279 = vmatprep.subr.bf16.mxu0 %v2278_v41  ;;  %v2324_v39 = vpack.c.bf16 %v1006_v47, %v1005_v54  ;;  %v566_v41 = vadd.f32 %v3108_v32, %v3210_v52  ;;  %v1041_v32 = vld [vmem:[%s3627_s3 + $0x690] sm:$0xff]  ;;  %v807_v52 = vmax.f32 %v3072_v4, 0.0  ;;  %v1030_v54 = vld [vmem:[%s3627_s3 + $0x638] sm:$0xff]  ;;  %v1048_v55 = vld [vmem:[%s3627_s3 + $0x6c8] sm:$0xff] }
 0x116   :  { %2311 = vmatprep.subr.bf16.mxu1 %v2310_v50  ;;  %v2358_v50 = vpack.c.bf16 %v1072_v58, %v1071_v56  ;;  %v1062_v47 = vld [vmem:[%s3627_s3 + $0x738] sm:$0xff]  ;;  %v1079_v56 = vld [vmem:[%s3627_s3 + $0x7c0] sm:$0xff]  ;;  %v1080_v58 = vld [vmem:[%s3627_s3 + $0x7c8] sm:$0xff] }
 0x117   :  { %v824_v4 = vmax.f32 %v566_v41, 0.0  ;;  %v2342_v41 = vpack.c.bf16 %v1048_v55, %v1047_v53  ;;  %v1064_v14 = vld [vmem:[%s3627_s3 + $0x748] sm:$0xff]  ;;  %v1049_v12 = vld [vmem:[%s3627_s3 + $0x6d0] sm:$0xff]  ;;  %v1082_v16 = vld [vmem:[%s3627_s3 + $0x7d8] sm:$0xff] }
 0x118   :  { %2281 = vmatpush3.bf16.msra.mxu0 %v2280_v59  ;;  %v1074_v59 = vld [vmem:[%s3627_s3 + $0x798] sm:$0xff] }
 0x119   :  { %2313 = vmatpush3.bf16.msra.mxu1 %v2312_v60  ;;  %2283 = vmatprep.subr.bf16.mxu0 %v2282_v61  ;;  %v809_v60 = vmax.f32 %v3074_v5, 0.0  ;;  %v2328_v61 = vpack.c.bf16 %v1024_v57, %v1023_v48  ;;  %v2330_v5 = vpack.c.bf16 %v1042_v31, %v1041_v32  ;;  %v2362_v0 = vpack.c.bf16 %v1074_v59, %v1073_v42  ;;  %v1032_v48 = vld [vmem:[%s3627_s3 + $0x648] sm:$0xff]  ;;  %v1063_v57 = vld [vmem:[%s3627_s3 + $0x740] sm:$0xff]  ;;  %v1050_v32 = vld [vmem:[%s3627_s3 + $0x6d8] sm:$0xff] }
 0x11a   :  { %2315 = vmatprep.subr.bf16.mxu1 %v2314_v7  ;;  %v1058_v7 = vld [vmem:[%s3627_s3 + $0x718] sm:$0xff]  ;;  %v2376_v42 = vpack.c.bf16 %v1064_v14, %v1063_v57  ;;  %v2346_v59 = vpack.c.bf16 %v1050_v32, %v1049_v12 }
 0x11b   :  { %v2364_v6 = vpack.c.bf16 %v1058_v7, %v1057_v63  ;;  %v1052_v63 = vld [vmem:[%s3627_s3 + $0x6e8] sm:$0xff]  ;;  %v1038_v28 = vld [vmem:[%s3627_s3 + $0x678] sm:$0xff] }
 0x11c   :  { %2285 = vmatpush3.bf16.msra.mxu0 %v2284_v21  ;;  %v1076_v21 = vld [vmem:[%s3627_s3 + $0x7a8] sm:$0xff] }
 0x11d   :  { %2317 = vmatpush3.bf16.msra.mxu1 %v2316_v22  ;;  %2287 = vmatprep.subr.bf16.mxu0 %v2286_v23  ;;  %v825_v22 = vmax.f32 %v3110_v33, 0.0  ;;  %v2332_v23 = vpack.c.bf16 %v1026_v62, %v1025_v15  ;;  %v2366_v33 = vpack.c.bf16 %v1076_v21, %v1075_v3  ;;  %v1066_v15 = vld [vmem:[%s3627_s3 + $0x758] sm:$0xff]  ;;  %v1051_v62 = vld [vmem:[%s3627_s3 + $0x6e0] sm:$0xff] }
 0x11e   :  { %2319 = vmatprep.subr.bf16.mxu1 %v2318_v26  ;;  %v1059_v26 = vld [vmem:[%s3627_s3 + $0x720] sm:$0xff]  ;;  %v2350_v13 = vpack.c.bf16 %v1052_v63, %v1051_v62 }
 0x11f   :  { %v2368_v18 = vpack.c.bf16 %v1060_v27, %v1059_v26  ;;  %v1067_v3 = vld [vmem:[%s3627_s3 + $0x760] sm:$0xff]  ;;  %v1037_v27 = vld [vmem:[%s3627_s3 + $0x670] sm:$0xff] }
 0x120   :  { %2289 = vmatpush3.bf16.msra.mxu0 %v2288_v43  ;;  %v1078_v43 = vld [vmem:[%s3627_s3 + $0x7b8] sm:$0xff] }
 0x121   :  { %2321 = vmatpush3.bf16.msra.mxu1 %v2320_v46  ;;  %2291 = vmatprep.subr.bf16.mxu0 %v2290_v49  ;;  %v814_v46 = vmax.f32 %v3172_v20, 0.0  ;;  %v2336_v49 = vpack.c.bf16 %v1028_v25, %v1027_v30  ;;  %v2370_v20 = vpack.c.bf16 %v1078_v43, %v1077_v40  ;;  %v1086_v30 = vld [vmem:[%s3627_s3 + $0x7f8] sm:$0xff]  ;;  %v2356_v43 = vpack.c.bf16 %v1038_v28, %v1037_v27 }
 0x122   :  { %2323 = vmatprep.subr.bf16.mxu1 %v2322_v1  ;;  %v1061_v1 = vld [vmem:[%s3627_s3 + $0x730] sm:$0xff]  ;;  %v1070_v40 = vld [vmem:[%s3627_s3 + $0x778] sm:$0xff] }
 0x124   :  { %2293 = vmatpush3.bf16.msra.mxu0 %v2292_v38  ;;  %v2340_v38 = vpack.c.bf16 %v1030_v54, %v1029_v19  ;;  %v830_v19 = vmax.f32 %v3196_v44, 0.0  ;;  %v829_v54 = vmax.f32 %v3184_v17, 0.0 }
 0x125   :  { %2325 = vmatpush3.bf16.msra.mxu1 %v2324_v39  ;;  %2327 = vmatprep.subr.bf16.mxu0 %v2326_v2  ;;  %v2372_v39 = vpack.c.bf16 %v1062_v47, %v1061_v1  ;;  %v1031_v2 = vld [vmem:[%s3627_s3 + $0x640] sm:$0xff]  ;;  %v827_v1 = vmax.f32 %v3182_v37, 0.0 }
 0x126   :  { %2359 = vmatprep.subr.bf16.mxu1 %v2358_v50  ;;  %v2374_v50 = vpack.c.bf16 %v1080_v58, %v1079_v56  ;;  %v2344_v31 = vpack.c.bf16 %v1032_v48, %v1031_v2 }
 0x127   :  { %1459 = vmatmul.mubr.f32.vlgmr.msra.gmra.mrb[24].mxu0 %v807_v52  ;;  %v1081_v52 = vld [vmem:[%s3627_s3 + $0x7d0] sm:$0xff] }
 0x128   :  { %1534 = vmatmul.mubr.f32.vlgmr.msra.gmra.mrb[24].mxu1 %v809_v60  ;;  %2329 = vmatpush3.bf16.msra.mxu0 %v2328_v61  ;;  %v1033_v60 = vld [vmem:[%s3627_s3 + $0x650] sm:$0xff]  ;;  %v1034_v61 = vld [vmem:[%s3627_s3 + $0x658] sm:$0xff] }
 0x129   :  { %2361 = vmatpush3.bf16.msra.mxu1 %v2360_v35  ;;  %1463 = vmatprep.mubr.f32.mxu0 %v824_v4  ;;  %v1065_v4 = vld [vmem:[%s3627_s3 + $0x750] sm:$0xff]  ;;  %v2378_v35 = vpack.c.bf16 %v1082_v16, %v1081_v52  ;;  %v2348_v7 = vpack.c.bf16 %v1034_v61, %v1033_v60 }
 0x12a   :  { %2331 = vmatprep.subr.bf16.mxu0 %v2330_v5  ;;  %2363 = vmatprep.subr.bf16.mxu1 %v2362_v0  ;;  %v1083_v5 = vld [vmem:[%s3627_s3 + $0x7e0] sm:$0xff]  ;;  %v1084_v0 = vld [vmem:[%s3627_s3 + $0x7e8] sm:$0xff]  ;;  %v2380_v9 = vpack.c.bf16 %v1066_v15, %v1065_v4 }
 0x12b   :  { %1464 = vmatmul.mubr.f32.gmra.mrb[26].mxu0 %v823_v10  ;;  %1538 = vmatprep.mubr.f32.mxu1 %v826_v11  ;;  %v1035_v10 = vld [vmem:[%s3627_s3 + $0x660] sm:$0xff]  ;;  %v1036_v11 = vld [vmem:[%s3627_s3 + $0x668] sm:$0xff]  ;;  %v2382_v21 = vpack.c.bf16 %v1084_v0, %v1083_v5 }
 0x12c   :  { %2333 = vmatpush3.bf16.msra.mxu0 %v2332_v23  ;;  %1539 = vmatmul.mubr.f32.gmra.mrb[26].mxu1 %v825_v22  ;;  %v1068_v22 = vld [vmem:[%s3627_s3 + $0x768] sm:$0xff]  ;;  %v1053_v23 = vld [vmem:[%s3627_s3 + $0x6f0] sm:$0xff]  ;;  %v2352_v25 = vpack.c.bf16 %v1036_v11, %v1035_v10 }
 0x12d   :  { %2365 = vmatpush3.bf16.msra.mxu1 %v2364_v6  ;;  %2335 = vmatprep.subr.bf16.mxu0 %v2334_v24  ;;  %v1054_v6 = vld [vmem:[%s3627_s3 + $0x6f8] sm:$0xff]  ;;  %v1085_v24 = vld [vmem:[%s3627_s3 + $0x7f0] sm:$0xff]  ;;  %v2384_v26 = vpack.c.bf16 %v1068_v22, %v1067_v3 }
 0x12e   :  { %2367 = vmatprep.subr.bf16.mxu1 %v2366_v33  ;;  %1608 = vmatprep.mubr.f32.mxu0 %v812_v36  ;;  %v2354_v33 = vpack.c.bf16 %v1054_v6, %v1053_v23  ;;  %v2386_v29 = vpack.c.bf16 %v1086_v30, %v1085_v24  ;;  %v1069_v36 = vld [vmem:[%s3627_s3 + $0x770] sm:$0xff] }
 0x12f   :  { %1683 = vmatprep.mubr.f32.mxu1 %v814_v46  ;;  %v2388_v46 = vpack.c.bf16 %v1070_v40, %v1069_v36 }
 0x130   :  { %2337 = vmatpush3.bf16.msra.mxu0 %v2336_v49  ;;  %v813_v49 = vmax.f32 %v3162_v8, 0.0 }
 0x131   :  { %2369 = vmatpush3.bf16.msra.mxu1 %v2368_v18  ;;  %2339 = vmatprep.subr.bf16.mxu0 %v2338_v45  ;;  %v828_v18 = vmax.f32 %v3194_v51, 0.0  ;;  %v811_v45 = vmax.f32 %v3160_v34, 0.0  ;;  %v1763_v51 = vld [vmem:[%s3629_s4] ss:$0 sm:$0xff] }
 0x132   :  { %2371 = vmatprep.subr.bf16.mxu1 %v2370_v20 }
 0x134   :  { %2341 = vmatpush3.bf16.msra.mxu0 %v2340_v38 }
 0x135   :  { %2373 = vmatpush3.bf16.msra.mxu1 %v2372_v39  ;;  %2343 = vmatprep.subr.bf16.mxu0 %v2342_v41 }
 0x136   :  { %2375 = vmatprep.subr.bf16.mxu1 %v2374_v50 }
 0x138   :  { %2345 = vmatpush3.bf16.msra.mxu0 %v2344_v31 }
 0x139   :  { %2377 = vmatpush3.bf16.msra.mxu1 %v2376_v42  ;;  %2347 = vmatprep.subr.bf16.mxu0 %v2346_v59 }
 0x13a   :  { %2379 = vmatprep.subr.bf16.mxu1 %v2378_v35 }
 0x13c   :  { %2349 = vmatpush3.bf16.msra.mxu0 %v2348_v7 }
 0x13d   :  { %2381 = vmatpush3.bf16.msra.mxu1 %v2380_v9  ;;  %2351 = vmatprep.subr.bf16.mxu0 %v2350_v13 }
 0x13e   :  { %2383 = vmatprep.subr.bf16.mxu1 %v2382_v21 }
 0x140   :  { %2353 = vmatpush3.bf16.msra.mxu0 %v2352_v25 }
 0x141   :  { %2385 = vmatpush3.bf16.msra.mxu1 %v2384_v26  ;;  %2355 = vmatprep.subr.bf16.mxu0 %v2354_v33 }
 0x142   :  { %2387 = vmatprep.subr.bf16.mxu1 %v2386_v29 }
 0x144   :  { %2357 = vmatpush3.bf16.msra.mxu0 %v2356_v43 }
 0x145   :  { %2389 = vmatpush3.bf16.msra.mxu1 %v2388_v46 }
 0x147   :  { %1609 = vmatmul.mubr.f32.vlgmr.msra.gmra.mrb[28].mxu0 %v811_v45 }
 0x148   :  { %1684 = vmatmul.mubr.f32.vlgmr.msra.gmra.mrb[28].mxu1 %v813_v49  ;;  %1613 = vmatprep.mubr.f32.mxu0 %v828_v18 }
 0x149   :  { %1688 = vmatprep.mubr.f32.mxu1 %v830_v19 }
 0x14b   :  { %1614 = vmatmul.mubr.f32.gmra.mrb[30].mxu0 %v827_v1 }
 0x14c   :  { %1689 = vmatmul.mubr.f32.gmra.mrb[30].mxu1 %v829_v54 }
 0x1ba   :  { %v1798_v20 = vpop.f32.mrb[16].mxu0 }
 0x1bb   :  { %v1836_v8 = vpop.f32.mrb[16].mxu1  ;;  %v1799_v34 = vpop.f32.mrb[17].mxu0 }
 0x1bc   :  { %v1800_v47 = vadd.f32 %v1799_v34, %v1798_v20  ;;  %v1837_v53 = vpop.f32.mrb[17].mxu1  ;;  %v2395_v20 = vld [vmem:[%s3626_s0] sm:$0xff] }
 0x1bd   :  { %v1838_v44 = vadd.f32 %v1837_v53, %v1836_v8 }
 0x1be   :  { %v1161_v55 = vadd.f32 %v1800_v47, %v1763_v51  ;;  %v1801_v56 = vpop.f32.mrb[18].mxu0  ;;  %v2396_v47 = vld [vmem:[%s3626_s0 + $0x8] sm:$0xff] }
 0x1bf   :  { %v1802_v17 = vpop.f32.mrb[19].mxu0  ;;  %v1839_v58 = vpop.f32.mrb[18].mxu1 }
 0x1c0   :  { %v1236_v38 = vadd.f32 %v1838_v44, %v1161_v55  ;;  %v1803_v39 = vadd.f32 %v1802_v17, %v1801_v56  ;;  %v1840_v37 = vpop.f32.mrb[19].mxu1 }
 0x1c1   :  { %v1841_v41 = vadd.f32 %v1840_v37, %v1839_v58 }
 0x1c2   :  { %v1166_v2 = vadd.f32 %v1803_v39, %v1763_v51 }
 0x1c4   :  { %v1241_v48 = vadd.f32 %v1841_v41, %v1166_v2 }
 0x1da   :  { %v1874_v57 = vpop.f32.mrb[20].mxu0 }
 0x1db   :  { %v1912_v50 = vpop.f32.mrb[20].mxu1  ;;  %v1875_v14 = vpop.f32.mrb[21].mxu0 }
 0x1dc   :  { %v1876_v12 = vadd.f32 %v1875_v14, %v1874_v57  ;;  %v1913_v32 = vpop.f32.mrb[21].mxu1 }
 0x1dd   :  { %v1914_v52 = vadd.f32 %v1913_v32, %v1912_v50 }
 0x1de   :  { %v1311_v16 = vadd.f32 %v1876_v12, %v1236_v38  ;;  %v1877_v31 = vpop.f32.mrb[22].mxu0 }
 0x1df   :  { %v1878_v42 = vpop.f32.mrb[23].mxu0  ;;  %v1915_v59 = vpop.f32.mrb[22].mxu1 }
 0x1e0   :  { %v1386_v60 = vadd.f32 %v1914_v52, %v1311_v16  ;;  %v1879_v61 = vadd.f32 %v1878_v42, %v1877_v31  ;;  %v1916_v4 = vpop.f32.mrb[23].mxu1  ;;  %v1764_v31 = vld [vmem:[%s3630_s5] ss:$0 sm:$0xff] }
 0x1e1   :  { %v1917_v35 = vadd.f32 %v1916_v4, %v1915_v59  ;;  %v1765_v59 = vld [vmem:[%s3631_s6] ss:$0 sm:$0xff] }
 0x1e2   :  { %v1316_v15 = vadd.f32 %v1879_v61, %v1241_v48 }
 0x1e4   :  { %v1391_v62 = vadd.f32 %v1917_v35, %v1316_v15 }
 0x1fa   :  { %v1950_v63 = vpop.f32.mrb[24].mxu0 }
 0x1fb   :  { %v1988_v5 = vpop.f32.mrb[24].mxu1  ;;  %v1951_v0 = vpop.f32.mrb[25].mxu0 }
 0x1fc   :  { %v1952_v7 = vadd.f32 %v1951_v0, %v1950_v63  ;;  %v1989_v9 = vpop.f32.mrb[25].mxu1 }
 0x1fd   :  { %v1990_v13 = vadd.f32 %v1989_v9, %v1988_v5 }
 0x1fe   :  { %v1461_v10 = vadd.f32 %v1952_v7, %v1386_v60  ;;  %v1953_v11 = vpop.f32.mrb[26].mxu0 }
 0x1ff   :  { %v1954_v3 = vpop.f32.mrb[27].mxu0  ;;  %v1991_v21 = vpop.f32.mrb[26].mxu1 }
 0x200   :  { %v1536_v22 = vadd.f32 %v1990_v13, %v1461_v10  ;;  %v1955_v23 = vadd.f32 %v1954_v3, %v1953_v11  ;;  %v1992_v6 = vpop.f32.mrb[27].mxu1 }
 0x201   :  { %v1993_v24 = vadd.f32 %v1992_v6, %v1991_v21 }
 0x202   :  { %v1466_v30 = vadd.f32 %v1955_v23, %v1391_v62 }
 0x204   :  { %v1541_v25 = vadd.f32 %v1993_v24, %v1466_v30 }
 0x21a   :  { %v2026_v26 = vpop.f32.mrb[28].mxu0 }
 0x21b   :  { %v2064_v33 = vpop.f32.mrb[28].mxu1  ;;  %v2027_v27 = vpop.f32.mrb[29].mxu0 }
 0x21c   :  { %v2028_v28 = vadd.f32 %v2027_v27, %v2026_v26  ;;  %v2065_v29 = vpop.f32.mrb[29].mxu1 }
 0x21d   :  { %v2066_v36 = vadd.f32 %v2065_v29, %v2064_v33 }
 0x21e   :  { %v1611_v40 = vadd.f32 %v2028_v28, %v1536_v22  ;;  %v2029_v43 = vpop.f32.mrb[30].mxu0 }
 0x21f   :  { %v2067_v46 = vpop.f32.mrb[30].mxu1  ;;  %v2030_v49 = vpop.f32.mrb[31].mxu0 }
 0x220   :  { %v1686_v18 = vadd.f32 %v2066_v36, %v1611_v40  ;;  %v2031_v45 = vadd.f32 %v2030_v49, %v2029_v43  ;;  %v2068_v19 = vpop.f32.mrb[31].mxu1 }
 0x221   :  { %v2069_v54 = vadd.f32 %v2068_v19, %v2067_v46 }
 0x222   :  { %v1616_v1 = vadd.f32 %v2031_v45, %v1541_v25  ;;  %v1694_v8 = vadd.f32 %v2395_v20, %v1686_v18 }
 0x224   :  { %v1691_v51 = vadd.f32 %v2069_v54, %v1616_v1  ;;  %v1698_v34 = vsel %vm176_vm0, %v1694_v8, 0.0 }
 0x225   :  { %1699 = vadd.xlane.f32.xlu0 %v1698_v34 }
 0x226   :  { %v1695_v53 = vadd.f32 %v2396_v47, %v1691_v51 }
 0x228   :  { %v1701_v44 = vsel %vm176_vm0, %v1695_v53, 0.0 }
 0x229   :  { %1702 = vadd.xlane.f32.xlu0 %v1701_v44 }
 0x2b2   :  { %v1700_v55 = vpop.xlane.xlu0 %1699 }
 0x2b3   :  { %v1705_v56 = vmul.f32 0.03125, %v1700_v55 }
 0x2b5   :  { %v1707_v17 = vsub.f32 %v1694_v8, %v1705_v56 }
 0x2b6   :  { %v1703_v58 = vpop.xlane.xlu0 %1702 }
 0x2b7   :  { %v1706_v38 = vmul.f32 0.03125, %v1703_v58  ;;  %v1709_v39 = vmul.f32 %v1707_v17, %v1707_v17 }
 0x2b9   :  { %v1708_v37 = vsub.f32 %v1695_v53, %v1706_v38  ;;  %v1711_v41 = vsel %vm176_vm0, %v1709_v39, 0.0 }
 0x2ba   :  { %1712 = vadd.xlane.f32.xlu1 %v1711_v41 }
 0x2bb   :  { %v1710_v2 = vmul.f32 %v1708_v37, %v1708_v37 }
 0x2bd   :  { %v1714_v48 = vsel %vm176_vm0, %v1710_v2, 0.0 }
 0x2be   :  { %1715 = vadd.xlane.f32.xlu1 %v1714_v48 }
 0x347   :  { %v1713_v57 = vpop.xlane.xlu1 %1712 }
 0x348   :  { %v1717_v50 = vmul.f32 0.03125, %v1713_v57 }
 0x34a   :  { %v1719_v14 = vadd.f32 1e-05, %v1717_v50 }
 0x34b   :  { %v1716_v12 = vpop.xlane.xlu1 %1715 }
 0x34c   :  { %2391 = vrsqrt.f32 %v1719_v14  ;;  %v1718_v32 = vmul.f32 0.03125, %v1716_v12 }
 0x34e   :  { %v1720_v52 = vadd.f32 1e-05, %v1718_v32 }
 0x350   :  { %2393 = vrsqrt.f32 %v1720_v52 }
 0x356   :  { %v2392_v16 = vpop.eup %2391 }
 0x357   :  { %v1723_v42 = vmul.f32 %v2392_v16, %v1707_v17 }
 0x359   :  { %v1731_v60 = vmul.f32 %v1764_v31, %v1723_v42 }
 0x35a   :  { %v2394_v61 = vpop.eup %2393 }
 0x35b   :  { %v1739_v4 = vadd.f32 %v1765_v59, %v1731_v60  ;;  %v1724_v35 = vmul.f32 %v2394_v61, %v1708_v37 }
 0x35d   :  { %1741 = vst.msk [vmem:[%s3632_s7] sm:$0xff] %vm176_vm0, %v1739_v4  ;;  %v1732_v15 = vmul.f32 %v1764_v31, %v1724_v35 }
 0x35f   :  { %v1740_v62 = vadd.f32 %v1765_v59, %v1732_v15 }
 0x361   :  { %1742 = vst.msk [vmem:[%s3632_s7 + $0x8] sm:$0xff] %vm176_vm0, %v1740_v62 }

// kernel: transformer_decoder_forward.10
= control target key start
LH: loop header
LB: loop body
LE: loop exit
PB: predicated region body
PF: predicated region fallthrough
CT: control target
= control target key end

     0   :  { %vm58_vm0 = vcmask 261120   ;;  %v2373_v18 = vmov 0.0|0.0   ;;  %vm2374_vm1 = vmmov 0   ;;  %v2375_v19 = vmov 0.0   ;;  %s2377_s19 = smov 120   ;;  %s2379_s21 = smov 8   ;;  %s2752_s4 = inlined_call_operand.vmem [shape: f32[32,32], index: 4, kind: input, shape index: {}]   ;;  %s2753_s1 = inlined_call_operand.vmem [shape: f32[32,32], index: 1, kind: input, shape index: {}]   ;;  %s2754_s2 = inlined_call_operand.vmem [shape: f32[32,32], index: 2, kind: input, shape index: {}]   ;;  %s2755_s0 = inlined_call_operand.vmem [shape: f32[16,32], index: 0, kind: input, shape index: {}]   ;;  %s2756_s6 = inlined_call_operand.vmem [shape: f32[32,32], index: 6, kind: input, shape index: {}]   ;;  %s2757_s5 = inlined_call_operand.vmem [shape: f32[1,32], index: 5, kind: input, shape index: {}]   ;;  %s2758_s3 = inlined_call_operand.vmem [shape: f32[1,32], index: 3, kind: input, shape index: {}]   ;;  %s2759_s7 = inlined_call_operand.vmem [shape: f32[1,32], index: 7, kind: input, shape index: {}]   ;;  %s2760_s8 = inlined_call_operand.vmem [shape: f32[32,32], index: 8, kind: input, shape index: {}]   ;;  %s2761_s9 = inlined_call_operand.vmem [shape: f32[1,32], index: 9, kind: input, shape index: {}]   ;;  %s2762_s10 = inlined_call_operand.vmem [shape: f32[1,32], index: 10, kind: input, shape index: {}]   ;;  %s2763_s11 = inlined_call_operand.vmem [shape: f32[1,32], index: 11, kind: input, shape index: {}]   ;;  %s2764_s12 = inlined_call_operand.vmem [shape: f32[16,32], index: 12, kind: output, shape index: {}]  }
   0x1   :  { %v140_v0 = vld [vmem:[%s2752_s4] sm:$0xff]  ;;  %v141_v1 = vld [vmem:[%s2752_s4 + $0x8] sm:$0xff]  ;;  %v142_v2 = vld [vmem:[%s2752_s4 + $0x10] sm:$0xff]  ;;  %vm344_vm2 = vcmask 64512   ;;  %vm425_vm4 = vcmask 130048   ;;  %s2380_s22 = smov 16  }
   0x2   :  { %v2188_v3 = vpack.c.bf16 %v141_v1, %v140_v0  ;;  %v143_v4 = vld [vmem:[%s2752_s4 + $0x18] sm:$0xff]  ;;  %v43_v5 = vld [vmem:[%s2753_s1] sm:$0xff]  ;;  %v48_v8 = vld [vmem:[%s2754_s2 + $0x8] sm:$0xff]  ;;  %s2381_s23 = smov 24   ;;  %vm1045_vm5 = vcmask 195584  }
   0x3   :  { %v2192_v6 = vpack.c.bf16 %v143_v4, %v142_v2  ;;  %2037 = vmatprep.mubr.msk.f32.mxu1 %vm58_vm0, %v43_v5  ;;  %v47_v7 = vld [vmem:[%s2754_s2] sm:$0xff]  ;;  %v49_v9 = vld [vmem:[%s2754_s2 + $0x10] sm:$0xff]  ;;  %v50_v11 = vld [vmem:[%s2754_s2 + $0x18] sm:$0xff] }
   0x4   :  { %2189 = vmatprep.subr.bf16.mxu1 %v2188_v3  ;;  %v2180_v10 = vpack.c.bf16 %v48_v8, %v47_v7  ;;  %v2478_v12 = vld [vmem:[%s2755_s0] sm:$0xff]  ;;  %v2184_v13 = vpack.c.bf16 %v50_v11, %v49_v9  ;;  %v44_v14 = vld [vmem:[%s2753_s1 + $0x8] sm:$0xff]  ;;  %v45_v15 = vld [vmem:[%s2753_s1 + $0x10] sm:$0xff] }
   0x5   :  { %2191 = vmatpush3.bf16.msra.mxu1 %v2188_v3  ;;  %2026 = vmatprep.mubr.msk.f32.mxu0 %vm58_vm0, %v2478_v12  ;;  %v2491_v16 = vld [vmem:[%s2755_s0 + $0x8] sm:$0xff]  ;;  %v46_v17 = vld [vmem:[%s2753_s1 + $0x18] sm:$0xff]  ;;  %v248_v20 = vld [vmem:[%s2756_s6] sm:$0xff] }
   0x6   :  { %2193 = vmatprep.subr.bf16.mxu1 %v2192_v6  ;;  %2181 = vmatprep.subr.bf16.mxu0 %v2180_v10  ;;  %v249_v21 = vld [vmem:[%s2756_s6 + $0x8] sm:$0xff]  ;;  %v250_v22 = vld [vmem:[%s2756_s6 + $0x10] sm:$0xff]  ;;  %v251_v24 = vld [vmem:[%s2756_s6 + $0x18] sm:$0xff] }
   0x7   :  { %2183 = vmatpush3.bf16.msra.mxu0 %v2180_v10  ;;  %v2196_v23 = vpack.c.bf16 %v249_v21, %v248_v20  ;;  %v2200_v25 = vpack.c.bf16 %v251_v24, %v250_v22  ;;  %v1895_v26 = vld [vmem:[%s2757_s5] ss:$0 sm:$0xff]  ;;  %vm2535_vm3 = vmpackc.low %vm344_vm2, %vm344_vm2  ;;  %s2376_s5 = smov 112  }
   0x8   :  { %2185 = vmatprep.subr.bf16.mxu0 %v2184_v13  ;;  %v1892_v32 = vld [vmem:[%s2758_s3] ss:$0 sm:$0xff] }
   0x9   :  { %2195 = vmatpush3.bf16.msra.mxu1 %v2192_v6  ;;  %v1900_v43 = vld [vmem:[%s2759_s7] ss:$0 sm:$0xff]  ;;  %s2378_s7 = smov 104  }
   0xa   :  { %2204 = vmatprep.subr.bf16.mxu1 %v2373_v18 }
   0xb   :  { %2187 = vmatpush3.bf16.msra.mxu0 %v2184_v13 }
   0xc   :  { %2038 = vmatmul.mubr.msk.f32.vlgmr.msra.gmra.mrb[0].mxu1 %vm58_vm0, %v44_v14  ;;  %2197 = vmatprep.subr.bf16.mxu0 %v2196_v23 }
   0xd   :  { %2040 = vmatprep.mubr.msk.f32.mxu1 %vm58_vm0, %v45_v15 }
   0xe   :  { %2027 = vmatmul.mubr.msk.f32.vlgmr.msra.gmra.mrb[0].mxu0 %vm58_vm0, %v2491_v16 }
   0xf   :  { %2051 = vmatprep.mubr.msk.f32.mxu0 %vm58_vm0, %v43_v5  ;;  %2199 = vmatpush3.bf16.msra.mxu0 %v2196_v23 }
  0x10   :  { %2041 = vmatmul.mubr.msk.f32.gmra.mrb[2].mxu1 %vm58_vm0, %v46_v17  ;;  %2201 = vmatprep.subr.bf16.mxu0 %v2200_v25 }
  0x11   :  { %2061 = vmatprep.mubr.msk.f32.mxu1 %vm2374_vm1, %v2375_v19 }
  0x13   :  { %2203 = vmatpush3.bf16.msra.mxu0 %v2200_v25 }
  0x14   :  { %2211 = vmatprep.subr.bf16.mxu0 %v2373_v18 }
  0x16   :  { %2052 = vmatmul.mubr.msk.f32.vlgmr.msra.gmra.mrb[2].mxu0 %vm58_vm0, %v44_v14 }
  0x17   :  { %2054 = vmatprep.mubr.msk.f32.mxu0 %vm58_vm0, %v45_v15 }
  0x1a   :  { %2055 = vmatmul.mubr.msk.f32.gmra.mrb[4].mxu0 %vm58_vm0, %v46_v17 }
  0x1b   :  { %2075 = vmatprep.mubr.msk.f32.mxu0 %vm2374_vm1, %v2375_v19 }
  0xdf   :  { %v2039_v27 = vpop.f32.mrb[0].mxu1 }
  0xe0   :  { %v235_v28 = vadd.f32 %v2039_v27, %v1895_v26  ;;  %v229_v29 = vpop.f32.mrb[1].mxu1 }
  0xe1   :  { %v230_v30 = vadd.f32 %v1895_v26, %v229_v29  ;;  %v2028_v31 = vpop.f32.mrb[0].mxu0 }
  0xe2   :  { %v2529_v33 = vadd.f32 %v2028_v31, %v1892_v32  ;;  %v131_v34 = vpop.f32.mrb[1].mxu0 }
  0xe3   :  { %v2205_v35 = vpack.c.bf16 %v235_v28, %v230_v30  ;;  %v2531_v36 = vpack.i.bf16 %v235_v28, %v230_v30  ;;  %v2042_v38 = vpop.f32.mrb[2].mxu1  ;;  %v2549_v42 = vadd.f32 %v1892_v32, %v131_v34 }
  0xe4   :  { %v2543_v39 = vadd.f32 %v2042_v38, %v1895_v26  ;;  %v239_v40 = vpop.f32.mrb[3].mxu1 }
  0xe5   :  { %2283 = vrot.lane.b32.xlu1 %v2531_v36, %s2376_s5  ;;  %2278 = vrot.lane.b32.xlu0 %v2531_v36, %s2377_s19  ;;  %v2547_v41 = vadd.f32 %v1895_v26, %v239_v40 }
  0xe6   :  { %2207 = vmatpush3.bf16.xpose.msk.msra.mxu1 %vm2535_vm3, %v2205_v35 }
  0xe7   :  { %2208 = vmatprep.subr.bf16.mxu1 %v2373_v18  ;;  %v2233_v62 = vpack.c.bf16 %v2543_v39, %v2547_v41 }
  0xe9   :  { %685 = vrot.lane.b32.xlu1 %v2549_v42, %s2376_s5  ;;  %510 = vrot.lane.b32.xlu0 %v2549_v42, %s2377_s19  ;;  %v2053_v44 = vpop.f32.mrb[2].mxu0 }
  0xea   :  { %v331_v45 = vadd.f32 %v2053_v44, %v1900_v43  ;;  %v325_v46 = vpop.f32.mrb[3].mxu0 }
  0xeb   :  { %v326_v47 = vadd.f32 %v1900_v43, %v325_v46 }
  0xed   :  { %2062 = vmatmul.mubr.msk.f32.vlgmr.msra.gmra.mrb[4].mxu1 %vm344_vm2, %v2549_v42  ;;  %v2056_v48 = vpop.f32.mrb[4].mxu0  ;;  %v2209_v49 = vpack.c.bf16 %v331_v45, %v326_v47  ;;  %v2287_v20 = vpack.i.bf16 %v331_v45, %v326_v47 }
  0xee   :  { %2068 = vmatprep.mubr.msk.f32.mxu1 %vm2374_vm1, %v2375_v19  ;;  %v2563_v50 = vadd.f32 %v2056_v48, %v1900_v43  ;;  %v335_v51 = vpop.f32.mrb[5].mxu0 }
  0xef   :  { %v2565_v52 = vadd.f32 %v1900_v43, %v335_v51  ;;  %2210 = vmatpush3.bf16.msra.mxu1 %v2209_v49 }
  0xf0   :  { %2215 = vmatprep.subr.bf16.mxu1 %v2373_v18 }
  0xf1   :  { %v2237_v0 = vpack.c.bf16 %v2563_v50, %v2565_v52  ;;  %v2593_v1 = vpack.i.bf16 %v2563_v50, %v2565_v52 }
 0x157   :  { %v2279_v53 = vpop.permute.xlu0 %2278  ;;  %v2284_v57 = vpop.permute.xlu1 %2283 }
 0x158   :  { %v2281_v54 = vunpack.i.h.bf16 %v2279_v53  ;;  %v2280_v55 = vunpack.i.l.bf16 %v2279_v53  ;;  %v2286_v58 = vunpack.i.h.bf16 %v2284_v57  ;;  %v2285_v59 = vunpack.i.l.bf16 %v2284_v57 }
 0x15a   :  { %v2212_v56 = vpack.c.bf16 %v2281_v54, %v2280_v55  ;;  %v2219_v61 = vpack.c.bf16 %v2286_v58, %v2285_v59 }
 0x15b   :  { %v511_v60 = vpop.permute.xlu0 %510  ;;  %v686_v63 = vpop.permute.xlu1 %685 }
 0x15c   :  { %2214 = vmatpush3.bf16.xpose.msk.msra.mxu0 %vm2535_vm3, %v2212_v56 }
 0x15d   :  { %2218 = vmatprep.subr.bf16.mxu0 %v2373_v18 }
 0x163   :  { %2076 = vmatmul.mubr.msk.f32.vlgmr.msra.gmra.mrb[6].mxu0 %vm344_vm2, %v511_v60 }
 0x164   :  { %2221 = vmatpush3.bf16.xpose.msk.msra.mxu0 %vm2535_vm3, %v2219_v61  ;;  %2089 = vmatprep.mubr.msk.f32.mxu0 %vm2374_vm1, %v2375_v19 }
 0x165   :  { %2232 = vmatprep.subr.bf16.mxu0 %v2373_v18 }
 0x16b   :  { %2090 = vmatmul.mubr.msk.f32.vlgmr.msra.gmra.mrb[8].mxu0 %vm344_vm2, %v686_v63 }
 0x16c   :  { %2235 = vmatpush3.bf16.xpose.msk.msra.mxu0 %vm2535_vm3, %v2233_v62  ;;  %2117 = vmatprep.mubr.msk.f32.mxu0 %vm2374_vm1, %v2375_v19 }
 0x16d   :  { %2243 = vmatprep.subr.bf16.mxu0 %v2373_v18 }
 0x173   :  { %2118 = vmatmul.mubr.msk.f32.vlgmr.msra.gmra.mrb[10].mxu0 %vm344_vm2, %v2529_v33 }
 0x174   :  { %2138 = vmatprep.mubr.msk.f32.mxu0 %vm2374_vm1, %v2375_v19 }
 0x1c0   :  { %v420_v2 = vpop.f32.mrb[4].mxu1 }
 0x1c1   :  { %v424_v3 = vmul.f32 0.35355338, %v420_v2  ;;  %v2063_v4 = vpop.f32.mrb[5].mxu1 }
 0x1c3   :  { %v426_v5 = vsel %vm425_vm4, %v424_v3, -inf }
 0x1c4   :  { %427 = vmax.xlane.f32.xlu0 %v426_v5 }
 0x236   :  { %v588_v6 = vpop.f32.mrb[6].mxu0 }
 0x237   :  { %v592_v7 = vmul.f32 0.35355338, %v588_v6  ;;  %v2077_v8 = vpop.f32.mrb[7].mxu0 }
 0x239   :  { %v593_v9 = vsel %vm425_vm4, %v592_v7, -inf }
 0x23a   :  { %594 = vmax.xlane.f32.xlu1 %v593_v9 }
 0x23e   :  { %v763_v10 = vpop.f32.mrb[8].mxu0 }
 0x23f   :  { %v767_v11 = vmul.f32 0.35355338, %v763_v10  ;;  %v2091_v13 = vpop.f32.mrb[9].mxu0 }
 0x241   :  { %v768_v14 = vsel %vm425_vm4, %v767_v11, -inf }
 0x242   :  { %769 = vmax.xlane.f32.xlu0 %v768_v14 }
 0x246   :  { %v1122_v15 = vpop.f32.mrb[10].mxu0 }
 0x247   :  { %v2119_v17 = vpop.f32.mrb[11].mxu0 }
 0x24b   :  { %2288 = vrot.lane.b32.xlu1 %v2287_v20, %s2377_s19 }
 0x251   :  { %v428_v21 = vpop.xlane.xlu0 %427 }
 0x252   :  { %v429_v22 = vsub.f32 %v424_v3, %v428_v21 }
 0x254   :  { %v430_v23 = vmul.f32 1.442695, %v429_v22 }
 0x256   :  { %2337 = vpow2.f32 %v430_v23 }
 0x260   :  { %v2338_v24 = vpop.eup %2337 }
 0x261   :  { %v432_v25 = vsel %vm425_vm4, %v2338_v24, 0.0 }
 0x262   :  { %433 = vadd.xlane.f32.xlu0 %v432_v25 }
 0x2c7   :  { %v595_v26 = vpop.xlane.xlu1 %594 }
 0x2c8   :  { %v596_v27 = vsub.f32 %v592_v7, %v595_v26 }
 0x2ca   :  { %v597_v28 = vmul.f32 1.442695, %v596_v27 }
 0x2cb   :  { %v2289_v43 = vpop.permute.xlu1 %2288 }
 0x2cc   :  { %2339 = vpow2.f32 %v597_v28  ;;  %v2291_v44 = vunpack.i.h.bf16 %v2289_v43  ;;  %v2290_v45 = vunpack.i.l.bf16 %v2289_v43 }
 0x2ce   :  { %v2216_v48 = vpack.c.bf16 %v2291_v44, %v2290_v45 }
 0x2cf   :  { %v770_v29 = vpop.xlane.xlu0 %769 }
 0x2d0   :  { %v771_v30 = vsub.f32 %v767_v11, %v770_v29 }
 0x2d2   :  { %v772_v31 = vmul.f32 1.442695, %v771_v30 }
 0x2d4   :  { %2341 = vpow2.f32 %v772_v31 }
 0x2d6   :  { %v2340_v32 = vpop.eup %2339 }
 0x2d7   :  { %v599_v34 = vsel %vm425_vm4, %v2340_v32, 0.0 }
 0x2d8   :  { %600 = vadd.xlane.f32.xlu1 %v599_v34 }
 0x2de   :  { %v2342_v35 = vpop.eup %2341 }
 0x2df   :  { %v774_v38 = vsel %vm425_vm4, %v2342_v35, 0.0 }
 0x2e0   :  { %775 = vadd.xlane.f32.xlu0 %v774_v38 }
 0x2e9   :  { %2298 = vrot.lane.b32.xlu1 %v2531_v36, %s2378_s7  ;;  %v1126_v36 = vmul.f32 0.35355338, %v1122_v15 }
 0x2ed   :  { %858 = vrot.lane.b32.xlu1 %v2549_v42, %s2378_s7  ;;  %v1127_v42 = vsel %vm425_vm4, %v1126_v36, -inf }
 0x2ef   :  { %v434_v40 = vpop.xlane.xlu0 %433 }
 0x2f0   :  { %2343 = vrcp.f32 %v434_v40 }
 0x2f6   :  { %2293 = vrot.lane.b32.xlu0 %v2287_v20, %s2376_s5 }
 0x2fa   :  { %v2344_v46 = vpop.eup %2343 }
 0x2fb   :  { %v436_v47 = vmul.f32 %v2344_v46, %v2338_v24 }
 0x2fd   :  { %2069 = vmatmul.mubr.msk.f32.vlgmr.msra.gmra.mrb[6].mxu1 %vm425_vm4, %v436_v47 }
 0x2fe   :  { %2217 = vmatpush3.bf16.msra.mxu1 %v2216_v48  ;;  %2082 = vmatprep.mubr.msk.f32.mxu1 %vm2374_vm1, %v2375_v19 }
 0x2ff   :  { %2222 = vmatprep.subr.bf16.mxu1 %v2373_v18 }
 0x311   :  { %1128 = vmax.xlane.f32.xlu1 %v1127_v42 }
 0x322   :  { %2303 = vrot.lane.b32.xlu1 %v2287_v20, %s2378_s7 }
 0x326   :  { %1211 = vrot.lane.b32.xlu1 %v2529_v33, %s2377_s19 }
 0x365   :  { %v601_v49 = vpop.xlane.xlu1 %600 }
 0x366   :  { %2345 = vrcp.f32 %v601_v49 }
 0x369   :  { %v2299_v59 = vpop.permute.xlu1 %2298 }
 0x36a   :  { %v2301_v61 = vunpack.i.h.bf16 %v2299_v59  ;;  %v2300_v62 = vunpack.i.l.bf16 %v2299_v59 }
 0x36c   :  { %v2226_v2 = vpack.c.bf16 %v2301_v61, %v2300_v62 }
 0x36d   :  { %v776_v51 = vpop.xlane.xlu0 %775  ;;  %v859_v3 = vpop.permute.xlu1 %858 }
 0x36e   :  { %2347 = vrcp.f32 %v776_v51 }
 0x370   :  { %v2346_v53 = vpop.eup %2345 }
 0x371   :  { %v603_v54 = vmul.f32 %v2346_v53, %v2340_v32  ;;  %v2294_v55 = vpop.permute.xlu0 %2293  ;;  %v2640_v32 = vpack.i.bf16 %v2543_v39, %v2547_v41 }
 0x372   :  { %v2296_v56 = vunpack.i.h.bf16 %v2294_v55  ;;  %v2295_v57 = vunpack.i.l.bf16 %v2294_v55 }
 0x373   :  { %2083 = vmatmul.mubr.msk.f32.vlgmr.msra.gmra.mrb[8].mxu1 %vm425_vm4, %v603_v54 }
 0x374   :  { %v2223_v58 = vpack.c.bf16 %v2296_v56, %v2295_v57  ;;  %2096 = vmatprep.mubr.msk.f32.mxu1 %vm2374_vm1, %v2375_v19 }
 0x376   :  { %2224 = vmatpush3.bf16.msra.mxu1 %v2223_v58 }
 0x377   :  { %2225 = vmatprep.subr.bf16.mxu1 %v2373_v18 }
 0x378   :  { %v2348_v60 = vpop.eup %2347 }
 0x379   :  { %v778_v63 = vmul.f32 %v2348_v60, %v2342_v35 }
 0x37b   :  { %2097 = vmatmul.mubr.msk.f32.vlgmr.msra.gmra.mrb[10].mxu1 %vm425_vm4, %v778_v63 }
 0x37c   :  { %2103 = vmatprep.mubr.msk.f32.mxu1 %vm2374_vm1, %v2375_v19 }
 0x37f   :  { %2228 = vmatpush3.bf16.xpose.msk.msra.mxu1 %vm2535_vm3, %v2226_v2 }
 0x380   :  { %2229 = vmatprep.subr.bf16.mxu1 %v2373_v18 }
 0x386   :  { %2104 = vmatmul.mubr.msk.f32.vlgmr.msra.gmra.mrb[12].mxu1 %vm344_vm2, %v859_v3 }
 0x387   :  { %2110 = vmatprep.mubr.msk.f32.mxu1 %vm2374_vm1, %v2375_v19 }
 0x39e   :  { %v1129_v4 = vpop.xlane.xlu1 %1128 }
 0x39f   :  { %v1130_v23 = vsub.f32 %v1126_v36, %v1129_v4 }
 0x3a1   :  { %v1131_v26 = vmul.f32 1.442695, %v1130_v23 }
 0x3a2   :  { %v2304_v5 = vpop.permute.xlu1 %2303 }
 0x3a3   :  { %v2306_v6 = vunpack.i.h.bf16 %v2304_v5  ;;  %v2305_v7 = vunpack.i.l.bf16 %v2304_v5 }
 0x3a5   :  { %v2230_v8 = vpack.c.bf16 %v2306_v6, %v2305_v7 }
 0x3a6   :  { %v1212_v50 = vpop.permute.xlu1 %1211 }
 0x3a7   :  { %2231 = vmatpush3.bf16.msra.mxu1 %v2230_v8 }
 0x3a8   :  { %2236 = vmatprep.subr.bf16.mxu1 %v2373_v18 }
 0x3d0   :  { %v2629_v9 = vpop.f32.mrb[6].mxu1 }
 0x3d1   :  { %v2070_v10 = vpop.f32.mrb[7].mxu1 }
 0x446   :  { %v2631_v11 = vpop.f32.mrb[8].mxu1 }
 0x447   :  { %v2084_v13 = vpop.f32.mrb[9].mxu1 }
 0x44e   :  { %v2633_v14 = vpop.f32.mrb[10].mxu1 }
 0x44f   :  { %v2098_v15 = vpop.f32.mrb[11].mxu1 }
 0x459   :  { %v936_v17 = vpop.f32.mrb[12].mxu1 }
 0x45a   :  { %v940_v20 = vmul.f32 0.35355338, %v936_v17  ;;  %v2105_v21 = vpop.f32.mrb[13].mxu1 }
 0x45c   :  { %v941_v22 = vsel %vm425_vm4, %v940_v20, -inf }
 0x45d   :  { %942 = vmax.xlane.f32.xlu0 %v941_v22 }
 0x4ea   :  { %v943_v24 = vpop.xlane.xlu0 %942 }
 0x4eb   :  { %v944_v25 = vsub.f32 %v940_v20, %v943_v24 }
 0x4ed   :  { %v945_v27 = vmul.f32 1.442695, %v944_v25 }
 0x4ef   :  { %2349 = vpow2.f32 %v945_v27 }
 0x4f0   :  { %2351 = vpow2.f32 %v1131_v26 }
 0x4f9   :  { %v2350_v28 = vpop.eup %2349 }
 0x4fa   :  { %v947_v29 = vsel %vm425_vm4, %v2350_v28, 0.0  ;;  %v2352_v30 = vpop.eup %2351 }
 0x4fb   :  { %948 = vadd.xlane.f32.xlu0 %v947_v29  ;;  %v1133_v31 = vsel %vm425_vm4, %v2352_v30, 0.0 }
 0x4ff   :  { %1134 = vadd.xlane.f32.xlu0 %v1133_v31 }
 0x515   :  { %2308 = vrot.lane.b32.xlu0 %v2640_v32, %s2377_s19 }
 0x588   :  { %v949_v34 = vpop.xlane.xlu0 %948 }
 0x589   :  { %2353 = vrcp.f32 %v949_v34 }
 0x58c   :  { %v1135_v35 = vpop.xlane.xlu0 %1134 }
 0x58d   :  { %2355 = vrcp.f32 %v1135_v35 }
 0x590   :  { %v2309_v44 = vpop.permute.xlu0 %2308 }
 0x591   :  { %v2311_v41 = vunpack.i.h.bf16 %v2309_v44  ;;  %v2310_v45 = vunpack.i.l.bf16 %v2309_v44 }
 0x593   :  { %v2354_v38 = vpop.eup %2353  ;;  %v2240_v46 = vpack.c.bf16 %v2311_v41, %v2310_v45 }
 0x594   :  { %v951_v40 = vmul.f32 %v2354_v38, %v2350_v28 }
 0x596   :  { %2111 = vmatmul.mubr.msk.f32.vlgmr.msra.gmra.mrb[14].mxu1 %vm425_vm4, %v951_v40 }
 0x597   :  { %v2356_v43 = vpop.eup %2355  ;;  %2238 = vmatpush3.bf16.msra.mxu1 %v2237_v0  ;;  %2124 = vmatprep.mubr.msk.f32.mxu1 %vm2374_vm1, %v2375_v19 }
 0x598   :  { %v1137_v39 = vmul.f32 %v2356_v43, %v2352_v30  ;;  %2239 = vmatprep.subr.bf16.mxu1 %v2373_v18 }
 0x59a   :  { %2125 = vmatmul.mubr.msk.f32.vlgmr.msra.gmra.mrb[16].mxu1 %vm425_vm4, %v1137_v39 }
 0x59b   :  { %2131 = vmatprep.mubr.msk.f32.mxu1 %vm2374_vm1, %v2375_v19 }
 0x5a0   :  { %2242 = vmatpush3.bf16.xpose.msk.msra.mxu1 %vm2535_vm3, %v2240_v46 }
 0x5a1   :  { %2250 = vmatprep.subr.bf16.mxu1 %v2373_v18 }
 0x5a7   :  { %2132 = vmatmul.mubr.msk.f32.vlgmr.msra.gmra.mrb[18].mxu1 %vm344_vm2, %v1212_v50 }
 0x5a8   :  { %2152 = vmatprep.mubr.msk.f32.mxu1 %vm2374_vm1, %v2375_v19 }
 0x669   :  { %v2660_v52 = vpop.f32.mrb[14].mxu1 }
 0x66a   :  { %v2112_v0 = vpop.f32.mrb[15].mxu1 }
 0x66d   :  { %v2662_v47 = vpop.f32.mrb[16].mxu1 }
 0x66e   :  { %v2126_v48 = vpop.f32.mrb[17].mxu1 }
 0x67a   :  { %v1289_v36 = vpop.f32.mrb[18].mxu1 }
 0x67b   :  { %v1293_v42 = vmul.f32 0.35355338, %v1289_v36  ;;  %v2133_v49 = vpop.f32.mrb[19].mxu1 }
 0x67d   :  { %v1294_v51 = vsel %vm425_vm4, %v1293_v42, -inf }
 0x67e   :  { %1295 = vmax.xlane.f32.xlu1 %v1294_v51 }
 0x68f   :  { %2318 = vrot.lane.b32.xlu1 %v2640_v32, %s2376_s5 }
 0x693   :  { %1386 = vrot.lane.b32.xlu1 %v2529_v33, %s2376_s5 }
 0x70b   :  { %v1296_v53 = vpop.xlane.xlu1 %1295 }
 0x70c   :  { %v1297_v54 = vsub.f32 %v1293_v42, %v1296_v53 }
 0x70e   :  { %v1298_v55 = vmul.f32 1.442695, %v1297_v54 }
 0x70f   :  { %v2319_v63 = vpop.permute.xlu1 %2318 }
 0x710   :  { %2357 = vpow2.f32 %v1298_v55  ;;  %v2321_v3 = vunpack.i.h.bf16 %v2319_v63  ;;  %v2320_v4 = vunpack.i.l.bf16 %v2319_v63 }
 0x712   :  { %v2247_v6 = vpack.c.bf16 %v2321_v3, %v2320_v4 }
 0x713   :  { %v1387_v7 = vpop.permute.xlu1 %1386 }
 0x71a   :  { %v2358_v56 = vpop.eup %2357 }
 0x71b   :  { %v1300_v57 = vsel %vm425_vm4, %v2358_v56, 0.0 }
 0x71c   :  { %1301 = vadd.xlane.f32.xlu0 %v1300_v57  ;;  %v1747_v57 = vld [vmem:[%s2760_s8] sm:$0xff] }
 0x732   :  { %2313 = vrot.lane.b32.xlu0 %v2593_v1, %s2377_s19 }
 0x7a9   :  { %v1302_v58 = vpop.xlane.xlu0 %1301 }
 0x7aa   :  { %2359 = vrcp.f32 %v1302_v58  ;;  %v1748_v58 = vld [vmem:[%s2760_s8 + $0x8] sm:$0xff] }
 0x7ad   :  { %v2314_v59 = vpop.permute.xlu0 %2313 }
 0x7ae   :  { %v2316_v60 = vunpack.i.h.bf16 %v2314_v59  ;;  %v2315_v61 = vunpack.i.l.bf16 %v2314_v59  ;;  %v2260_v59 = vpack.c.bf16 %v1748_v58, %v1747_v57 }
 0x7b0   :  { %v2244_v62 = vpack.c.bf16 %v2316_v60, %v2315_v61  ;;  %v1750_v60 = vld [vmem:[%s2760_s8 + $0x18] sm:$0xff] }
 0x7b2   :  { %2245 = vmatpush3.bf16.msra.mxu0 %v2244_v62 }
 0x7b3   :  { %2246 = vmatprep.subr.bf16.mxu0 %v2373_v18 }
 0x7b4   :  { %v2360_v2 = vpop.eup %2359 }
 0x7b5   :  { %v1304_v5 = vmul.f32 %v2360_v2, %v2358_v56 }
 0x7b7   :  { %2139 = vmatmul.mubr.msk.f32.vlgmr.msra.gmra.mrb[12].mxu0 %vm425_vm4, %v1304_v5 }
 0x7b8   :  { %2145 = vmatprep.mubr.msk.f32.mxu0 %vm2374_vm1, %v2375_v19 }
 0x7bb   :  { %2249 = vmatpush3.bf16.xpose.msk.msra.mxu0 %vm2535_vm3, %v2247_v6 }
 0x7bc   :  { %2257 = vmatprep.subr.bf16.mxu0 %v2373_v18 }
 0x7c2   :  { %2146 = vmatmul.mubr.msk.f32.vlgmr.msra.gmra.mrb[14].mxu0 %vm344_vm2, %v1387_v7 }
 0x7c3   :  { %2166 = vmatprep.mubr.msk.f32.mxu0 %vm2374_vm1, %v2375_v19 }
 0x88a   :  { %v1382_v8 = vpop.f32.mrb[12].mxu0 }
 0x88b   :  { %v2140_v10 = vpop.f32.mrb[13].mxu0 }
 0x895   :  { %v1464_v13 = vpop.f32.mrb[14].mxu0 }
 0x896   :  { %v1468_v15 = vmul.f32 0.35355338, %v1464_v13  ;;  %v2147_v17 = vpop.f32.mrb[15].mxu0 }
 0x898   :  { %v1469_v20 = vsel %vm425_vm4, %v1468_v15, -inf }
 0x899   :  { %1470 = vmax.xlane.f32.xlu0 %v1469_v20 }
 0x8af   :  { %2323 = vrot.lane.b32.xlu0 %v2593_v1, %s2376_s5 }
 0x8b3   :  { %1559 = vrot.lane.b32.xlu0 %v2529_v33, %s2378_s7 }
 0x926   :  { %v1471_v21 = vpop.xlane.xlu0 %1470 }
 0x927   :  { %v1472_v22 = vsub.f32 %v1468_v15, %v1471_v21 }
 0x929   :  { %v1473_v23 = vmul.f32 1.442695, %v1472_v22 }
 0x92a   :  { %v2324_v24 = vpop.permute.xlu0 %2323 }
 0x92b   :  { %2361 = vpow2.f32 %v1473_v23  ;;  %v2326_v25 = vunpack.i.h.bf16 %v2324_v24  ;;  %v2325_v26 = vunpack.i.l.bf16 %v2324_v24 }
 0x92d   :  { %v2251_v27 = vpack.c.bf16 %v2326_v25, %v2325_v26 }
 0x92f   :  { %2252 = vmatpush3.bf16.msra.mxu1 %v2251_v27 }
 0x930   :  { %2253 = vmatprep.subr.bf16.mxu1 %v2373_v18  ;;  %v1560_v18 = vpop.permute.xlu0 %1559 }
 0x935   :  { %v2362_v28 = vpop.eup %2361 }
 0x936   :  { %v1475_v29 = vsel %vm425_vm4, %v2362_v28, 0.0 }
 0x937   :  { %1476 = vadd.xlane.f32.xlu1 %v1475_v29 }
 0x948   :  { %2328 = vrot.lane.b32.xlu1 %v2640_v32, %s2378_s7 }
 0x9c4   :  { %v1477_v30 = vpop.xlane.xlu1 %1476 }
 0x9c5   :  { %2363 = vrcp.f32 %v1477_v30 }
 0x9c8   :  { %v2329_v33 = vpop.permute.xlu1 %2328 }
 0x9c9   :  { %v2331_v31 = vunpack.i.h.bf16 %v2329_v33  ;;  %v2330_v34 = vunpack.i.l.bf16 %v2329_v33 }
 0x9cb   :  { %v2254_v40 = vpack.c.bf16 %v2331_v31, %v2330_v34 }
 0x9cf   :  { %v2364_v35 = vpop.eup %2363 }
 0x9d0   :  { %v1479_v38 = vmul.f32 %v2364_v35, %v2362_v28 }
 0x9d2   :  { %2153 = vmatmul.mubr.msk.f32.vlgmr.msra.gmra.mrb[20].mxu1 %vm425_vm4, %v1479_v38 }
 0x9d3   :  { %2256 = vmatpush3.bf16.xpose.msk.msra.mxu1 %vm2535_vm3, %v2254_v40  ;;  %2159 = vmatprep.mubr.msk.f32.mxu1 %vm2374_vm1, %v2375_v19 }
 0x9da   :  { %2160 = vmatmul.mubr.msk.f32.vlgmr.msra.gmra.mrb[22].mxu1 %vm344_vm2, %v1560_v18 }
 0xaa5   :  { %v1555_v32 = vpop.f32.mrb[20].mxu1 }
 0xaa6   :  { %v2154_v43 = vpop.f32.mrb[21].mxu1 }
 0xaad   :  { %v1637_v44 = vpop.f32.mrb[22].mxu1 }
 0xaae   :  { %v1641_v39 = vmul.f32 0.35355338, %v1637_v44  ;;  %v2161_v41 = vpop.f32.mrb[23].mxu1  ;;  %v1941_v44 = vld [vmem:[%s2763_s11] ss:$0 sm:$0xff] }
 0xab0   :  { %v1642_v45 = vsel %vm425_vm4, %v1641_v39, -inf }
 0xab1   :  { %1643 = vmax.xlane.f32.xlu1 %v1642_v45 }
 0xac2   :  { %1032 = vrot.lane.b32.xlu1 %v2631_v11, %s2379_s21 }
 0xac6   :  { %1036 = vrot.lane.b32.xlu1 %v2633_v14, %s2380_s22 }
 0xaca   :  { %1040 = vrot.lane.b32.xlu1 %v2660_v52, %s2381_s23 }
 0xb3e   :  { %v1644_v19 = vpop.xlane.xlu1 %1643 }
 0xb3f   :  { %v1645_v37 = vsub.f32 %v1641_v39, %v1644_v19 }
 0xb41   :  { %v1646_v46 = vmul.f32 1.442695, %v1645_v37 }
 0xb42   :  { %v1033_v11 = vpop.permute.xlu1 %1032 }
 0xb43   :  { %2365 = vpow2.f32 %v1646_v46  ;;  %v1043_v54 = vsel %vm344_vm2, %v2629_v9, %v1033_v11  ;;  %v1749_v9 = vld [vmem:[%s2760_s8 + $0x10] sm:$0xff] }
 0xb44   :  { %v2264_v61 = vpack.c.bf16 %v1750_v60, %v1749_v9 }
 0xb46   :  { %v1037_v36 = vpop.permute.xlu1 %1036 }
 0xb4a   :  { %v1041_v53 = vpop.permute.xlu1 %1040 }
 0xb4d   :  { %v2366_v50 = vpop.eup %2365 }
 0xb4e   :  { %v1648_v0 = vsel %vm425_vm4, %v2366_v50, 0.0 }
 0xb4f   :  { %1649 = vadd.xlane.f32.xlu0 %v1648_v0 }
 0xb65   :  { %2333 = vrot.lane.b32.xlu0 %v2593_v1, %s2378_s7  ;;  %v1044_v1 = vsel %vm425_vm4, %v1043_v54, %v1037_v36 }
 0xb66   :  { %v1046_v56 = vsel %vm1045_vm5, %v1044_v1, %v1041_v53 }
 0xb69   :  { %1733 = vrot.lane.b32.xlu0 %v1382_v8, %s2379_s21  ;;  %v1937_v8 = vld [vmem:[%s2761_s9] ss:$0 sm:$0xff] }
 0xb6d   :  { %1737 = vrot.lane.b32.xlu0 %v1555_v32, %s2380_s22  ;;  %v1940_v32 = vld [vmem:[%s2762_s10] ss:$0 sm:$0xff] }
 0xbdc   :  { %v1650_v48 = vpop.xlane.xlu0 %1649 }
 0xbdd   :  { %2367 = vrcp.f32 %v1650_v48 }
 0xbe0   :  { %v2334_v14 = vpop.permute.xlu0 %2333 }
 0xbe1   :  { %v2336_v42 = vunpack.i.h.bf16 %v2334_v14  ;;  %v2335_v52 = vunpack.i.l.bf16 %v2334_v14 }
 0xbe3   :  { %v2258_v49 = vpack.c.bf16 %v2336_v42, %v2335_v52 }
 0xbe4   :  { %v1734_v2 = vpop.permute.xlu0 %1733 }
 0xbe5   :  { %2259 = vmatpush3.bf16.msra.mxu0 %v2258_v49  ;;  %v1744_v4 = vsel %vm344_vm2, %v2662_v47, %v1734_v2 }
 0xbe6   :  { %2261 = vmatprep.subr.bf16.mxu0 %v2260_v59 }
 0xbe7   :  { %v2368_v51 = vpop.eup %2367 }
 0xbe8   :  { %v1652_v55 = vmul.f32 %v2368_v51, %v2366_v50  ;;  %v1738_v3 = vpop.permute.xlu0 %1737 }
 0xbe9   :  { %v1745_v5 = vsel %vm425_vm4, %v1744_v4, %v1738_v3 }
 0xbea   :  { %2167 = vmatmul.mubr.msk.f32.vlgmr.msra.gmra.mrb[16].mxu0 %vm425_vm4, %v1652_v55 }
 0xbeb   :  { %2177 = vmatprep.mubr.msk.f32.mxu0 %vm58_vm0, %v1046_v56  ;;  %2263 = vmatpush3.bf16.msra.mxu0 %v2260_v59 }
 0xbec   :  { %2265 = vmatprep.subr.bf16.mxu0 %v2264_v61 }
 0xbef   :  { %2267 = vmatpush3.bf16.msra.mxu0 %v2264_v61 }
 0xcbd   :  { %v1728_v62 = vpop.f32.mrb[16].mxu0 }
 0xcbe   :  { %1741 = vrot.lane.b32.xlu1 %v1728_v62, %s2381_s23  ;;  %v2168_v63 = vpop.f32.mrb[17].mxu0 }
 0xd30   :  { %v1742_v6 = vpop.permute.xlu1 %1741 }
 0xd31   :  { %v1746_v7 = vsel %vm1045_vm5, %v1745_v5, %v1742_v6 }
 0xd32   :  { %2178 = vmatmul.mubr.msk.f32.vlgmr.msra.gmra.mrb[18].mxu0 %vm58_vm0, %v1746_v7 }
 0xe05   :  { %v2179_v10 = vpop.f32.mrb[18].mxu0 }
 0xe06   :  { %v1836_v13 = vadd.f32 %v2179_v10, %v1937_v8  ;;  %v1830_v15 = vpop.f32.mrb[19].mxu0 }
 0xe07   :  { %v1831_v17 = vadd.f32 %v1937_v8, %v1830_v15 }
 0xe08   :  { %v1840_v20 = vadd.f32 %v1836_v13, %v2491_v16 }
 0xe09   :  { %v1839_v21 = vadd.f32 %v1831_v17, %v2478_v12 }
 0xe0a   :  { %v1846_v47 = vsel %vm58_vm0, %v1840_v20, 0.0 }
 0xe0b   :  { %1847 = vadd.xlane.f32.xlu1 %v1846_v47  ;;  %v1843_v22 = vsel %vm58_vm0, %v1839_v21, 0.0 }
 0xe0c   :  { %1844 = vadd.xlane.f32.xlu0 %v1843_v22 }
 0xe98   :  { %v1848_v23 = vpop.xlane.xlu1 %1847 }
 0xe99   :  { %v1851_v24 = vmul.f32 0.03125, %v1848_v23  ;;  %v1845_v25 = vpop.xlane.xlu0 %1844 }
 0xe9a   :  { %v1850_v26 = vmul.f32 0.03125, %v1845_v25 }
 0xe9b   :  { %v1853_v27 = vsub.f32 %v1840_v20, %v1851_v24 }
 0xe9c   :  { %v1852_v28 = vsub.f32 %v1839_v21, %v1850_v26 }
 0xe9d   :  { %v1855_v33 = vmul.f32 %v1853_v27, %v1853_v27 }
 0xe9e   :  { %v1854_v29 = vmul.f32 %v1852_v28, %v1852_v28 }
 0xe9f   :  { %v1859_v16 = vsel %vm58_vm0, %v1855_v33, 0.0 }
 0xea0   :  { %v1856_v30 = vsel %vm58_vm0, %v1854_v29, 0.0 }
 0xea1   :  { %1857 = vadd.xlane.f32.xlu0 %v1856_v30 }
 0xea5   :  { %1860 = vadd.xlane.f32.xlu0 %v1859_v16 }
 0xf2e   :  { %v1858_v12 = vpop.xlane.xlu0 %1857 }
 0xf2f   :  { %v1862_v31 = vmul.f32 0.03125, %v1858_v12 }
 0xf31   :  { %v1864_v34 = vadd.f32 1e-05, %v1862_v31 }
 0xf32   :  { %v1861_v35 = vpop.xlane.xlu0 %1860 }
 0xf33   :  { %2369 = vrsqrt.f32 %v1864_v34  ;;  %v1863_v38 = vmul.f32 0.03125, %v1861_v35 }
 0xf35   :  { %v1865_v40 = vadd.f32 1e-05, %v1863_v38 }
 0xf37   :  { %2371 = vrsqrt.f32 %v1865_v40 }
 0xf3d   :  { %v2370_v18 = vpop.eup %2369 }
 0xf3e   :  { %v1868_v43 = vmul.f32 %v2370_v18, %v1852_v28 }
 0xf40   :  { %v1876_v39 = vmul.f32 %v1940_v32, %v1868_v43 }
 0xf41   :  { %v2372_v41 = vpop.eup %2371 }
 0xf42   :  { %v1884_v45 = vadd.f32 %v1941_v44, %v1876_v39  ;;  %v1869_v19 = vmul.f32 %v2372_v41, %v1853_v27 }
 0xf44   :  { %1886 = vst.msk [vmem:[%s2764_s12] sm:$0xff] %vm58_vm0, %v1884_v45  ;;  %v1877_v37 = vmul.f32 %v1940_v32, %v1869_v19 }
 0xf46   :  { %v1885_v46 = vadd.f32 %v1941_v44, %v1877_v37 }
 0xf48   :  { %1887 = vst.msk [vmem:[%s2764_s12 + $0x8] sm:$0xff] %vm58_vm0, %v1885_v46 }

</bundles_post_ra>
